<compile_context>
chip_gen: v6e
topology: v6e:2x2x1
jax: 0.10.0
libtpu: 0.0.40
codegen_flags: <defaults>
</compile_context>

<pallas_src>
import functools

import jax
import jax.numpy as jnp
from jax import lax
from jax.experimental import pallas as pl
from jax.experimental.pallas import tpu as pltpu

# ---- static model configuration (module defaults) ----
MAX_LENGTH = 32            # NeuralPhiRanker default max_length
HIDDEN = 64                # rank_net hidden dim (module default)
C1 = 16                    # conv1 output channels
C2 = 32                    # conv2 output channels
K2 = 3                     # conv2 kernel size
L1 = MAX_LENGTH - 1        # conv1 'valid' output length (k=2)
L2 = MAX_LENGTH - 3        # conv2 'valid' output length (k=3 after k=2)
FEAT = C2 + 2              # pooled channels + length + density
FEAT_PAD = 40              # FEAT padded to a multiple of 8
N_PAT = 16                 # 4-bit window -> 16 possible conv2 outputs
BATCH = 2                  # test batch
BATCH_TILE = 512           # traces per grid block (= lane width of the output)
LANES = 128
COL_BIAS = 127             # lane holding the MLP biases inside the W blocks

# ---- packed parameter buffer layout: one (ROWS, 128) f32 array ----
R_WL3 = 0                                   # row 0:  Linear(H,1) weight (:64)
R_BL3 = 1                                   # row 1:  Linear(H,1) bias (lane 0)
ROW_TT = 8                                  # (C2, 16) transposed conv LUT
ROW_WL1 = ROW_TT + C2                       # (HIDDEN, FEAT_PAD) + bias @ lane 127
ROW_WL2 = ROW_WL1 + HIDDEN                  # (HIDDEN, HIDDEN)   + bias @ lane 127
ROWS = ROW_WL2 + HIDDEN                     # 168 rows total


def phi_ranker_kernel(x_ref, p_ref, o_ref, *, inv_max_length):
    x = x_ref[...]                                   # (L, BT) f32 binary, batch on lanes
    length, bt = x.shape

    # ---- unpack packed parameters (static slices; single resident DMA) ----
    wl3 = p_ref[R_WL3:R_WL3 + 1, :HIDDEN]            # (1, 64)
    bl3 = p_ref[R_BL3:R_BL3 + 1, 0:1]                # (1, 1)
    tableT = p_ref[ROW_TT:ROW_TT + C2, :N_PAT]       # (32, 16) LUT, channels-major
    wl1 = p_ref[ROW_WL1:ROW_WL1 + HIDDEN, :FEAT_PAD]                 # (64, 40)
    bl1 = p_ref[ROW_WL1:ROW_WL1 + HIDDEN, COL_BIAS:COL_BIAS + 1]     # (64, 1)
    wl2 = p_ref[ROW_WL2:ROW_WL2 + HIDDEN, :HIDDEN]                   # (64, 64)
    bl2 = p_ref[ROW_WL2:ROW_WL2 + HIDDEN, COL_BIAS:COL_BIAS + 1]     # (64, 1)

    # ---- conv1+ReLU -> conv2+ReLU -> avg-pool via 16-entry LUT ----
    xi = x.astype(jnp.int32)                         # exact (binary) cast
    idx = (8 * xi[0:L2] + 4 * xi[1:L2 + 1]
           + 2 * xi[2:L2 + 2] + xi[3:L2 + 3])        # (L2, BT) int in [0, 16)
    pat = lax.broadcasted_iota(jnp.int32, (N_PAT, L2, bt), 0)
    onehot = (idx[None, :, :] == pat).astype(jnp.float32)            # (16, L2, BT)
    counts = jnp.sum(onehot, axis=1)                                 # (16, BT)
    pooled = jnp.dot(tableT, counts,
                     preferred_element_type=jnp.float32) * (1.0 / L2)  # (32, BT)

    # ---- scalar features (uses the padded tensor length, exactly like the
    #      PyTorch forward: trace_length = trace.shape[1] for every row) ----
    # TODO(synk): true per-trace variable lengths would need a per-row length
    # input (scalar prefetch) plus masking of density and the LUT windows.
    length_feat = jnp.full((1, bt), length * inv_max_length, jnp.float32)
    density = jnp.mean(x, axis=0, keepdims=True)                     # (1, BT)
    extra = jnp.concatenate(
        [length_feat, density,
         jnp.zeros((FEAT_PAD - FEAT, bt), jnp.float32)], axis=0)     # (8, BT)
    feats = jnp.concatenate([pooled, extra], axis=0)                 # (40, BT)

    # ---- rank_net MLP, channels-on-sublanes / batch-on-lanes ----
    h = jnp.maximum(
        jnp.dot(wl1, feats, preferred_element_type=jnp.float32) + bl1, 0.0)
    h = jnp.maximum(
        jnp.dot(wl2, h, preferred_element_type=jnp.float32) + bl2, 0.0)
    out = jnp.dot(wl3, h, preferred_element_type=jnp.float32) + bl3  # (1, BT)
    o_ref[...] = out.astype(o_ref.dtype)


def neural_phi_ranker(trace, params, *, batch_tile=BATCH_TILE):
    """trace: (B, MAX_LENGTH) binary int tensor -> (B, 1) f32 predicted rank."""
    B, L = trace.shape
    assert L == MAX_LENGTH, (L, MAX_LENGTH)
    # Pre-transpose once: time on sublanes, batch on lanes (no in-kernel .T).
    xt = trace.astype(jnp.float32).T                 # (L, B)
    n_blocks = -(-B // batch_tile)
    b_pad = n_blocks * batch_tile
    if b_pad != B:
        xt = jnp.pad(xt, ((0, 0), (0, b_pad - B)))   # zero columns -> discarded
    kernel = functools.partial(phi_ranker_kernel,
                               inv_max_length=1.0 / MAX_LENGTH)
    out = pl.pallas_call(
        kernel,
        out_shape=jax.ShapeDtypeStruct((n_blocks, batch_tile), jnp.float32),
        grid=(n_blocks,),
        in_specs=[
            pl.BlockSpec((L, batch_tile), lambda i: (0, i)),
            pl.BlockSpec((ROWS, LANES), lambda i: (0, 0)),   # resident, 1 DMA
        ],
        out_specs=pl.BlockSpec((1, batch_tile), lambda i: (i, 0)),
        compiler_params=pltpu.CompilerParams(
            dimension_semantics=("parallel",)),
    )(xt, params['packed'])
    return out.reshape(b_pad, 1)[:B]


def pack_params(params):
    """Pack the conv LUT and MLP weights into one lane-dense (ROWS, 128) buffer."""
    w1, b1, w2, b2 = params['w1'], params['b1'], params['w2'], params['b2']
    wl1, bl1 = params['wl1'], params['bl1']
    wl2, bl2 = params['wl2'], params['bl2']
    wl3, bl3 = params['wl3'], params['bl3']

    # 16-entry LUT: every conv2 window sees only x[t..t+3].
    # bits[p] = [x_t, x_{t+1}, x_{t+2}, x_{t+3}] for pattern p = 8*x_t+4*x_{t+1}+2*x_{t+2}+x_{t+3}
    bits = ((jnp.arange(N_PAT)[:, None] >> jnp.arange(3, -1, -1)[None, :]) & 1
            ).astype(jnp.float32)                                   # (16, 4)
    w1a, w1b = w1[:, 0, 0], w1[:, 0, 1]
    y1 = jnp.maximum(bits[:, 0:3, None] * w1a[None, None, :]
                     + bits[:, 1:4, None] * w1b[None, None, :]
                     + b1[None, None, :], 0.0)                      # (16, 3, 16)
    y2 = jnp.einsum('pkc,dck->pd', y1, w2) + b2[None, :]            # (16, 32)
    table = jnp.maximum(y2, 0.0)                                    # ReLU(conv2) per pattern

    p = jnp.zeros((ROWS, LANES), jnp.float32)
    p = p.at[R_WL3, :HIDDEN].set(wl3[0])
    p = p.at[R_BL3, 0].set(bl3[0])
    p = p.at[ROW_TT:ROW_TT + C2, :N_PAT].set(table.T)               # (32, 16)
    # MLP weights stay in PyTorch (out, in) orientation: dots are W @ feats.
    p = p.at[ROW_WL1:ROW_WL1 + HIDDEN, :FEAT].set(wl1)              # cols 34..39 = 0
    p = p.at[ROW_WL1:ROW_WL1 + HIDDEN, COL_BIAS].set(bl1)
    p = p.at[ROW_WL2:ROW_WL2 + HIDDEN, :HIDDEN].set(wl2)
    p = p.at[ROW_WL2:ROW_WL2 + HIDDEN, COL_BIAS].set(bl2)
    return p


def init_params(key, hidden=HIDDEN):
    """Deterministic PyTorch-shaped parameters (uniform +-1/sqrt(fan_in))."""
    ks = jax.random.split(key, 10)

    def u(k, shape, fan_in):
        bound = 1.0 / float(fan_in) ** 0.5
        return jax.random.uniform(k, shape, jnp.float32, -bound, bound)

    params = dict(
        w1=u(ks[0], (C1, 1, 2), 1 * 2),              # Conv1d(1, 16, 2)
        b1=u(ks[1], (C1,), 1 * 2),
        w2=u(ks[2], (C2, C1, K2), C1 * K2),          # Conv1d(16, 32, 3)
        b2=u(ks[3], (C2,), C1 * K2),
        wl1=u(ks[4], (hidden, FEAT), FEAT),          # Linear(34, hidden)
        bl1=u(ks[5], (hidden,), FEAT),
        wl2=u(ks[6], (hidden, hidden), hidden),      # Linear(hidden, hidden)
        bl2=u(ks[7], (hidden,), hidden),
        wl3=u(ks[8], (1, hidden), hidden),           # Linear(hidden, 1)
        bl3=u(ks[9], (1,), hidden),
    )
    params['packed'] = pack_params(params)
    return params


def reference_forward(trace, params):
    """Pure-JAX reference matching the PyTorch forward (NCL layout)."""
    B, L = trace.shape
    xf = trace.astype(jnp.float32)
    x = xf[:, None, :]                               # (B, 1, L)
    dn = ('NCH', 'OIH', 'NCH')
    y1 = lax.conv_general_dilated(x, params['w1'], (1,), 'VALID',
                                  dimension_numbers=dn)
    y1 = jnp.maximum(y1 + params['b1'][None, :, None], 0.0)
    y2 = lax.conv_general_dilated(y1, params['w2'], (1,), 'VALID',
                                  dimension_numbers=dn)
    y2 = jnp.maximum(y2 + params['b2'][None, :, None], 0.0)
    pooled = jnp.mean(y2, axis=-1)                   # AdaptiveAvgPool1d(1)
    length_feat = jnp.full((B, 1), L / MAX_LENGTH, dtype=jnp.float32)
    density = jnp.mean(xf, axis=1, keepdims=True)
    feats = jnp.concatenate([pooled, length_feat, density], axis=1)
    h = jnp.maximum(feats @ params['wl1'].T + params['bl1'], 0.0)
    h = jnp.maximum(h @ params['wl2'].T + params['bl2'], 0.0)
    return h @ params['wl3'].T + params['bl3']


if __name__ == "__main__":
    key = jax.random.PRNGKey(0)
    pkey, tkey = jax.random.split(key)
    params = init_params(pkey)

    # (B, L) binary trace input, L == max_length (as in learn_ranking).
    trace = jax.random.randint(tkey, (BATCH, MAX_LENGTH), 0, 2, dtype=jnp.int32)

    out = jax.block_until_ready(neural_phi_ranker(trace, params))
    ref = reference_forward(trace, params)

    assert out.shape == (BATCH, 1), out.shape
    assert jnp.allclose(out, ref, atol=1e-4, rtol=1e-4), (out, ref)
    print("KERNEL_OK")
</pallas_src>

<mosaic_0001>
module attributes {stable_mosaic.version = 11 : i64} {
  func.func @phi_ranker_kernel(%arg0: i32, %arg1: memref<32x512xf32, #tpu.memory_space<vmem>>, %arg2: memref<168x128xf32, #tpu.memory_space<vmem>>, %arg3: memref<1x512xf32, #tpu.memory_space<vmem>>) attributes {dimension_semantics = [#tpu.dimension_semantics<parallel>], iteration_bounds = array<i64: 1>, scalar_prefetch = 0 : i64, scratch_operands = 0 : i64, tpu.core_type = #tpu.core_type<tc>, window_params = [{transform_indices = @transform_0, window_bounds = array<i64: 32, 512>}, {pipeline_mode = #tpu.pipeline_mode<synchronous>, transform_indices = @transform_1, window_bounds = array<i64: 168, 128>}, {transform_indices = @transform_2, window_bounds = array<i64: 1, 512>}]} {
    %c0 = arith.constant 0 : index
    %c0_0 = arith.constant 0 : index
    %0 = vector.load %arg1[%c0, %c0_0] : memref<32x512xf32, #tpu.memory_space<vmem>>, vector<32x512xf32>
    %c0_1 = arith.constant 0 : index
    %c0_2 = arith.constant 0 : index
    %1 = vector.load %arg2[%c0_1, %c0_2] : memref<168x128xf32, #tpu.memory_space<vmem>>, vector<1x64xf32>
    %c1 = arith.constant 1 : index
    %c0_3 = arith.constant 0 : index
    %2 = vector.load %arg2[%c1, %c0_3] : memref<168x128xf32, #tpu.memory_space<vmem>>, vector<1x1xf32>
    %c8 = arith.constant 8 : index
    %c0_4 = arith.constant 0 : index
    %3 = vector.load %arg2[%c8, %c0_4] : memref<168x128xf32, #tpu.memory_space<vmem>>, vector<32x16xf32>
    %c40 = arith.constant 40 : index
    %c0_5 = arith.constant 0 : index
    %4 = vector.load %arg2[%c40, %c0_5] : memref<168x128xf32, #tpu.memory_space<vmem>>, vector<64x40xf32>
    %c40_6 = arith.constant 40 : index
    %c127 = arith.constant 127 : index
    %5 = vector.load %arg2[%c40_6, %c127] : memref<168x128xf32, #tpu.memory_space<vmem>>, vector<64x1xf32>
    %c104 = arith.constant 104 : index
    %c0_7 = arith.constant 0 : index
    %6 = vector.load %arg2[%c104, %c0_7] : memref<168x128xf32, #tpu.memory_space<vmem>>, vector<64x64xf32>
    %c104_8 = arith.constant 104 : index
    %c127_9 = arith.constant 127 : index
    %7 = vector.load %arg2[%c104_8, %c127_9] : memref<168x128xf32, #tpu.memory_space<vmem>>, vector<64x1xf32>
    %8 = arith.fptosi %0 : vector<32x512xf32> to vector<32x512xi32>
    %9 = vector.extract_strided_slice %8 {offsets = [0, 0], sizes = [29, 512], strides = [1, 1]} : vector<32x512xi32> to vector<29x512xi32>
    %c8_i32 = arith.constant 8 : i32
    %10 = vector.broadcast %c8_i32 : i32 to vector<29x512xi32>
    %11 = arith.muli %10, %9 : vector<29x512xi32>
    %12 = vector.extract_strided_slice %8 {offsets = [1, 0], sizes = [29, 512], strides = [1, 1]} : vector<32x512xi32> to vector<29x512xi32>
    %c4_i32 = arith.constant 4 : i32
    %13 = vector.broadcast %c4_i32 : i32 to vector<29x512xi32>
    %14 = arith.muli %13, %12 : vector<29x512xi32>
    %15 = arith.addi %11, %14 : vector<29x512xi32>
    %16 = vector.extract_strided_slice %8 {offsets = [2, 0], sizes = [29, 512], strides = [1, 1]} : vector<32x512xi32> to vector<29x512xi32>
    %c2_i32 = arith.constant 2 : i32
    %17 = vector.broadcast %c2_i32 : i32 to vector<29x512xi32>
    %18 = arith.muli %17, %16 : vector<29x512xi32>
    %19 = arith.addi %15, %18 : vector<29x512xi32>
    %20 = vector.extract_strided_slice %8 {offsets = [3, 0], sizes = [29, 512], strides = [1, 1]} : vector<32x512xi32> to vector<29x512xi32>
    %21 = arith.addi %19, %20 : vector<29x512xi32>
    %22 = tpu.iota {dimensions = array<i32: 0>} : vector<16x29x512xi32>
    %23 = vector.shape_cast %21 : vector<29x512xi32> to vector<1x29x512xi32>
    %24 = vector.broadcast %23 : vector<1x29x512xi32> to vector<16x29x512xi32>
    %25 = arith.cmpi eq, %24, %22 : vector<16x29x512xi32>
    %26 = arith.extui %25 : vector<16x29x512xi1> to vector<16x29x512xi32>
    %27 = arith.sitofp %26 : vector<16x29x512xi32> to vector<16x29x512xf32>
    %cst = arith.constant dense<0.000000e+00> : vector<16x512xf32>
    %28 = vector.multi_reduction <add>, %27, %cst [1] : vector<16x29x512xf32> to vector<16x512xf32>
    %cst_10 = arith.constant dense<0.000000e+00> : vector<32x512xf32>
    %29 = tpu.matmul %3, %28, %cst_10 {dimension_numbers = #tpu.dot_dimension_numbers<[1], [0], [0], [1], [0, 0, 1, 1], [], []>} : vector<32x16xf32>, vector<16x512xf32>, vector<32x512xf32> -> vector<32x512xf32>
    %cst_11 = arith.constant 0.0344827585 : f32
    %30 = vector.broadcast %cst_11 : f32 to vector<32x512xf32>
    %31 = arith.mulf %29, %30 : vector<32x512xf32>
    %cst_12 = arith.constant 1.000000e+00 : f32
    %32 = vector.broadcast %cst_12 : f32 to vector<1x512xf32>
    %cst_13 = arith.constant dense<0.000000e+00> : vector<512xf32>
    %33 = vector.multi_reduction <add>, %0, %cst_13 [0] : vector<32x512xf32> to vector<512xf32>
    %34 = vector.shape_cast %33 : vector<512xf32> to vector<1x512xf32>
    %cst_14 = arith.constant 3.200000e+01 : f32
    %35 = vector.broadcast %cst_14 : f32 to vector<1x512xf32>
    %36 = arith.divf %34, %35 : vector<1x512xf32>
    %cst_15 = arith.constant 0.000000e+00 : f32
    %37 = vector.broadcast %cst_15 : f32 to vector<6x512xf32>
    %38 = tpu.concatenate %32, %36, %37 in 0 : vector<1x512xf32>, vector<1x512xf32>, vector<6x512xf32> -> vector<8x512xf32>
    %39 = tpu.concatenate %31, %38 in 0 : vector<32x512xf32>, vector<8x512xf32> -> vector<40x512xf32>
    %cst_16 = arith.constant dense<0.000000e+00> : vector<64x512xf32>
    %40 = tpu.matmul %4, %39, %cst_16 {dimension_numbers = #tpu.dot_dimension_numbers<[1], [0], [0], [1], [0, 0, 1, 1], [], []>} : vector<64x40xf32>, vector<40x512xf32>, vector<64x512xf32> -> vector<64x512xf32>
    %41 = vector.broadcast %5 : vector<64x1xf32> to vector<64x512xf32>
    %42 = arith.addf %40, %41 : vector<64x512xf32>
    %cst_17 = arith.constant 0.000000e+00 : f32
    %43 = vector.broadcast %cst_17 : f32 to vector<64x512xf32>
    %44 = arith.maximumf %42, %43 : vector<64x512xf32>
    %cst_18 = arith.constant dense<0.000000e+00> : vector<64x512xf32>
    %45 = tpu.matmul %6, %44, %cst_18 {dimension_numbers = #tpu.dot_dimension_numbers<[1], [0], [0], [1], [0, 0, 1, 1], [], []>} : vector<64x64xf32>, vector<64x512xf32>, vector<64x512xf32> -> vector<64x512xf32>
    %46 = vector.broadcast %7 : vector<64x1xf32> to vector<64x512xf32>
    %47 = arith.addf %45, %46 : vector<64x512xf32>
    %cst_19 = arith.constant 0.000000e+00 : f32
    %48 = vector.broadcast %cst_19 : f32 to vector<64x512xf32>
    %49 = arith.maximumf %47, %48 : vector<64x512xf32>
    %cst_20 = arith.constant dense<0.000000e+00> : vector<1x512xf32>
    %50 = tpu.matmul %1, %49, %cst_20 {dimension_numbers = #tpu.dot_dimension_numbers<[1], [0], [0], [1], [0, 0, 1, 1], [], []>} : vector<1x64xf32>, vector<64x512xf32>, vector<1x512xf32> -> vector<1x512xf32>
    %51 = vector.broadcast %2 : vector<1x1xf32> to vector<1x512xf32>
    %52 = arith.addf %50, %51 : vector<1x512xf32>
    %c0_21 = arith.constant 0 : index
    %c0_22 = arith.constant 0 : index
    %53 = vector.load %arg3[%c0_21, %c0_22] : memref<1x512xf32, #tpu.memory_space<vmem>>, vector<1x512xf32>
    tpu.vector_store %arg3[%c0_21, %c0_22], %52 {strides = array<i32>} : memref<1x512xf32, #tpu.memory_space<vmem>>, vector<1x512xf32>,
    return
  }
  func.func @transform_0(%arg0: i32) -> (i32, i32) {
    %c0_i32 = arith.constant 0 : i32
    %c0_i32_0 = arith.constant 0 : i32
    return %c0_i32, %arg0 : i32, i32
  }
  func.func @transform_1(%arg0: i32) -> (i32, i32) {
    %c0_i32 = arith.constant 0 : i32
    %c0_i32_0 = arith.constant 0 : i32
    %c0_i32_1 = arith.constant 0 : i32
    return %c0_i32, %c0_i32_0 : i32, i32
  }
  func.func @transform_2(%arg0: i32) -> (i32, i32) {
    %c0_i32 = arith.constant 0 : i32
    %c0_i32_0 = arith.constant 0 : i32
    return %arg0, %c0_i32 : i32, i32
  }
}

</mosaic_0001>

<bundles_post_ra>
// kernel: tpu_custom_call.1
= control target key start
LH: loop header
LB: loop body
LE: loop exit
PB: predicated region body
PF: predicated region fallthrough
CT: control target
= control target key end

     0   :  { %7 = vsyncpa [#allocation3], 0  ;;  %s4951_s0 = inlined_call_operand.hbm [shape: f32[32,512], index: 0, kind: input, shape index: {}]   ;;  %s4952_s1 = inlined_call_operand.hbm [shape: f32[168,128], index: 1, kind: input, shape index: {}]   ;;  %s4953_s2 = inlined_call_operand.hbm [shape: f32[1,512], index: 2, kind: output, shape index: {}]  }
   0x1   :  { %8 = vsyncpa [#allocation6], 0 }
   0x2   :  { %9 = vsyncpa [#allocation4], 0  ;;  %s3338_s9 = smov [#allocation2]  }
   0x3   :  { %s15_s10 = sshll.u32 %s3338_s9, 4  ;;  %s16_s10 = int_to_ptr.vmem [resolvable:$true] %s15_s10 }
   0x4   :  { %s3280_s11 = scalar_lea.vmem %s16_s10, 2048  ;;  %p3285_p1 = scmp.lt.s32.totalorder %s16_s10, %s16_s10 }
   0x5   :  { %p3281_p0 = scmp.ne.s32.totalorder %s16_s10, %s3280_s11  ;;  %p3286_p2 = scmp.lt.s32.totalorder %s3280_s11, %s3280_s11 }
   0x7   :  { %p3287_p3 = por %p3286_p2, %p3285_p1 }
   0x9   :  { %p3288_p4 = pnand %p3287_p3, %p3281_p0 }
   0xb   :  { %3291 = shalt.err (!%p3288_p4)
}
   0xc   :  { %s3339_s12 = smov 512   ;;  %s3340_s13 = smov 32  }
   0xd   :  { %21 = dma.hbm_to_vmem [thread:$0]  %s4951_s0, 2048, %s16_s10, [#allocation3], %s3339_s12, %s3339_s12, %s3340_s13  }
   0xe   :  { %s3341_s16 = smov [#allocation5]  }
   0xf   :  { %s27_s17 = sshll.u32 %s3341_s16, 4  ;;  %s28_s17 = int_to_ptr.vmem [resolvable:$true] %s27_s17 }
  0x10   :  { %s3300_s18 = scalar_lea.vmem %s28_s17, 2688  ;;  %p3305_p6 = scmp.lt.s32.totalorder %s28_s17, %s28_s17 }
  0x11   :  { %p3301_p5 = scmp.ne.s32.totalorder %s28_s17, %s3300_s18  ;;  %p3306_p7 = scmp.lt.s32.totalorder %s3300_s18, %s3300_s18 }
  0x13   :  { %p3307_p8 = por %p3306_p7, %p3305_p6 }
  0x15   :  { %p3308_p9 = pnand %p3307_p8, %p3301_p5 }
  0x17   :  { %3311 = shalt.err (!%p3308_p9)
}
  0x18   :  { %s3342_s19 = smov 128   ;;  %s3343_s20 = smov 8  }
  0x19   :  { %33 = dma.hbm_to_vmem [thread:$0]  %s4952_s1, 2688, %s28_s17, [#allocation6], %s3342_s19, %s3342_s19, %s3343_s20  }
  0x1a   :  { %3332 = dma.done.wait [#allocation3], 2048  }
  0x1b   :  { %3333 = vsyncadd [#allocation3], 4294965248 }
  0x1c   :  { %3334 = dma.done.wait [#allocation6], 2688  }
  0x1d   :  { %3335 = vsyncadd [#allocation6], 4294964608  ;;  %v3344_v0 = vmov 0.0   ;;  %v41_v1 = vld [vmem:[#allocation2 + $0x8] sm:$0xff]  ;;  %vm4955_vm0 = vcmask 1046528   ;;  %v43_v8 = vld [vmem:[#allocation2 + $0x18] sm:$0xff] }
  0x1e   :  { %1897 = vmatprep.mubr.f32.mxu0 %v3344_v0  ;;  %1986 = vmatprep.mubr.f32.mxu1 %v3344_v0  ;;  %v45_v2 = vld [vmem:[#allocation2 + $0x28] sm:$0xff]  ;;  %v3212_v5 = vtrunc.f32 %v41_v1  ;;  %v47_v9 = vld [vmem:[#allocation2 + $0x38] sm:$0xff]  ;;  %vm4954_vm1 = vcmask 1045504   ;;  %vm4956_vm2 = vcmask 1044480   ;;  %v3216_v13 = vtrunc.f32 %v43_v8  ;;  %s3348_s0 = smov [#allocation7]  }
  0x1f   :  { %v49_v3 = vld [vmem:[#allocation2 + $0x48] sm:$0xff]  ;;  %v3220_v6 = vtrunc.f32 %v45_v2  ;;  %v51_v11 = vld [vmem:[#allocation2 + $0x58] sm:$0xff]  ;;  %v3224_v14 = vtrunc.f32 %v47_v9  ;;  %s2898_s1 = sshll.u32 %s3348_s0, 4  ;;  %s2899_s1 = int_to_ptr.vmem [resolvable:$true] %s2898_s1 }
  0x20   :  { %v53_v4 = vld [vmem:[#allocation2 + $0x68] sm:$0xff]  ;;  %v3228_v7 = vtrunc.f32 %v49_v3  ;;  %v55_v12 = vld [vmem:[#allocation2 + $0x78] sm:$0xff]  ;;  %v3213_v15 = vcvt.f32.s32 %v3212_v5  ;;  %v3232_v18 = vtrunc.f32 %v51_v11  ;;  %v3372_v20 = vcvt.f32.s32 %v3216_v13  ;;  %s3312_s23 = scalar_lea.vmem %s2899_s1, 64  ;;  %p3317_p11 = scmp.lt.s32.totalorder %s2899_s1, %s2899_s1 }
  0x21   :  { %v3236_v10 = vtrunc.f32 %v53_v4  ;;  %v3221_v16 = vcvt.f32.s32 %v3220_v6  ;;  %v3374_v21 = vcvt.f32.s32 %v3224_v14  ;;  %v3240_v22 = vtrunc.f32 %v55_v12  ;;  %p3313_p10 = scmp.ne.s32.totalorder %s2899_s1, %s3312_s23  ;;  %p3318_p12 = scmp.lt.s32.totalorder %s3312_s23, %s3312_s23 }
  0x22   :  { %v3229_v17 = vcvt.f32.s32 %v3228_v7  ;;  %v95_v23 = vmul.u32 8, %v3213_v15  ;;  %v236_v25 = vrot.slane %v3213_v15, 3  ;;  %v111_v31 = vmul.u32 4, %v3213_v15 }
  0x23   :  { %v3237_v19 = vcvt.f32.s32 %v3236_v10  ;;  %v99_v24 = vmul.u32 8, %v3221_v16  ;;  %v237_v26 = vrot.slane %v3221_v16, 3  ;;  %v115_v32 = vmul.u32 4, %v3221_v16  ;;  %p3319_p13 = por %p3318_p12, %p3317_p11 }
  0x24   :  { %v103_v27 = vmul.u32 8, %v3229_v17  ;;  %v247_v29 = vrot.slane %v3229_v17, 3  ;;  %v3377_v34 = vcvt.f32.s32 %v3232_v18  ;;  %v119_v35 = vmul.u32 4, %v3229_v17 }
  0x25   :  { %v107_v28 = vmul.u32 8, %v3237_v19  ;;  %v255_v30 = vrot.slane %v3237_v19, 3  ;;  %v238_v33 = vsel %vm4956_vm2, %v236_v25, %v237_v26  ;;  %v123_v36 = vmul.u32 4, %v3237_v19  ;;  %p3320_p0 = pnand %p3319_p13, %p3313_p10 }
  0x26   :  { %v248_v37 = vsel %vm4956_vm2, %v237_v26, %v247_v29  ;;  %v130_v39 = vrot.slane %v111_v31, 1  ;;  %v131_v40 = vrot.slane %v115_v32, 1  ;;  %v172_v41 = vmul.u32 2, %v3213_v15 }
  0x27   :  { %v256_v38 = vsel %vm4956_vm2, %v247_v29, %v255_v30  ;;  %v176_v42 = vmul.u32 2, %v3221_v16  ;;  %v141_v43 = vrot.slane %v119_v35, 1  ;;  %v149_v44 = vrot.slane %v123_v36, 1 }
  0x28   :  { %v180_v45 = vmul.u32 2, %v3229_v17  ;;  %v184_v46 = vmul.u32 2, %v3237_v19  ;;  %v132_v47 = vsel %vm4955_vm0, %v130_v39, %v131_v40  ;;  %v191_v48 = vrot.slane %v172_v41, 2 }
  0x29   :  { %v192_v49 = vrot.slane %v176_v42, 2  ;;  %v3382_v50 = vcvt.f32.s32 %v3240_v22  ;;  %v142_v51 = vsel %vm4955_vm0, %v131_v40, %v141_v43  ;;  %v150_v52 = vsel %vm4955_vm0, %v141_v43, %v149_v44 }
  0x2a   :  { %v156_v53 = vadd.s32 %v132_v47, %v95_v23  ;;  %v168_v54 = vadd.s32 %v149_v44, %v107_v28  ;;  %v160_v55 = vadd.s32 %v142_v51, %v99_v24  ;;  %v164_v56 = vadd.s32 %v150_v52, %v103_v27 }
  0x2b   :  { %v193_v57 = vsel %vm4954_vm1, %v191_v48, %v192_v49  ;;  %v202_v58 = vrot.slane %v180_v45, 2  ;;  %v210_v59 = vrot.slane %v184_v46, 2  ;;  %v97_v61 = vmul.u32 8, %v3372_v20 }
  0x2c   :  { %v217_v60 = vadd.s32 %v193_v57, %v156_v53  ;;  %v101_v62 = vmul.u32 8, %v3374_v21  ;;  %v105_v1 = vmul.u32 8, %v3377_v34  ;;  %v242_v3 = vrot.slane %v3372_v20, 3 }
  0x2d   :  { %v203_v63 = vsel %vm4954_vm1, %v192_v49, %v202_v58  ;;  %v109_v2 = vmul.u32 8, %v3382_v50  ;;  %v211_v4 = vsel %vm4954_vm1, %v202_v58, %v210_v59  ;;  %v229_v6 = vadd.s32 %v210_v59, %v168_v54 }
  0x2e   :  { %v221_v5 = vadd.s32 %v203_v63, %v160_v55  ;;  %v3394_v7 = vadd.s32 %v238_v33, %v217_v60  ;;  %v225_v8 = vadd.s32 %v211_v4, %v164_v56  ;;  %v113_v9 = vmul.u32 4, %v3372_v20 }
  0x2f   :  { %v117_v10 = vmul.u32 4, %v3374_v21  ;;  %v243_v11 = vrot.slane %v3374_v21, 3  ;;  %v3401_v13 = vadd.s32 %v255_v30, %v229_v6 }
  0x30   :  { %v3399_v12 = vadd.s32 %v248_v37, %v221_v5  ;;  %vm406_vm3 = vcmp.eq.s32.totalorder %v3394_v7, 8  ;;  %vm422_vm4 = vcmp.eq.s32.totalorder %v3394_v7, 9  ;;  %v3405_v14 = vadd.s32 %v256_v38, %v225_v8 }
  0x31   :  { %vm418_vm9 = vcmp.eq.s32.totalorder %v3401_v13, 8  ;;  %vm498_vm1 = vcmp.eq.s32.totalorder %v3401_v13, 13  ;;  %vm502_vm0 = vcmp.eq.s32.totalorder %v3394_v7, 14  ;;  %vm514_vm6 = vcmp.eq.s32.totalorder %v3401_v13, 14 }
  0x32   :  { %vm410_vm8 = vcmp.eq.s32.totalorder %v3399_v12, 8  ;;  %vm426_vm10 = vcmp.eq.s32.totalorder %v3399_v12, 9  ;;  %vm414_vm12 = vcmp.eq.s32.totalorder %v3405_v14, 8  ;;  %vm494_vm15 = vcmp.eq.s32.totalorder %v3405_v14, 13 }
  0x33   :  { %vm506_vm2 = vcmp.eq.s32.totalorder %v3399_v12, 14  ;;  %vm510_vm7 = vcmp.eq.s32.totalorder %v3405_v14, 14  ;;  %vm518_vm5 = vcmp.eq.s32.totalorder %v3394_v7, 15  ;;  %vm522_vm11 = vcmp.eq.s32.totalorder %v3399_v12, 15 }
  0x34   :  { %vm526_vm13 = vcmp.eq.s32.totalorder %v3405_v14, 15  ;;  %vm530_vm14 = vcmp.eq.s32.totalorder %v3401_v13, 15  ;;  %v3037_v15 = vsel %vm406_vm3, 1.0, %v3344_v0  ;;  %v3041_v16 = vsel %vm410_vm8, 1.0, %v3344_v0 }
  0x35   :  { %v3045_v17 = vsel %vm414_vm12, 1.0, %v3344_v0  ;;  %v3049_v18 = vsel %vm418_vm9, 1.0, %v3344_v0  ;;  %v3053_v19 = vsel %vm422_vm4, 1.0, %v3344_v0  ;;  %v3057_v22 = vsel %vm426_vm10, 1.0, %v3344_v0 }
  0x36   :  { %vm4964_vm3 = vcmp.eq.s32.totalorder %v3405_v14, 9  ;;  %vm4965_vm8 = vcmp.eq.s32.totalorder %v3401_v13, 9  ;;  %vm4966_vm12 = vcmp.eq.s32.totalorder %v3394_v7, 10  ;;  %vm4967_vm9 = vcmp.eq.s32.totalorder %v3399_v12, 10 }
  0x37   :  { %v3061_v23 = vsel %vm4964_vm3, 1.0, %v3344_v0  ;;  %v3065_v24 = vsel %vm4965_vm8, 1.0, %v3344_v0  ;;  %v3069_v25 = vsel %vm4966_vm12, 1.0, %v3344_v0  ;;  %v3073_v26 = vsel %vm4967_vm9, 1.0, %v3344_v0 }
  0x38   :  { %vm4968_vm4 = vcmp.eq.s32.totalorder %v3405_v14, 10  ;;  %vm4969_vm10 = vcmp.eq.s32.totalorder %v3401_v13, 10  ;;  %vm4970_vm3 = vcmp.eq.s32.totalorder %v3394_v7, 11  ;;  %vm4971_vm8 = vcmp.eq.s32.totalorder %v3399_v12, 11 }
  0x39   :  { %v3077_v27 = vsel %vm4968_vm4, 1.0, %v3344_v0  ;;  %v3081_v28 = vsel %vm4969_vm10, 1.0, %v3344_v0  ;;  %v3085_v29 = vsel %vm4970_vm3, 1.0, %v3344_v0  ;;  %v3089_v30 = vsel %vm4971_vm8, 1.0, %v3344_v0 }
  0x3a   :  { %vm4972_vm12 = vcmp.eq.s32.totalorder %v3405_v14, 11  ;;  %vm4973_vm9 = vcmp.eq.s32.totalorder %v3401_v13, 11  ;;  %vm4974_vm4 = vcmp.eq.s32.totalorder %v3394_v7, 12  ;;  %vm4975_vm10 = vcmp.eq.s32.totalorder %v3399_v12, 12 }
  0x3b   :  { %v3093_v31 = vsel %vm4972_vm12, 1.0, %v3344_v0  ;;  %v3097_v32 = vsel %vm4973_vm9, 1.0, %v3344_v0  ;;  %v3101_v33 = vsel %vm4974_vm4, 1.0, %v3344_v0  ;;  %v3105_v35 = vsel %vm4975_vm10, 1.0, %v3344_v0 }
  0x3c   :  { %vm4976_vm3 = vcmp.eq.s32.totalorder %v3405_v14, 12  ;;  %vm4977_vm8 = vcmp.eq.s32.totalorder %v3401_v13, 12  ;;  %vm4978_vm12 = vcmp.eq.s32.totalorder %v3394_v7, 13  ;;  %vm4979_vm9 = vcmp.eq.s32.totalorder %v3399_v12, 13 }
  0x3d   :  { %v3109_v36 = vsel %vm4976_vm3, 1.0, %v3344_v0  ;;  %v3113_v37 = vsel %vm4977_vm8, 1.0, %v3344_v0  ;;  %v3117_v38 = vsel %vm4978_vm12, 1.0, %v3344_v0  ;;  %v3121_v39 = vsel %vm4979_vm9, 1.0, %v3344_v0 }
  0x3e   :  { %v3125_v40 = vsel %vm494_vm15, 1.0, %v3344_v0  ;;  %v3129_v41 = vsel %vm498_vm1, 1.0, %v3344_v0  ;;  %v3133_v42 = vsel %vm502_vm0, 1.0, %v3344_v0  ;;  %v3137_v43 = vsel %vm506_vm2, 1.0, %v3344_v0 }
  0x3f   :  { %v3141_v44 = vsel %vm510_vm7, 1.0, %v3344_v0  ;;  %v3145_v45 = vsel %vm514_vm6, 1.0, %v3344_v0  ;;  %v3149_v46 = vsel %vm518_vm5, 1.0, %v3344_v0  ;;  %v3153_v47 = vsel %vm522_vm11, 1.0, %v3344_v0 }
  0x40   :  { %v3157_v48 = vsel %vm526_vm13, 1.0, %v3344_v0  ;;  %v3161_v49 = vsel %vm530_vm14, 1.0, %v3344_v0  ;;  %v1375_v51 = vadd.f32 %v3041_v16, %v3037_v15  ;;  %vm4980_vm0 = vcmask 1044480  }
  0x41   :  { %v1377_v52 = vsel %vm4980_vm0, %v3049_v18, 0.0  ;;  %v1415_v53 = vadd.f32 %v3057_v22, %v3053_v19  ;;  %vm4981_vm1 = vmmov %vm4980_vm0  ;;  %v1455_v55 = vadd.f32 %v3073_v26, %v3069_v25  ;;  %v1495_v58 = vadd.f32 %v3089_v30, %v3085_v29 }
  0x42   :  { %v1417_v54 = vsel %vm4981_vm1, %v3065_v24, 0.0  ;;  %v1376_v56 = vadd.f32 %v3045_v17, %v1375_v51  ;;  %vm4982_vm2 = vmmov %vm4980_vm0  ;;  %v1535_v4 = vadd.f32 %v3105_v35, %v3101_v33  ;;  %v1575_v15 = vadd.f32 %v3121_v39, %v3117_v38 }
  0x43   :  { %v1457_v57 = vsel %vm4982_vm2, %v3081_v28, 0.0  ;;  %vm4983_vm5 = vmmov %vm4980_vm0  ;;  %v1416_v60 = vadd.f32 %v3061_v23, %v1415_v53  ;;  %v1456_v63 = vadd.f32 %v3077_v27, %v1455_v55  ;;  %v1496_v8 = vadd.f32 %v3093_v31, %v1495_v58 }
  0x44   :  { %v1497_v59 = vsel %vm4983_vm5, %v3097_v32, 0.0  ;;  %vm4984_vm6 = vmmov %vm4980_vm0  ;;  %v1378_v6 = vadd.f32 %v1377_v52, %v1376_v56  ;;  %v1536_v22 = vadd.f32 %v3109_v36, %v1535_v4  ;;  %v1615_v24 = vadd.f32 %v3137_v43, %v3133_v42 }
  0x45   :  { %v1537_v5 = vsel %vm4984_vm6, %v3113_v37, 0.0  ;;  %vm4985_vm7 = vmmov %vm4980_vm0  ;;  %v1418_v18 = vadd.f32 %v1417_v54, %v1416_v60  ;;  %v1458_v19 = vadd.f32 %v1457_v57, %v1456_v63  ;;  %v1498_v25 = vadd.f32 %v1497_v59, %v1496_v8 }
  0x46   :  { %v1577_v16 = vsel %vm4985_vm7, %v3129_v41, 0.0  ;;  %v1379_v17 = vrot.slane %v1378_v6, 4  ;;  %v1576_v26 = vadd.f32 %v3125_v40, %v1575_v15  ;;  %vm4986_vm11 = vmmov %vm4980_vm0  ;;  %v1538_v27 = vadd.f32 %v1537_v5, %v1536_v22 }
  0x47   :  { %v1617_v28 = vsel %vm4986_vm11, %v3145_v45, 0.0  ;;  %v1419_v29 = vrot.slane %v1418_v18, 4  ;;  %v1459_v23 = vrot.slane %v1458_v19, 4  ;;  %v1616_v30 = vadd.f32 %v3141_v44, %v1615_v24  ;;  %vm4987_vm10 = vmmov %vm4980_vm0 }
  0x48   :  { %v1380_v32 = vadd.f32 %v1379_v17, %v1378_v6  ;;  %v1499_v33 = vrot.slane %v1498_v25, 4  ;;  %v1578_v35 = vadd.f32 %v1577_v16, %v1576_v26  ;;  %v1655_v31 = vadd.f32 %v3153_v47, %v3149_v46  ;;  %vm4993_vm7 = vmmov %vm4982_vm2 }
  0x49   :  { %vm4963_vm13 = vcmask 1041409   ;;  %v1420_v37 = vadd.f32 %v1419_v29, %v1418_v18  ;;  %v1460_v38 = vadd.f32 %v1459_v23, %v1458_v19  ;;  %v1539_v39 = vrot.slane %v1538_v27, 4  ;;  %vm4994_vm11 = vmmov %vm4982_vm2 }
  0x4a   :  { %v1618_v41 = vadd.f32 %v1617_v28, %v1616_v30  ;;  %vm4962_vm14 = vcmask 1042434   ;;  %v1381_v36 = vrot.slane %v1380_v32, 2  ;;  %v1500_v42 = vadd.f32 %v1499_v33, %v1498_v25 }
  0x4b   :  { %v1579_v43 = vrot.slane %v1578_v35, 4  ;;  %v1656_v40 = vadd.f32 %v3157_v48, %v1655_v31  ;;  %vm4961_vm15 = vcmask 1043459   ;;  %v1421_v45 = vrot.slane %v1420_v37, 2 }
  0x4c   :  { %v1461_v51 = vrot.slane %v1460_v38, 2  ;;  %v1540_v52 = vadd.f32 %v1539_v39, %v1538_v27  ;;  %v1619_v53 = vrot.slane %v1618_v41, 4  ;;  %vm4960_vm4 = vcmask 1044484  }
  0x4d   :  { %v1382_v44 = vadd.f32 %v1381_v36, %v1380_v32  ;;  %v1501_v54 = vrot.slane %v1500_v42, 2  ;;  %v1580_v55 = vadd.f32 %v1579_v43, %v1578_v35  ;;  %v1657_v46 = vsel %vm4987_vm10, %v3161_v49, 0.0 }
  0x4e   :  { %vm4959_vm3 = vcmask 1045509   ;;  %v1422_v47 = vadd.f32 %v1421_v45, %v1420_v37  ;;  %v1462_v56 = vadd.f32 %v1461_v51, %v1460_v38  ;;  %v1541_v57 = vrot.slane %v1540_v52, 2 }
  0x4f   :  { %v1620_v58 = vadd.f32 %v1619_v53, %v1618_v41  ;;  %vm4958_vm8 = vcmask 1046534   ;;  %v1383_v59 = vrot.slane %v1382_v44, 1  ;;  %v1502_v60 = vadd.f32 %v1501_v54, %v1500_v42 }
  0x50   :  { %v1581_v48 = vrot.slane %v1580_v55, 2  ;;  %v1658_v63 = vadd.f32 %v1657_v46, %v1656_v40  ;;  %v1423_v4 = vrot.slane %v1422_v47, 1  ;;  %v1463_v5 = vrot.slane %v1462_v56, 1 }
  0x51   :  { %v1542_v6 = vadd.f32 %v1541_v57, %v1540_v52  ;;  %v1621_v8 = vrot.slane %v1620_v58, 2  ;;  %v1384_v15 = vadd.f32 %v1383_v59, %v1382_v44  ;;  %v1503_v16 = vrot.slane %v1502_v60, 1 }
  0x52   :  { %v1582_v18 = vadd.f32 %v1581_v48, %v1580_v55  ;;  %v1659_v19 = vrot.slane %v1658_v63, 4  ;;  %v1424_v22 = vadd.f32 %v1423_v4, %v1422_v47  ;;  %v1464_v49 = vadd.f32 %v1463_v5, %v1462_v56 }
  0x53   :  { %v1543_v24 = vrot.slane %v1542_v6, 1  ;;  %v1622_v17 = vadd.f32 %v1621_v8, %v1620_v58  ;;  %vm4957_vm12 = vcmask 1047559   ;;  %v1504_v25 = vadd.f32 %v1503_v16, %v1502_v60  ;;  %v40_v58 = vld [vmem:[#allocation2] sm:$0xff] }
  0x54   :  { %v1583_v26 = vrot.slane %v1582_v18, 1  ;;  %v1660_v28 = vadd.f32 %v1659_v19, %v1658_v63  ;;  %v121_v29 = vmul.u32 4, %v3377_v34  ;;  %v1791_v30 = vsel %vm4963_vm13, %v1424_v22, %v1384_v15  ;;  %v3577_v8 = vld [vmem:[#allocation2 + $0x20] sm:$0xff] }
  0x55   :  { %v1544_v23 = vadd.f32 %v1543_v24, %v1542_v6  ;;  %v1623_v27 = vrot.slane %v1622_v17, 1  ;;  %v125_v32 = vmul.u32 4, %v3382_v50  ;;  %v1792_v31 = vsel %vm4962_vm14, %v1464_v49, %v1791_v30  ;;  %v3579_v15 = vld [vmem:[#allocation2 + $0x40] sm:$0xff] }
  0x56   :  { %v1584_v33 = vadd.f32 %v1583_v26, %v1582_v18  ;;  %v1661_v35 = vrot.slane %v1660_v28, 2  ;;  %v136_v37 = vrot.slane %v113_v9, 1  ;;  %v1793_v39 = vsel %vm4961_vm15, %v1504_v25, %v1792_v31 }
  0x57   :  { %v1624_v38 = vadd.f32 %v1623_v27, %v1622_v17  ;;  %v137_v41 = vrot.slane %v117_v10, 1  ;;  %v145_v36 = vrot.slane %v121_v29, 1  ;;  %v1794_v43 = vsel %vm4960_vm4, %v1544_v23, %v1793_v39 }
  0x58   :  { %v1662_v42 = vadd.f32 %v1661_v35, %v1660_v28  ;;  %v153_v40 = vrot.slane %v125_v32, 1  ;;  %v174_v45 = vmul.u32 2, %v3372_v20  ;;  %v1795_v51 = vsel %vm4959_vm3, %v1584_v33, %v1794_v43 }
  0x59   :  { %vm4988_vm9 = vcmask 1046528   ;;  %v178_v9 = vmul.u32 2, %v3374_v21  ;;  %v1796_v54 = vsel %vm4958_vm8, %v1624_v38, %v1795_v51  ;;  %v182_v57 = vmul.u32 2, %v3377_v34 }
  0x5a   :  { %v138_v52 = vsel %vm4988_vm9, %v136_v37, %v137_v41  ;;  %vm4989_vm0 = vmmov %vm4988_vm9  ;;  %v1663_v44 = vrot.slane %v1662_v42, 1  ;;  %v170_v56 = vadd.s32 %v153_v40, %v109_v2  ;;  %v186_v60 = vmul.u32 2, %v3382_v50 }
  0x5b   :  { %v146_v53 = vsel %vm4989_vm0, %v137_v41, %v145_v36  ;;  %vm4990_vm1 = vmmov %vm4989_vm0  ;;  %v158_v55 = vadd.s32 %v138_v52, %v97_v61  ;;  %v197_v48 = vrot.slane %v174_v45, 2  ;;  %v198_v63 = vrot.slane %v178_v9, 2 }
  0x5c   :  { %v154_v10 = vsel %vm4990_vm1, %v145_v36, %v153_v40  ;;  %v162_v46 = vadd.s32 %v146_v53, %v101_v62  ;;  %v1664_v59 = vadd.f32 %v1663_v44, %v1662_v42  ;;  %v206_v4 = vrot.slane %v182_v57, 2 }
  0x5d   :  { %v166_v47 = vadd.s32 %v154_v10, %v105_v1  ;;  %v244_v61 = vsel %vm4982_vm2, %v242_v3, %v243_v11  ;;  %v251_v62 = vrot.slane %v3377_v34, 3  ;;  %v259_v1 = vrot.slane %v3382_v50, 3  ;;  %v3586_v3 = vld [vmem:[#allocation2 + $0x60] sm:$0xff] }
  0x5e   :  { %v1797_v2 = vsel %vm4957_vm12, %v1664_v59, %v1796_v54  ;;  %vm4991_vm5 = vcmask 1045504   ;;  %v214_v6 = vrot.slane %v186_v60, 2  ;;  %v3210_v16 = vtrunc.f32 %v40_v58 }
  0x5f   :  { %v199_v5 = vsel %vm4991_vm5, %v197_v48, %v198_v63  ;;  %1861 = vmatprep.subr.mxu0 %v1797_v2  ;;  %vm4992_vm6 = vmmov %vm4991_vm5  ;;  %v252_v34 = vsel %vm4993_vm7, %v243_v11, %v251_v62  ;;  %v260_v50 = vsel %vm4994_vm11, %v251_v62, %v259_v1  ;;  %v3218_v26 = vtrunc.f32 %v3577_v8 }
  0x60   :  { %v207_v18 = vsel %vm4992_vm6, %v198_v63, %v206_v4  ;;  %v219_v20 = vadd.s32 %v199_v5, %v158_v55  ;;  %vm4995_vm10 = vmmov %vm4991_vm5  ;;  %v231_v49 = vadd.s32 %v214_v6, %v170_v56  ;;  %v3589_v24 = vcvt.f32.s32 %v3210_v16 }
  0x61   :  { %v215_v19 = vsel %vm4995_vm10, %v206_v4, %v214_v6  ;;  %v223_v22 = vadd.s32 %v207_v18, %v162_v46  ;;  %v3226_v28 = vtrunc.f32 %v3579_v15  ;;  %v3234_v29 = vtrunc.f32 %v3586_v3 }
  0x62   :  { %v227_v17 = vadd.s32 %v215_v19, %v166_v47  ;;  %v3591_v25 = vadd.s32 %v244_v61, %v219_v20  ;;  %v3597_v11 = vadd.s32 %v259_v1, %v231_v49  ;;  %v94_v23 = vmul.u32 8, %v3589_v24 }
  0x63   :  { %v3595_v21 = vadd.s32 %v252_v34, %v223_v22  ;;  %v110_v8 = vmul.u32 4, %v3589_v24 }
  0x64   :  { %v3601_v27 = vadd.s32 %v260_v50, %v227_v17  ;;  %vm408_vm9 = vcmp.eq.s32.totalorder %v3591_v25, 8  ;;  %vm424_vm0 = vcmp.eq.s32.totalorder %v3591_v25, 9  ;;  %vm420_vm5 = vcmp.eq.s32.totalorder %v3597_v11, 8 }
  0x65   :  { %vm412_vm2 = vcmp.eq.s32.totalorder %v3595_v21, 8  ;;  %vm428_vm6 = vcmp.eq.s32.totalorder %v3595_v21, 9  ;;  %vm500_vm15 = vcmp.eq.s32.totalorder %v3597_v11, 13  ;;  %vm504_vm14 = vcmp.eq.s32.totalorder %v3591_v25, 14 }
  0x66   :  { %vm416_vm11 = vcmp.eq.s32.totalorder %v3601_v27, 8  ;;  %vm496_vm4 = vcmp.eq.s32.totalorder %v3601_v27, 13  ;;  %vm508_vm13 = vcmp.eq.s32.totalorder %v3595_v21, 14  ;;  %vm512_vm1 = vcmp.eq.s32.totalorder %v3601_v27, 14 }
  0x67   :  { %vm516_vm7 = vcmp.eq.s32.totalorder %v3597_v11, 14  ;;  %vm520_vm10 = vcmp.eq.s32.totalorder %v3591_v25, 15  ;;  %vm524_vm12 = vcmp.eq.s32.totalorder %v3595_v21, 15  ;;  %vm528_vm8 = vcmp.eq.s32.totalorder %v3601_v27, 15 }
  0x68   :  { %vm532_vm3 = vcmp.eq.s32.totalorder %v3597_v11, 15  ;;  %v3039_v30 = vsel %vm408_vm9, 1.0, %v3344_v0  ;;  %v3043_v32 = vsel %vm412_vm2, 1.0, %v3344_v0  ;;  %v3047_v33 = vsel %vm416_vm11, 1.0, %v3344_v0 }
  0x69   :  { %v3051_v35 = vsel %vm420_vm5, 1.0, %v3344_v0  ;;  %v3055_v31 = vsel %vm424_vm0, 1.0, %v3344_v0  ;;  %v3059_v37 = vsel %vm428_vm6, 1.0, %v3344_v0  ;;  %vm4996_vm9 = vcmp.eq.s32.totalorder %v3601_v27, 9 }
  0x6a   :  { %v3063_v38 = vsel %vm4996_vm9, 1.0, %v3344_v0  ;;  %vm4997_vm2 = vcmp.eq.s32.totalorder %v3597_v11, 9  ;;  %vm4998_vm11 = vcmp.eq.s32.totalorder %v3591_v25, 10  ;;  %vm4999_vm5 = vcmp.eq.s32.totalorder %v3595_v21, 10 }
  0x6b   :  { %v3067_v39 = vsel %vm4997_vm2, 1.0, %v3344_v0  ;;  %v3071_v41 = vsel %vm4998_vm11, 1.0, %v3344_v0  ;;  %v3075_v36 = vsel %vm4999_vm5, 1.0, %v3344_v0  ;;  %vm5000_vm0 = vcmp.eq.s32.totalorder %v3601_v27, 10 }
  0x6c   :  { %v3079_v42 = vsel %vm5000_vm0, 1.0, %v3344_v0  ;;  %vm5001_vm6 = vcmp.eq.s32.totalorder %v3597_v11, 10  ;;  %vm5002_vm9 = vcmp.eq.s32.totalorder %v3591_v25, 11  ;;  %vm5003_vm2 = vcmp.eq.s32.totalorder %v3595_v21, 11 }
  0x6d   :  { %v3083_v43 = vsel %vm5001_vm6, 1.0, %v3344_v0  ;;  %v3087_v40 = vsel %vm5002_vm9, 1.0, %v3344_v0  ;;  %v3091_v45 = vsel %vm5003_vm2, 1.0, %v3344_v0  ;;  %vm5004_vm11 = vcmp.eq.s32.totalorder %v3601_v27, 11 }
  0x6e   :  { %v3095_v51 = vsel %vm5004_vm11, 1.0, %v3344_v0  ;;  %vm5005_vm5 = vcmp.eq.s32.totalorder %v3597_v11, 11  ;;  %vm5006_vm0 = vcmp.eq.s32.totalorder %v3591_v25, 12  ;;  %vm5007_vm6 = vcmp.eq.s32.totalorder %v3595_v21, 12 }
  0x6f   :  { %v3099_v52 = vsel %vm5005_vm5, 1.0, %v3344_v0  ;;  %v3103_v53 = vsel %vm5006_vm0, 1.0, %v3344_v0  ;;  %v3107_v9 = vsel %vm5007_vm6, 1.0, %v3344_v0  ;;  %vm5008_vm9 = vcmp.eq.s32.totalorder %v3601_v27, 12 }
  0x70   :  { %v3111_v44 = vsel %vm5008_vm9, 1.0, %v3344_v0  ;;  %vm5009_vm2 = vcmp.eq.s32.totalorder %v3597_v11, 12  ;;  %vm5010_vm11 = vcmp.eq.s32.totalorder %v3591_v25, 13  ;;  %vm5011_vm5 = vcmp.eq.s32.totalorder %v3595_v21, 13 }
  0x71   :  { %v3115_v54 = vsel %vm5009_vm2, 1.0, %v3344_v0  ;;  %v3119_v10 = vsel %vm5010_vm11, 1.0, %v3344_v0  ;;  %v3123_v55 = vsel %vm5011_vm5, 1.0, %v3344_v0  ;;  %v3127_v46 = vsel %vm496_vm4, 1.0, %v3344_v0 }
  0x72   :  { %v3131_v47 = vsel %vm500_vm15, 1.0, %v3344_v0  ;;  %v3135_v56 = vsel %vm504_vm14, 1.0, %v3344_v0  ;;  %v3139_v57 = vsel %vm508_vm13, 1.0, %v3344_v0  ;;  %v3143_v58 = vsel %vm512_vm1, 1.0, %v3344_v0 }
  0x73   :  { %v3147_v59 = vsel %vm516_vm7, 1.0, %v3344_v0  ;;  %v3151_v60 = vsel %vm520_vm10, 1.0, %v3344_v0  ;;  %v3155_v48 = vsel %vm524_vm12, 1.0, %v3344_v0  ;;  %v3159_v63 = vsel %vm528_vm8, 1.0, %v3344_v0 }
  0x74   :  { %v3163_v4 = vsel %vm532_vm3, 1.0, %v3344_v0  ;;  %v1395_v61 = vadd.f32 %v3043_v32, %v3039_v30  ;;  %vm5012_vm13 = vcmask 1044480   ;;  %v1435_v1 = vadd.f32 %v3059_v37, %v3055_v31 }
  0x75   :  { %v1397_v62 = vsel %vm5012_vm13, %v3051_v35, 0.0  ;;  %vm5013_vm14 = vmmov %vm5012_vm13  ;;  %v1475_v5 = vadd.f32 %v3075_v36, %v3071_v41  ;;  %v1515_v16 = vadd.f32 %v3091_v45, %v3087_v40  ;;  %v1555_v50 = vadd.f32 %v3107_v9, %v3103_v53 }
  0x76   :  { %v1437_v2 = vsel %vm5013_vm14, %v3067_v39, 0.0  ;;  %vm5014_vm15 = vmmov %vm5012_vm13  ;;  %v1396_v18 = vadd.f32 %v3047_v33, %v1395_v61  ;;  %v1436_v20 = vadd.f32 %v3063_v38, %v1435_v1  ;;  %v1595_v17 = vadd.f32 %v3123_v55, %v3119_v10 }
  0x77   :  { %v1477_v6 = vsel %vm5014_vm15, %v3083_v43, 0.0  ;;  %vm5015_vm4 = vmmov %vm5012_vm13  ;;  %v1476_v19 = vadd.f32 %v3079_v42, %v1475_v5  ;;  %v1516_v22 = vadd.f32 %v3095_v51, %v1515_v16  ;;  %v1556_v35 = vadd.f32 %v3111_v44, %v1555_v50 }
  0x78   :  { %v1517_v34 = vsel %vm5015_vm4, %v3099_v52, 0.0  ;;  %vm5016_vm8 = vmmov %vm5015_vm4  ;;  %v1398_v30 = vadd.f32 %v1397_v62, %v1396_v18  ;;  %v1438_v32 = vadd.f32 %v1437_v2, %v1436_v20  ;;  %v1596_v41 = vadd.f32 %v3127_v46, %v1595_v17 }
  0x79   :  { %v1557_v49 = vsel %vm5016_vm8, %v3115_v54, 0.0  ;;  %vm5017_vm3 = vmmov %vm5015_vm4  ;;  %v1478_v37 = vadd.f32 %v1477_v6, %v1476_v19  ;;  %v1518_v39 = vadd.f32 %v1517_v34, %v1516_v22  ;;  %v1635_v36 = vadd.f32 %v3139_v57, %v3135_v56 }
  0x7a   :  { %v1597_v31 = vsel %vm5017_vm3, %v3131_v47, 0.0  ;;  %v1399_v43 = vrot.slane %v1398_v30, 4  ;;  %v1439_v33 = vrot.slane %v1438_v32, 4  ;;  %v1558_v38 = vadd.f32 %v1557_v49, %v1556_v35  ;;  %vm5018_vm12 = vmmov %vm5017_vm3 }
  0x7b   :  { %v1637_v40 = vsel %vm5018_vm12, %v3147_v59, 0.0  ;;  %v1479_v45 = vrot.slane %v1478_v37, 4  ;;  %v1519_v42 = vrot.slane %v1518_v39, 4  ;;  %v1598_v51 = vadd.f32 %v1597_v31, %v1596_v41  ;;  %vm5019_vm1 = vmmov %vm5017_vm3 }
  0x7c   :  { %v1636_v52 = vadd.f32 %v3143_v58, %v1635_v36  ;;  %v1400_v53 = vadd.f32 %v1399_v43, %v1398_v30  ;;  %v1440_v9 = vadd.f32 %v1439_v33, %v1438_v32  ;;  %v1559_v54 = vrot.slane %v1558_v38, 4  ;;  %vm5033_vm3 = vmmov %vm5019_vm1 }
  0x7d   :  { %v1675_v10 = vadd.f32 %v3155_v48, %v3151_v60  ;;  %v1480_v44 = vadd.f32 %v1479_v45, %v1478_v37  ;;  %v1520_v55 = vadd.f32 %v1519_v42, %v1518_v39  ;;  %v1599_v47 = vrot.slane %v1598_v51, 4  ;;  %vm5034_vm12 = vmmov %vm5019_vm1 }
  0x7e   :  { %v1638_v61 = vadd.f32 %v1637_v40, %v1636_v52  ;;  %v1401_v62 = vrot.slane %v1400_v53, 2  ;;  %v1441_v46 = vrot.slane %v1440_v9, 2  ;;  %v1560_v56 = vadd.f32 %v1559_v54, %v1558_v38 }
  0x7f   :  { %v1676_v57 = vadd.f32 %v3159_v63, %v1675_v10  ;;  %v1481_v1 = vrot.slane %v1480_v44, 2  ;;  %v1521_v2 = vrot.slane %v1520_v55, 2  ;;  %v1600_v5 = vadd.f32 %v1599_v47, %v1598_v51 }
  0x80   :  { %v1639_v59 = vrot.slane %v1638_v61, 4  ;;  %v1402_v6 = vadd.f32 %v1401_v62, %v1400_v53  ;;  %v1442_v16 = vadd.f32 %v1441_v46, %v1440_v9  ;;  %v1561_v18 = vrot.slane %v1560_v56, 2 }
  0x81   :  { %v1677_v58 = vsel %vm5019_vm1, %v3163_v4, 0.0  ;;  %v1482_v20 = vadd.f32 %v1481_v1, %v1480_v44  ;;  %v1522_v34 = vadd.f32 %v1521_v2, %v1520_v55  ;;  %v1601_v60 = vrot.slane %v1600_v5, 2 }
  0x82   :  { %v1640_v48 = vadd.f32 %v1639_v59, %v1638_v61  ;;  %v1403_v50 = vrot.slane %v1402_v6, 1  ;;  %v1443_v19 = vrot.slane %v1442_v16, 1  ;;  %v1562_v22 = vadd.f32 %v1561_v18, %v1560_v56 }
  0x83   :  { %v1678_v49 = vadd.f32 %v1677_v58, %v1676_v57  ;;  %v1483_v17 = vrot.slane %v1482_v20, 1  ;;  %v1523_v30 = vrot.slane %v1522_v34, 1  ;;  %v1602_v63 = vadd.f32 %v1601_v60, %v1600_v5 }
  0x84   :  { %v1641_v32 = vrot.slane %v1640_v48, 2  ;;  %v1404_v35 = vadd.f32 %v1403_v50, %v1402_v6  ;;  %v1444_v31 = vadd.f32 %v1443_v19, %v1442_v16  ;;  %v1563_v37 = vrot.slane %v1562_v22, 1 }
  0x85   :  { %v1679_v39 = vrot.slane %v1678_v49, 4  ;;  %v1484_v41 = vadd.f32 %v1483_v17, %v1482_v20  ;;  %v1524_v36 = vadd.f32 %v1523_v30, %v1522_v34  ;;  %v1603_v43 = vrot.slane %v1602_v63, 1 }
  0x86   :  { %v1642_v4 = vadd.f32 %v1641_v32, %v1640_v48  ;;  %v1564_v33 = vadd.f32 %v1563_v37, %v1562_v22  ;;  %vm5020_vm7 = vcmask 1041409   ;;  %v3219_v45 = vcvt.f32.s32 %v3218_v26 }
  0x87   :  { %v1680_v38 = vadd.f32 %v1679_v39, %v1678_v49  ;;  %v1805_v40 = vsel %vm5020_vm7, %v1444_v31, %v1404_v35  ;;  %v1604_v42 = vadd.f32 %v1603_v43, %v1602_v63  ;;  %vm5021_vm10 = vcmask 1042434   ;;  %v42_v49 = vld [vmem:[#allocation2 + $0x10] sm:$0xff] }
  0x88   :  { %v1643_v51 = vrot.slane %v1642_v4, 1  ;;  %v1806_v52 = vsel %vm5021_vm10, %v1484_v41, %v1805_v40  ;;  %v3227_v53 = vcvt.f32.s32 %v3226_v28  ;;  %vm5022_vm0 = vcmask 1043459   ;;  %v46_v35 = vld [vmem:[#allocation2 + $0x30] sm:$0xff] }
  0x89   :  { %v1681_v9 = vrot.slane %v1680_v38, 2  ;;  %v1807_v54 = vsel %vm5022_vm0, %v1524_v36, %v1806_v52  ;;  %v3235_v10 = vcvt.f32.s32 %v3234_v29  ;;  %v98_v44 = vmul.u32 8, %v3219_v45 }
  0x8a   :  { %v1644_v55 = vadd.f32 %v1643_v51, %v1642_v4  ;;  %vm5023_vm6 = vcmask 1044484   ;;  %v102_v61 = vmul.u32 8, %v3227_v53  ;;  %vm5024_vm9 = vcmask 1045509  }
  0x8b   :  { %v1808_v47 = vsel %vm5023_vm6, %v1564_v33, %v1807_v54  ;;  %v1682_v26 = vadd.f32 %v1681_v9, %v1680_v38  ;;  %v106_v46 = vmul.u32 8, %v3235_v10  ;;  %v114_v56 = vmul.u32 4, %v3219_v45 }
  0x8c   :  { %v1809_v62 = vsel %vm5024_vm9, %v1604_v42, %v1808_v47  ;;  %vm5025_vm2 = vcmask 1046534   ;;  %v118_v28 = vmul.u32 4, %v3227_v53  ;;  %v122_v57 = vmul.u32 4, %v3235_v10  ;;  %v3763_v42 = vld [vmem:[#allocation2 + $0x50] sm:$0xff] }
  0x8d   :  { %v1810_v15 = vsel %vm5025_vm2, %v1644_v55, %v1809_v62  ;;  %v127_v1 = vrot.slane %v110_v8, 1  ;;  %v1683_v2 = vrot.slane %v1682_v26, 1  ;;  %v128_v3 = vrot.slane %v114_v56, 1 }
  0x8e   :  { %v171_v29 = vmul.u32 2, %v3589_v24  ;;  %v175_v5 = vmul.u32 2, %v3219_v45  ;;  %v139_v59 = vrot.slane %v118_v28, 1  ;;  %v147_v6 = vrot.slane %v122_v57, 1 }
  0x8f   :  { %v179_v16 = vmul.u32 2, %v3227_v53  ;;  %v183_v18 = vmul.u32 2, %v3235_v10  ;;  %v1684_v58 = vadd.f32 %v1683_v2, %v1682_v26  ;;  %vm5026_vm11 = vcmask 1046528  }
  0x90   :  { %v129_v20 = vsel %vm5026_vm11, %v127_v1, %v128_v3  ;;  %v188_v34 = vrot.slane %v171_v29, 2  ;;  %v189_v60 = vrot.slane %v175_v5, 2  ;;  %vm5027_vm5 = vmmov %vm5026_vm11  ;;  %v167_v22 = vadd.s32 %v147_v6, %v106_v46 }
  0x91   :  { %v140_v48 = vsel %vm5027_vm5, %v128_v3, %v139_v59  ;;  %vm5028_vm13 = vmmov %vm5027_vm5  ;;  %v155_v19 = vadd.s32 %v129_v20, %v94_v23  ;;  %vm5029_vm14 = vcmask 1047559   ;;  %vm5030_vm15 = vcmask 1045504  }
  0x92   :  { %v148_v50 = vsel %vm5028_vm13, %v139_v59, %v147_v6  ;;  %v1811_v17 = vsel %vm5029_vm14, %v1684_v58, %v1810_v15  ;;  %v159_v30 = vadd.s32 %v140_v48, %v98_v44  ;;  %v190_v32 = vsel %vm5030_vm15, %v188_v34, %v189_v60  ;;  %vm5031_vm4 = vmmov %vm5030_vm15 }
  0x93   :  { %v163_v63 = vadd.s32 %v148_v50, %v102_v61  ;;  %1950 = vmatprep.subr.mxu1 %v1811_v17  ;;  %v200_v31 = vrot.slane %v179_v16, 2  ;;  %v208_v37 = vrot.slane %v183_v18, 2  ;;  %v216_v39 = vadd.s32 %v190_v32, %v155_v19  ;;  %vm5032_vm8 = vmmov %vm5031_vm4 }
  0x94   :  { %v233_v41 = vrot.slane %v3589_v24, 3  ;;  %v234_v36 = vrot.slane %v3219_v45, 3  ;;  %v245_v43 = vrot.slane %v3227_v53, 3  ;;  %v253_v4 = vrot.slane %v3235_v10, 3 }
  0x95   :  { %v3214_v33 = vtrunc.f32 %v42_v49  ;;  %v201_v23 = vsel %vm5031_vm4, %v189_v60, %v200_v31  ;;  %v209_v38 = vsel %vm5032_vm8, %v200_v31, %v208_v37  ;;  %v228_v40 = vadd.s32 %v208_v37, %v167_v22 }
  0x96   :  { %v3222_v51 = vtrunc.f32 %v46_v35  ;;  %v220_v52 = vadd.s32 %v201_v23, %v159_v30  ;;  %v224_v9 = vadd.s32 %v209_v38, %v163_v63  ;;  %v235_v54 = vsel %vm5033_vm3, %v233_v41, %v234_v36 }
  0x97   :  { %v246_v44 = vsel %vm5034_vm12, %v234_v36, %v245_v43  ;;  %v254_v24 = vsel %vm5019_vm1, %v245_v43, %v253_v4  ;;  %v3768_v45 = vadd.s32 %v235_v54, %v216_v39  ;;  %v3770_v53 = vadd.s32 %v253_v4, %v228_v40 }
  0x98   :  { %v3772_v10 = vcvt.f32.s32 %v3214_v33  ;;  %v3774_v55 = vadd.s32 %v246_v44, %v220_v52  ;;  %v3776_v47 = vadd.s32 %v254_v24, %v224_v9  ;;  %v3778_v61 = vcvt.f32.s32 %v3222_v51 }
  0x99   :  { %v3230_v8 = vtrunc.f32 %v3763_v42  ;;  %vm405_vm7 = vcmp.eq.s32.totalorder %v3768_v45, 8  ;;  %vm417_vm10 = vcmp.eq.s32.totalorder %v3770_v53, 8  ;;  %vm421_vm0 = vcmp.eq.s32.totalorder %v3768_v45, 9 }
  0x9a   :  { %vm409_vm9 = vcmp.eq.s32.totalorder %v3774_v55, 8  ;;  %vm413_vm2 = vcmp.eq.s32.totalorder %v3776_v47, 8  ;;  %vm425_vm11 = vcmp.eq.s32.totalorder %v3774_v55, 9  ;;  %vm493_vm8 = vcmp.eq.s32.totalorder %v3776_v47, 13 }
  0x9b   :  { %vm497_vm3 = vcmp.eq.s32.totalorder %v3770_v53, 13  ;;  %vm501_vm12 = vcmp.eq.s32.totalorder %v3768_v45, 14  ;;  %vm505_vm1 = vcmp.eq.s32.totalorder %v3774_v55, 14  ;;  %vm509_vm6 = vcmp.eq.s32.totalorder %v3776_v47, 14 }
  0x9c   :  { %vm513_vm5 = vcmp.eq.s32.totalorder %v3770_v53, 14  ;;  %vm517_vm13 = vcmp.eq.s32.totalorder %v3768_v45, 15  ;;  %vm521_vm14 = vcmp.eq.s32.totalorder %v3774_v55, 15  ;;  %vm525_vm15 = vcmp.eq.s32.totalorder %v3776_v47, 15 }
  0x9d   :  { %vm529_vm4 = vcmp.eq.s32.totalorder %v3770_v53, 15  ;;  %v3036_v26 = vsel %vm405_vm7, 1.0, %v3344_v0  ;;  %v3040_v62 = vsel %vm409_vm9, 1.0, %v3344_v0  ;;  %v3044_v46 = vsel %vm413_vm2, 1.0, %v3344_v0 }
  0x9e   :  { %v3048_v56 = vsel %vm417_vm10, 1.0, %v3344_v0  ;;  %v3052_v15 = vsel %vm421_vm0, 1.0, %v3344_v0  ;;  %v3056_v28 = vsel %vm425_vm11, 1.0, %v3344_v0  ;;  %vm5035_vm7 = vcmp.eq.s32.totalorder %v3776_v47, 9 }
  0x9f   :  { %v3060_v57 = vsel %vm5035_vm7, 1.0, %v3344_v0  ;;  %vm5036_vm9 = vcmp.eq.s32.totalorder %v3770_v53, 9  ;;  %vm5037_vm2 = vcmp.eq.s32.totalorder %v3768_v45, 10  ;;  %vm5038_vm10 = vcmp.eq.s32.totalorder %v3774_v55, 10 }
  0xa0   :  { %v3064_v1 = vsel %vm5036_vm9, 1.0, %v3344_v0  ;;  %v3068_v2 = vsel %vm5037_vm2, 1.0, %v3344_v0  ;;  %v3072_v3 = vsel %vm5038_vm10, 1.0, %v3344_v0  ;;  %vm5039_vm0 = vcmp.eq.s32.totalorder %v3776_v47, 10 }
  0xa1   :  { %v3076_v29 = vsel %vm5039_vm0, 1.0, %v3344_v0  ;;  %vm5040_vm11 = vcmp.eq.s32.totalorder %v3770_v53, 10  ;;  %vm5041_vm7 = vcmp.eq.s32.totalorder %v3768_v45, 11  ;;  %vm5042_vm9 = vcmp.eq.s32.totalorder %v3774_v55, 11 }
  0xa2   :  { %v3080_v5 = vsel %vm5040_vm11, 1.0, %v3344_v0  ;;  %v3084_v59 = vsel %vm5041_vm7, 1.0, %v3344_v0  ;;  %v3088_v6 = vsel %vm5042_vm9, 1.0, %v3344_v0  ;;  %vm5043_vm2 = vcmp.eq.s32.totalorder %v3776_v47, 11 }
  0xa3   :  { %v3092_v16 = vsel %vm5043_vm2, 1.0, %v3344_v0  ;;  %vm5044_vm10 = vcmp.eq.s32.totalorder %v3770_v53, 11  ;;  %vm5045_vm0 = vcmp.eq.s32.totalorder %v3768_v45, 12  ;;  %vm5046_vm11 = vcmp.eq.s32.totalorder %v3774_v55, 12 }
  0xa4   :  { %v3096_v18 = vsel %vm5044_vm10, 1.0, %v3344_v0  ;;  %v3100_v58 = vsel %vm5045_vm0, 1.0, %v3344_v0  ;;  %v3104_v20 = vsel %vm5046_vm11, 1.0, %v3344_v0  ;;  %vm5047_vm7 = vcmp.eq.s32.totalorder %v3776_v47, 12 }
  0xa5   :  { %v3108_v34 = vsel %vm5047_vm7, 1.0, %v3344_v0  ;;  %vm5048_vm9 = vcmp.eq.s32.totalorder %v3770_v53, 12  ;;  %vm5049_vm2 = vcmp.eq.s32.totalorder %v3768_v45, 13  ;;  %vm5050_vm10 = vcmp.eq.s32.totalorder %v3774_v55, 13 }
  0xa6   :  { %v3112_v60 = vsel %vm5048_vm9, 1.0, %v3344_v0  ;;  %v3116_v48 = vsel %vm5049_vm2, 1.0, %v3344_v0  ;;  %v3120_v50 = vsel %vm5050_vm10, 1.0, %v3344_v0  ;;  %v3124_v19 = vsel %vm493_vm8, 1.0, %v3344_v0 }
  0xa7   :  { %v3128_v22 = vsel %vm497_vm3, 1.0, %v3344_v0  ;;  %v3132_v49 = vsel %vm501_vm12, 1.0, %v3344_v0  ;;  %v3136_v17 = vsel %vm505_vm1, 1.0, %v3344_v0  ;;  %v3140_v30 = vsel %vm509_vm6, 1.0, %v3344_v0 }
  0xa8   :  { %v3144_v63 = vsel %vm513_vm5, 1.0, %v3344_v0  ;;  %v3148_v32 = vsel %vm517_vm13, 1.0, %v3344_v0  ;;  %v3152_v35 = vsel %vm521_vm14, 1.0, %v3344_v0  ;;  %v3156_v31 = vsel %vm525_vm15, 1.0, %v3344_v0 }
  0xa9   :  { %v3160_v37 = vsel %vm529_vm4, 1.0, %v3344_v0  ;;  %v1365_v39 = vadd.f32 %v3040_v62, %v3036_v26  ;;  %vm5051_vm6 = vcmask 1044480   ;;  %v1405_v36 = vadd.f32 %v3056_v28, %v3052_v15 }
  0xaa   :  { %v1367_v41 = vsel %vm5051_vm6, %v3048_v56, 0.0  ;;  %vm5052_vm5 = vmmov %vm5051_vm6  ;;  %v1445_v4 = vadd.f32 %v3072_v3, %v3068_v2  ;;  %v1485_v23 = vadd.f32 %v3088_v6, %v3084_v59  ;;  %v1525_v52 = vadd.f32 %v3104_v20, %v3100_v58 }
  0xab   :  { %v1407_v43 = vsel %vm5052_vm5, %v3064_v1, 0.0  ;;  %vm5053_vm13 = vmmov %vm5052_vm5  ;;  %v1366_v40 = vadd.f32 %v3044_v46, %v1365_v39  ;;  %v1406_v51 = vadd.f32 %v3060_v57, %v1405_v36  ;;  %v1565_v24 = vadd.f32 %v3120_v50, %v3116_v48 }
  0xac   :  { %v1447_v33 = vsel %vm5053_vm13, %v3080_v5, 0.0  ;;  %vm5054_vm8 = vmmov %vm5052_vm5  ;;  %v1446_v54 = vadd.f32 %v3076_v29, %v1445_v4  ;;  %v1486_v44 = vadd.f32 %v3092_v16, %v1485_v23  ;;  %v1526_v15 = vadd.f32 %v3108_v34, %v1525_v52 }
  0xad   :  { %v1487_v38 = vsel %vm5054_vm8, %v3096_v18, 0.0  ;;  %vm5055_vm14 = vmmov %vm5052_vm5  ;;  %v1368_v62 = vadd.f32 %v1367_v41, %v1366_v40  ;;  %v1408_v56 = vadd.f32 %v1407_v43, %v1406_v51  ;;  %v1605_v28 = vadd.f32 %v3136_v17, %v3132_v49 }
  0xae   :  { %v1527_v9 = vsel %vm5055_vm14, %v3112_v60, 0.0  ;;  %vm5056_vm15 = vmmov %vm5052_vm5  ;;  %v1448_v1 = vadd.f32 %v1447_v33, %v1446_v54  ;;  %v1488_v2 = vadd.f32 %v1487_v38, %v1486_v44  ;;  %v1566_v3 = vadd.f32 %v3124_v19, %v1565_v24 }
  0xaf   :  { %v1567_v26 = vsel %vm5056_vm15, %v3128_v22, 0.0  ;;  %vm5057_vm4 = vmmov %vm5052_vm5  ;;  %v1369_v59 = vrot.slane %v1368_v62, 4  ;;  %v1409_v46 = vrot.slane %v1408_v56, 4  ;;  %v1528_v57 = vadd.f32 %v1527_v9, %v1526_v15 }
  0xb0   :  { %v1607_v5 = vsel %vm5057_vm4, %v3144_v63, 0.0  ;;  %v1606_v6 = vadd.f32 %v3140_v30, %v1605_v28  ;;  %v1449_v18 = vrot.slane %v1448_v1, 4  ;;  %v1489_v58 = vrot.slane %v1488_v2, 4  ;;  %vm5058_vm3 = vmmov %vm5057_vm4 }
  0xb1   :  { %v1568_v29 = vadd.f32 %v1567_v26, %v1566_v3  ;;  %v1645_v16 = vadd.f32 %v3152_v35, %v3148_v32  ;;  %v1370_v20 = vadd.f32 %v1369_v59, %v1368_v62  ;;  %v1410_v60 = vadd.f32 %v1409_v46, %v1408_v56  ;;  %vm5072_vm15 = vmmov %vm5058_vm3 }
  0xb2   :  { %v1529_v48 = vrot.slane %v1528_v57, 4  ;;  %v1608_v50 = vadd.f32 %v1607_v5, %v1606_v6  ;;  %v1450_v22 = vadd.f32 %v1449_v18, %v1448_v1  ;;  %v1490_v34 = vadd.f32 %v1489_v58, %v1488_v2  ;;  %v54_v2 = vld [vmem:[#allocation2 + $0x70] sm:$0xff]  ;;  %vm5073_vm4 = vmmov %vm5058_vm3 }
  0xb3   :  { %v1569_v49 = vrot.slane %v1568_v29, 4  ;;  %v1646_v17 = vadd.f32 %v3156_v31, %v1645_v16  ;;  %v1371_v39 = vrot.slane %v1370_v20, 2  ;;  %v1411_v19 = vrot.slane %v1410_v60, 2 }
  0xb4   :  { %v1530_v41 = vadd.f32 %v1529_v48, %v1528_v57  ;;  %v1609_v63 = vrot.slane %v1608_v50, 4  ;;  %v1451_v36 = vrot.slane %v1450_v22, 2  ;;  %v1491_v43 = vrot.slane %v1490_v34, 2 }
  0xb5   :  { %v1570_v4 = vadd.f32 %v1569_v49, %v1568_v29  ;;  %v1647_v30 = vsel %vm5058_vm3, %v3160_v37, 0.0  ;;  %v1372_v33 = vadd.f32 %v1371_v39, %v1370_v20  ;;  %v1412_v23 = vadd.f32 %v1411_v19, %v1410_v60 }
  0xb6   :  { %v1531_v32 = vrot.slane %v1530_v41, 2  ;;  %v1610_v35 = vadd.f32 %v1609_v63, %v1608_v50  ;;  %v1452_v38 = vadd.f32 %v1451_v36, %v1450_v22  ;;  %v1492_v40 = vadd.f32 %v1491_v43, %v1490_v34 }
  0xb7   :  { %v1571_v51 = vrot.slane %v1570_v4, 2  ;;  %v1648_v52 = vadd.f32 %v1647_v30, %v1646_v17  ;;  %v1373_v9 = vrot.slane %v1372_v33, 1  ;;  %v1413_v54 = vrot.slane %v1412_v23, 1 }
  0xb8   :  { %v1532_v31 = vadd.f32 %v1531_v32, %v1530_v41  ;;  %v1611_v44 = vrot.slane %v1610_v35, 2  ;;  %v1453_v24 = vrot.slane %v1452_v38, 1  ;;  %v1493_v26 = vrot.slane %v1492_v40, 1 }
  0xb9   :  { %v1572_v62 = vadd.f32 %v1571_v51, %v1570_v4  ;;  %v1649_v56 = vrot.slane %v1648_v52, 4  ;;  %v1374_v15 = vadd.f32 %v1373_v9, %v1372_v33  ;;  %v1414_v28 = vadd.f32 %v1413_v54, %v1412_v23 }
  0xba   :  { %v1533_v1 = vrot.slane %v1532_v31, 1  ;;  %v1612_v37 = vadd.f32 %v1611_v44, %v1610_v35  ;;  %v1454_v3 = vadd.f32 %v1453_v24, %v1452_v38  ;;  %v1494_v5 = vadd.f32 %v1493_v26, %v1492_v40 }
  0xbb   :  { %v1573_v59 = vrot.slane %v1572_v62, 1  ;;  %v1650_v46 = vadd.f32 %v1649_v56, %v1648_v52  ;;  %vm5059_vm12 = vcmask 1041409   ;;  %v3231_v58 = vcvt.f32.s32 %v3230_v8 }
  0xbc   :  { %v1534_v57 = vadd.f32 %v1533_v1, %v1532_v31  ;;  %v1613_v6 = vrot.slane %v1612_v37, 1  ;;  %v1784_v18 = vsel %vm5059_vm12, %v1414_v28, %v1374_v15  ;;  %vm5060_vm1 = vcmask 1042434  }
  0xbd   :  { %v1574_v29 = vadd.f32 %v1573_v59, %v1572_v62  ;;  %v1651_v16 = vrot.slane %v1650_v46, 2  ;;  %v1785_v20 = vsel %vm5060_vm1, %v1454_v3, %v1784_v18  ;;  %v3238_v60 = vtrunc.f32 %v54_v2 }
  0xbe   :  { %v1614_v48 = vadd.f32 %v1613_v6, %v1612_v37  ;;  %vm5061_vm0 = vcmask 1043459   ;;  %v96_v22 = vmul.u32 8, %v3772_v10  ;;  %v100_v34 = vmul.u32 8, %v3778_v61 }
  0xbf   :  { %v1786_v50 = vsel %vm5061_vm0, %v1494_v5, %v1785_v20  ;;  %v1652_v49 = vadd.f32 %v1651_v16, %v1650_v46  ;;  %vm5062_vm11 = vcmask 1044484   ;;  %v3239_v39 = vcvt.f32.s32 %v3238_v60 }
  0xc0   :  { %v1787_v17 = vsel %vm5062_vm11, %v1534_v57, %v1786_v50  ;;  %v104_v19 = vmul.u32 8, %v3231_v58  ;;  %vm5063_vm7 = vcmask 1045509   ;;  %v112_v8 = vmul.u32 4, %v3772_v10 }
  0xc1   :  { %v1788_v42 = vsel %vm5063_vm7, %v1574_v29, %v1787_v17  ;;  %v116_v41 = vmul.u32 4, %v3778_v61  ;;  %v239_v63 = vrot.slane %v3772_v10, 3  ;;  %v1653_v36 = vrot.slane %v1652_v49, 1 }
  0xc2   :  { %vm5064_vm9 = vcmask 1046534   ;;  %v108_v4 = vmul.u32 8, %v3239_v39  ;;  %v120_v30 = vmul.u32 4, %v3231_v58  ;;  %v133_v23 = vrot.slane %v112_v8, 1 }
  0xc3   :  { %v1789_v43 = vsel %vm5064_vm9, %v1614_v48, %v1788_v42  ;;  %v124_v33 = vmul.u32 4, %v3239_v39  ;;  %v134_v32 = vrot.slane %v116_v41, 1  ;;  %v173_v35 = vmul.u32 2, %v3772_v10 }
  0xc4   :  { %v1654_v38 = vadd.f32 %v1653_v36, %v1652_v49  ;;  %v143_v40 = vrot.slane %v120_v30, 1  ;;  %v177_v51 = vmul.u32 2, %v3778_v61  ;;  %v181_v52 = vmul.u32 2, %v3231_v58 }
  0xc5   :  { %vm5065_vm2 = vcmask 1046528   ;;  %v151_v54 = vrot.slane %v124_v33, 1  ;;  %v185_v31 = vmul.u32 2, %v3239_v39  ;;  %v194_v44 = vrot.slane %v173_v35, 2 }
  0xc6   :  { %v135_v9 = vsel %vm5065_vm2, %v133_v23, %v134_v32  ;;  %vm5066_vm10 = vcmask 1047559   ;;  %vm5067_vm6 = vmmov %vm5065_vm2  ;;  %v195_v56 = vrot.slane %v177_v51, 2  ;;  %v204_v1 = vrot.slane %v181_v52, 2 }
  0xc7   :  { %v1790_v24 = vsel %vm5066_vm10, %v1654_v38, %v1789_v43  ;;  %v144_v26 = vsel %vm5067_vm6, %v134_v32, %v143_v40  ;;  %v157_v62 = vadd.s32 %v135_v9, %v96_v22  ;;  %vm5068_vm5 = vmmov %vm5065_vm2  ;;  %v169_v28 = vadd.s32 %v151_v54, %v108_v4 }
  0xc8   :  { %1862 = vmatpush1.msra.mxu0 %v1790_v24  ;;  %v152_v15 = vsel %vm5068_vm5, %v143_v40, %v151_v54  ;;  %v161_v10 = vadd.s32 %v144_v26, %v100_v34  ;;  %vm5069_vm13 = vcmask 1045504   ;;  %v212_v3 = vrot.slane %v185_v31, 2 }
  0xc9   :  { %v165_v37 = vadd.s32 %v152_v15, %v104_v19  ;;  %v196_v2 = vsel %vm5069_vm13, %v194_v44, %v195_v56  ;;  %v240_v5 = vrot.slane %v3778_v61, 3  ;;  %vm5070_vm8 = vmmov %vm5069_vm13  ;;  %v249_v57 = vrot.slane %v3231_v58, 3 }
  0xca   :  { %v205_v59 = vsel %vm5070_vm8, %v195_v56, %v204_v1  ;;  %v218_v46 = vadd.s32 %v196_v2, %v157_v62  ;;  %v257_v6 = vrot.slane %v3239_v39, 3  ;;  %vm5071_vm14 = vmmov %vm5070_vm8  ;;  %v230_v16 = vadd.s32 %v212_v3, %v169_v28 }
  0xcb   :  { %v213_v18 = vsel %vm5071_vm14, %v204_v1, %v212_v3  ;;  %v222_v29 = vadd.s32 %v205_v59, %v161_v10  ;;  %v241_v20 = vsel %vm5072_vm15, %v239_v63, %v240_v5  ;;  %v250_v48 = vsel %vm5073_vm4, %v240_v5, %v249_v57 }
  0xcc   :  { %v226_v60 = vadd.s32 %v213_v18, %v165_v37  ;;  %v258_v50 = vsel %vm5058_vm3, %v249_v57, %v257_v6  ;;  %v3943_v22 = vadd.s32 %v241_v20, %v218_v46  ;;  %v3947_v61 = vadd.s32 %v257_v6, %v230_v16 }
  0xcd   :  { %v3945_v34 = vadd.s32 %v250_v48, %v222_v29 }
  0xce   :  { %v3949_v49 = vadd.s32 %v258_v50, %v226_v60  ;;  %vm407_vm12 = vcmp.eq.s32.totalorder %v3943_v22, 8  ;;  %vm423_vm1 = vcmp.eq.s32.totalorder %v3943_v22, 9  ;;  %vm419_vm7 = vcmp.eq.s32.totalorder %v3947_v61, 8 }
  0xcf   :  { %vm411_vm11 = vcmp.eq.s32.totalorder %v3945_v34, 8  ;;  %vm427_vm9 = vcmp.eq.s32.totalorder %v3945_v34, 9  ;;  %vm499_vm15 = vcmp.eq.s32.totalorder %v3947_v61, 13  ;;  %vm503_vm4 = vcmp.eq.s32.totalorder %v3943_v22, 14 }
  0xd0   :  { %vm415_vm10 = vcmp.eq.s32.totalorder %v3949_v49, 8  ;;  %vm495_vm14 = vcmp.eq.s32.totalorder %v3949_v49, 13  ;;  %vm507_vm3 = vcmp.eq.s32.totalorder %v3945_v34, 14  ;;  %vm511_vm0 = vcmp.eq.s32.totalorder %v3949_v49, 14 }
  0xd1   :  { %vm515_vm2 = vcmp.eq.s32.totalorder %v3947_v61, 14  ;;  %vm519_vm6 = vcmp.eq.s32.totalorder %v3943_v22, 15  ;;  %vm523_vm5 = vcmp.eq.s32.totalorder %v3945_v34, 15  ;;  %vm527_vm13 = vcmp.eq.s32.totalorder %v3949_v49, 15 }
  0xd2   :  { %vm531_vm8 = vcmp.eq.s32.totalorder %v3947_v61, 15  ;;  %v3038_v58 = vsel %vm407_vm12, 1.0, %v3344_v0  ;;  %v3042_v17 = vsel %vm411_vm11, 1.0, %v3344_v0  ;;  %v3046_v39 = vsel %vm415_vm10, 1.0, %v3344_v0 }
  0xd3   :  { %v3050_v19 = vsel %vm419_vm7, 1.0, %v3344_v0  ;;  %v3054_v42 = vsel %vm423_vm1, 1.0, %v3344_v0  ;;  %v3058_v8 = vsel %vm427_vm9, 1.0, %v3344_v0  ;;  %vm5074_vm12 = vcmp.eq.s32.totalorder %v3949_v49, 9 }
  0xd4   :  { %v3062_v41 = vsel %vm5074_vm12, 1.0, %v3344_v0  ;;  %vm5075_vm11 = vcmp.eq.s32.totalorder %v3947_v61, 9  ;;  %vm5076_vm10 = vcmp.eq.s32.totalorder %v3943_v22, 10  ;;  %vm5077_vm7 = vcmp.eq.s32.totalorder %v3945_v34, 10 }
  0xd5   :  { %v3066_v63 = vsel %vm5075_vm11, 1.0, %v3344_v0  ;;  %v3070_v36 = vsel %vm5076_vm10, 1.0, %v3344_v0  ;;  %v3074_v43 = vsel %vm5077_vm7, 1.0, %v3344_v0  ;;  %vm5078_vm1 = vcmp.eq.s32.totalorder %v3949_v49, 10 }
  0xd6   :  { %v3078_v4 = vsel %vm5078_vm1, 1.0, %v3344_v0  ;;  %vm5079_vm9 = vcmp.eq.s32.totalorder %v3947_v61, 10  ;;  %vm5080_vm12 = vcmp.eq.s32.totalorder %v3943_v22, 11  ;;  %vm5081_vm11 = vcmp.eq.s32.totalorder %v3945_v34, 11 }
  0xd7   :  { %v3082_v30 = vsel %vm5079_vm9, 1.0, %v3344_v0  ;;  %v3086_v33 = vsel %vm5080_vm12, 1.0, %v3344_v0  ;;  %v3090_v23 = vsel %vm5081_vm11, 1.0, %v3344_v0  ;;  %vm5082_vm10 = vcmp.eq.s32.totalorder %v3949_v49, 11 }
  0xd8   :  { %v3094_v32 = vsel %vm5082_vm10, 1.0, %v3344_v0  ;;  %vm5083_vm7 = vcmp.eq.s32.totalorder %v3947_v61, 11  ;;  %vm5084_vm1 = vcmp.eq.s32.totalorder %v3943_v22, 12  ;;  %vm5085_vm9 = vcmp.eq.s32.totalorder %v3945_v34, 12 }
  0xd9   :  { %v3098_v35 = vsel %vm5083_vm7, 1.0, %v3344_v0  ;;  %v3102_v38 = vsel %vm5084_vm1, 1.0, %v3344_v0  ;;  %v3106_v40 = vsel %vm5085_vm9, 1.0, %v3344_v0  ;;  %vm5086_vm12 = vcmp.eq.s32.totalorder %v3949_v49, 12 }
  0xda   :  { %v3110_v51 = vsel %vm5086_vm12, 1.0, %v3344_v0  ;;  %vm5087_vm11 = vcmp.eq.s32.totalorder %v3947_v61, 12  ;;  %vm5088_vm10 = vcmp.eq.s32.totalorder %v3943_v22, 13  ;;  %vm5089_vm7 = vcmp.eq.s32.totalorder %v3945_v34, 13 }
  0xdb   :  { %v3114_v52 = vsel %vm5087_vm11, 1.0, %v3344_v0  ;;  %v3118_v9 = vsel %vm5088_vm10, 1.0, %v3344_v0  ;;  %v3122_v54 = vsel %vm5089_vm7, 1.0, %v3344_v0  ;;  %v3126_v31 = vsel %vm495_vm14, 1.0, %v3344_v0 }
  0xdc   :  { %v3130_v44 = vsel %vm499_vm15, 1.0, %v3344_v0  ;;  %v3134_v24 = vsel %vm503_vm4, 1.0, %v3344_v0  ;;  %v3138_v26 = vsel %vm507_vm3, 1.0, %v3344_v0  ;;  %v3142_v62 = vsel %vm511_vm0, 1.0, %v3344_v0 }
  0xdd   :  { %v3146_v56 = vsel %vm515_vm2, 1.0, %v3344_v0  ;;  %v3150_v15 = vsel %vm519_vm6, 1.0, %v3344_v0  ;;  %v3154_v10 = vsel %vm523_vm5, 1.0, %v3344_v0  ;;  %v3158_v28 = vsel %vm527_vm13, 1.0, %v3344_v0 }
  0xde   :  { %v3162_v1 = vsel %vm531_vm8, 1.0, %v3344_v0  ;;  %v1385_v37 = vadd.f32 %v3042_v17, %v3038_v58  ;;  %vm5090_vm0 = vcmask 1044480   ;;  %v1425_v3 = vadd.f32 %v3058_v8, %v3054_v42 }
  0xdf   :  { %v1387_v2 = vsel %vm5090_vm0, %v3050_v19, 0.0  ;;  %vm5091_vm2 = vmmov %vm5090_vm0  ;;  %v1465_v59 = vadd.f32 %v3074_v43, %v3070_v36  ;;  %v1505_v57 = vadd.f32 %v3090_v23, %v3086_v33  ;;  %v1545_v16 = vadd.f32 %v3106_v40, %v3102_v38 }
  0xe0   :  { %v1427_v5 = vsel %vm5091_vm2, %v3066_v63, 0.0  ;;  %vm5092_vm6 = vmmov %vm5090_vm0  ;;  %v1386_v6 = vadd.f32 %v3046_v39, %v1385_v37  ;;  %v1426_v18 = vadd.f32 %v3062_v41, %v1425_v3  ;;  %v1585_v50 = vadd.f32 %v3122_v54, %v3118_v9 }
  0xe1   :  { %v1467_v46 = vsel %vm5092_vm6, %v3082_v30, 0.0  ;;  %vm5093_vm5 = vmmov %vm5090_vm0  ;;  %v1466_v20 = vadd.f32 %v3078_v4, %v1465_v59  ;;  %v1506_v60 = vadd.f32 %v3094_v32, %v1505_v57  ;;  %v1546_v19 = vadd.f32 %v3110_v51, %v1545_v16 }
  0xe2   :  { %v1507_v29 = vsel %vm5093_vm5, %v3098_v35, 0.0  ;;  %vm5094_vm13 = vmmov %vm5090_vm0  ;;  %v1388_v58 = vadd.f32 %v1387_v2, %v1386_v6  ;;  %v1428_v17 = vadd.f32 %v1427_v5, %v1426_v18  ;;  %v1586_v36 = vadd.f32 %v3126_v31, %v1585_v50 }
  0xe3   :  { %v1547_v48 = vsel %vm5094_vm13, %v3114_v52, 0.0  ;;  %vm5095_vm8 = vmmov %vm5090_vm0  ;;  %v1468_v8 = vadd.f32 %v1467_v46, %v1466_v20  ;;  %v1508_v63 = vadd.f32 %v1507_v29, %v1506_v60  ;;  %v1625_v43 = vadd.f32 %v3138_v26, %v3134_v24 }
  0xe4   :  { %v1587_v42 = vsel %vm5095_vm8, %v3130_v44, 0.0  ;;  %v1389_v30 = vrot.slane %v1388_v58, 4  ;;  %v1429_v39 = vrot.slane %v1428_v17, 4  ;;  %v1548_v41 = vadd.f32 %v1547_v48, %v1546_v19  ;;  %vm5096_vm14 = vmmov %vm5090_vm0 }
  0xe5   :  { %v1627_v33 = vsel %vm5096_vm14, %v3146_v56, 0.0  ;;  %v1469_v23 = vrot.slane %v1468_v8, 4  ;;  %v1509_v4 = vrot.slane %v1508_v63, 4  ;;  %v1588_v32 = vadd.f32 %v1587_v42, %v1586_v36  ;;  %vm5097_vm15 = vmmov %vm5090_vm0 }
  0xe6   :  { %v1626_v35 = vadd.f32 %v3142_v62, %v1625_v43  ;;  %v1390_v38 = vadd.f32 %v1389_v30, %v1388_v58  ;;  %v1430_v40 = vadd.f32 %v1429_v39, %v1428_v17  ;;  %v1549_v52 = vrot.slane %v1548_v41, 4 }
  0xe7   :  { %v1665_v9 = vadd.f32 %v3154_v10, %v3150_v15  ;;  %v1470_v51 = vadd.f32 %v1469_v23, %v1468_v8  ;;  %v1510_v54 = vadd.f32 %v1509_v4, %v1508_v63  ;;  %v1589_v44 = vrot.slane %v1588_v32, 4 }
  0xe8   :  { %v1628_v37 = vadd.f32 %v1627_v33, %v1626_v35  ;;  %v1391_v2 = vrot.slane %v1390_v38, 2  ;;  %v1431_v31 = vrot.slane %v1430_v40, 2  ;;  %v1550_v24 = vadd.f32 %v1549_v52, %v1548_v41 }
  0xe9   :  { %v1666_v26 = vadd.f32 %v3158_v28, %v1665_v9  ;;  %v1471_v3 = vrot.slane %v1470_v51, 2  ;;  %v1511_v5 = vrot.slane %v1510_v54, 2  ;;  %v1590_v59 = vadd.f32 %v1589_v44, %v1588_v32 }
  0xea   :  { %v1629_v56 = vrot.slane %v1628_v37, 4  ;;  %v1392_v46 = vadd.f32 %v1391_v2, %v1390_v38  ;;  %v1432_v57 = vadd.f32 %v1431_v31, %v1430_v40  ;;  %v1551_v6 = vrot.slane %v1550_v24, 2 }
  0xeb   :  { %v1667_v62 = vsel %vm5097_vm15, %v3162_v1, 0.0  ;;  %v1472_v18 = vadd.f32 %v1471_v3, %v1470_v51  ;;  %v1512_v29 = vadd.f32 %v1511_v5, %v1510_v54  ;;  %v1591_v15 = vrot.slane %v1590_v59, 2 }
  0xec   :  { %v1630_v10 = vadd.f32 %v1629_v56, %v1628_v37  ;;  %v1393_v16 = vrot.slane %v1392_v46, 1  ;;  %v1433_v20 = vrot.slane %v1432_v57, 1  ;;  %v1552_v60 = vadd.f32 %v1551_v6, %v1550_v24 }
  0xed   :  { %v1668_v48 = vadd.f32 %v1667_v62, %v1666_v26  ;;  %v1473_v50 = vrot.slane %v1472_v18, 1  ;;  %v1513_v58 = vrot.slane %v1512_v29, 1  ;;  %v1592_v28 = vadd.f32 %v1591_v15, %v1590_v59 }
  0xee   :  { %v1631_v17 = vrot.slane %v1630_v10, 2  ;;  %v1394_v19 = vadd.f32 %v1393_v16, %v1392_v46  ;;  %v1434_v42 = vadd.f32 %v1433_v20, %v1432_v57  ;;  %v1553_v8 = vrot.slane %v1552_v60, 1 }
  0xef   :  { %v1669_v63 = vrot.slane %v1668_v48, 4  ;;  %v1474_v36 = vadd.f32 %v1473_v50, %v1472_v18  ;;  %v1514_v43 = vadd.f32 %v1513_v58, %v1512_v29  ;;  %v1593_v30 = vrot.slane %v1592_v28, 1 }
  0xf0   :  { %v1632_v1 = vadd.f32 %v1631_v17, %v1630_v10  ;;  %v1554_v39 = vadd.f32 %v1553_v8, %v1552_v60  ;;  %vm5098_vm4 = vcmask 1041409   ;;  %vm278_vm3 = vcmp.eq.s32.totalorder %v3394_v7, 0 }
  0xf1   :  { %v1670_v41 = vadd.f32 %v1669_v63, %v1668_v48  ;;  %v1798_v33 = vsel %vm5098_vm4, %v1434_v42, %v1394_v19  ;;  %vm282_vm1 = vcmp.eq.s32.totalorder %v3399_v12, 0  ;;  %v1594_v23 = vadd.f32 %v1593_v30, %v1592_v28 }
  0xf2   :  { %v1633_v4 = vrot.slane %v1632_v1, 1  ;;  %vm5099_vm9 = vcmask 1042434   ;;  %vm286_vm12 = vcmp.eq.s32.totalorder %v3405_v14, 0  ;;  %vm290_vm11 = vcmp.eq.s32.totalorder %v3401_v13, 0 }
  0xf3   :  { %v1799_v32 = vsel %vm5099_vm9, %v1474_v36, %v1798_v33  ;;  %v1671_v35 = vrot.slane %v1670_v41, 2  ;;  %vm5100_vm10 = vcmask 1043459   ;;  %vm294_vm7 = vcmp.eq.s32.totalorder %v3394_v7, 1 }
  0xf4   :  { %v1800_v38 = vsel %vm5100_vm10, %v1514_v43, %v1799_v32  ;;  %vm298_vm0 = vcmp.eq.s32.totalorder %v3399_v12, 1  ;;  %v1634_v40 = vadd.f32 %v1633_v4, %v1632_v1  ;;  %vm5101_vm2 = vcmask 1044484  }
  0xf5   :  { %v1801_v52 = vsel %vm5101_vm2, %v1554_v39, %v1800_v38  ;;  %v1672_v9 = vadd.f32 %v1671_v35, %v1670_v41  ;;  %vm5102_vm13 = vcmask 1045509   ;;  %vm5103_vm15 = vcmask 1046534  }
  0xf6   :  { %v1802_v51 = vsel %vm5102_vm13, %v1594_v23, %v1801_v52  ;;  %vm370_vm2 = vcmp.eq.s32.totalorder %v3401_v13, 5  ;;  %vm374_vm5 = vcmp.eq.s32.totalorder %v3394_v7, 6  ;;  %vm378_vm6 = vcmp.eq.s32.totalorder %v3399_v12, 6 }
  0xf7   :  { %v1803_v54 = vsel %vm5103_vm15, %v1634_v40, %v1802_v51  ;;  %v1673_v44 = vrot.slane %v1672_v9, 1  ;;  %vm382_vm13 = vcmp.eq.s32.totalorder %v3405_v14, 6  ;;  %vm5104_vm8 = vcmask 1047559  }
  0xf8   :  { %vm386_vm14 = vcmp.eq.s32.totalorder %v3401_v13, 6  ;;  %vm390_vm15 = vcmp.eq.s32.totalorder %v3394_v7, 7  ;;  %vm394_vm9 = vcmp.eq.s32.totalorder %v3399_v12, 7  ;;  %vm398_vm10 = vcmp.eq.s32.totalorder %v3405_v14, 7 }
  0xf9   :  { %v1674_v37 = vadd.f32 %v1673_v44, %v1672_v9  ;;  %vm402_vm4 = vcmp.eq.s32.totalorder %v3401_v13, 7  ;;  %v2909_v31 = vsel %vm278_vm3, 1.0, %v3344_v0  ;;  %v2913_v24 = vsel %vm282_vm1, 1.0, %v3344_v0 }
  0xfa   :  { %v2917_v26 = vsel %vm286_vm12, 1.0, %v3344_v0  ;;  %v2921_v3 = vsel %vm290_vm11, 1.0, %v3344_v0  ;;  %v2925_v5 = vsel %vm294_vm7, 1.0, %v3344_v0  ;;  %v2929_v59 = vsel %vm298_vm0, 1.0, %v3344_v0 }
  0xfb   :  { %v1804_v2 = vsel %vm5104_vm8, %v1674_v37, %v1803_v54  ;;  %vm5105_vm3 = vcmp.eq.s32.totalorder %v3405_v14, 1  ;;  %vm5106_vm1 = vcmp.eq.s32.totalorder %v3401_v13, 1  ;;  %vm5107_vm12 = vcmp.eq.s32.totalorder %v3394_v7, 2 }
  0xfc   :  { %1951 = vmatpush1.msra.mxu1 %v1804_v2  ;;  %v2933_v56 = vsel %vm5105_vm3, 1.0, %v3344_v0  ;;  %v2937_v46 = vsel %vm5106_vm1, 1.0, %v3344_v0  ;;  %v2941_v57 = vsel %vm5107_vm12, 1.0, %v3344_v0  ;;  %vm5108_vm11 = vcmp.eq.s32.totalorder %v3399_v12, 2 }
  0xfd   :  { %v2945_v6 = vsel %vm5108_vm11, 1.0, %v3344_v0  ;;  %vm5109_vm7 = vcmp.eq.s32.totalorder %v3405_v14, 2  ;;  %vm5110_vm0 = vcmp.eq.s32.totalorder %v3401_v13, 2  ;;  %vm5111_vm8 = vcmp.eq.s32.totalorder %v3394_v7, 3 }
  0xfe   :  { %v2949_v62 = vsel %vm5109_vm7, 1.0, %v3344_v0  ;;  %v2953_v18 = vsel %vm5110_vm0, 1.0, %v3344_v0  ;;  %v2957_v29 = vsel %vm5111_vm8, 1.0, %v3344_v0  ;;  %vm5112_vm3 = vcmp.eq.s32.totalorder %v3399_v12, 3 }
  0xff   :  { %v2961_v15 = vsel %vm5112_vm3, 1.0, %v3344_v0  ;;  %vm5113_vm1 = vcmp.eq.s32.totalorder %v3405_v14, 3  ;;  %vm5114_vm12 = vcmp.eq.s32.totalorder %v3401_v13, 3  ;;  %vm5115_vm11 = vcmp.eq.s32.totalorder %v3394_v7, 4 }
 0x100   :  { %v2965_v10 = vsel %vm5113_vm1, 1.0, %v3344_v0  ;;  %v2969_v16 = vsel %vm5114_vm12, 1.0, %v3344_v0  ;;  %v2973_v20 = vsel %vm5115_vm11, 1.0, %v3344_v0  ;;  %vm5116_vm7 = vcmp.eq.s32.totalorder %v3399_v12, 4 }
 0x101   :  { %v2977_v60 = vsel %vm5116_vm7, 1.0, %v3344_v0  ;;  %vm5117_vm0 = vcmp.eq.s32.totalorder %v3405_v14, 4  ;;  %vm5118_vm8 = vcmp.eq.s32.totalorder %v3401_v13, 4  ;;  %vm5119_vm3 = vcmp.eq.s32.totalorder %v3394_v7, 5 }
 0x102   :  { %v2981_v48 = vsel %vm5117_vm0, 1.0, %v3344_v0  ;;  %v2985_v50 = vsel %vm5118_vm8, 1.0, %v3344_v0  ;;  %v2989_v58 = vsel %vm5119_vm3, 1.0, %v3344_v0  ;;  %vm5120_vm1 = vcmp.eq.s32.totalorder %v3399_v12, 5 }
 0x103   :  { %v2993_v28 = vsel %vm5120_vm1, 1.0, %v3344_v0  ;;  %vm5121_vm12 = vcmp.eq.s32.totalorder %v3405_v14, 5  ;;  %v3001_v19 = vsel %vm370_vm2, 1.0, %v3344_v0  ;;  %v3005_v42 = vsel %vm374_vm5, 1.0, %v3344_v0 }
 0x104   :  { %v2997_v17 = vsel %vm5121_vm12, 1.0, %v3344_v0  ;;  %v3009_v8 = vsel %vm378_vm6, 1.0, %v3344_v0  ;;  %v3013_v63 = vsel %vm382_vm13, 1.0, %v3344_v0  ;;  %v3017_v36 = vsel %vm386_vm14, 1.0, %v3344_v0 }
 0x105   :  { %v3021_v43 = vsel %vm390_vm15, 1.0, %v3344_v0  ;;  %v3025_v30 = vsel %vm394_vm9, 1.0, %v3344_v0  ;;  %v3029_v1 = vsel %vm398_vm10, 1.0, %v3344_v0  ;;  %v3033_v39 = vsel %vm402_vm4, 1.0, %v3344_v0 }
 0x106   :  { %v1055_v41 = vadd.f32 %v2913_v24, %v2909_v31  ;;  %vm5122_vm6 = vcmask 1044480   ;;  %v1095_v23 = vadd.f32 %v2929_v59, %v2925_v5  ;;  %v1135_v7 = vadd.f32 %v2945_v6, %v2941_v57 }
 0x107   :  { %v1057_v33 = vsel %vm5122_vm6, %v2921_v3, 0.0  ;;  %vm5123_vm5 = vmmov %vm5122_vm6  ;;  %v1175_v12 = vadd.f32 %v2961_v15, %v2957_v29  ;;  %v1215_v40 = vadd.f32 %v2977_v60, %v2973_v20  ;;  %v1255_v13 = vadd.f32 %v2993_v28, %v2989_v58 }
 0x108   :  { %v1097_v4 = vsel %vm5123_vm5, %v2937_v46, 0.0  ;;  %vm5124_vm14 = vmmov %vm5123_vm5  ;;  %v1056_v35 = vadd.f32 %v2917_v26, %v1055_v41  ;;  %v1096_v14 = vadd.f32 %v2933_v56, %v1095_v23  ;;  %v1136_v52 = vadd.f32 %v2949_v62, %v1135_v7 }
 0x109   :  { %v1137_v32 = vsel %vm5124_vm14, %v2953_v18, 0.0  ;;  %vm5125_vm9 = vmmov %vm5123_vm5  ;;  %v1176_v54 = vadd.f32 %v2965_v10, %v1175_v12  ;;  %v1216_v44 = vadd.f32 %v2981_v48, %v1215_v40  ;;  %v1256_v24 = vadd.f32 %v2997_v17, %v1255_v13 }
 0x10a   :  { %v1177_v38 = vsel %vm5125_vm9, %v2969_v16, 0.0  ;;  %vm5126_vm10 = vmmov %vm5123_vm5  ;;  %v1058_v51 = vadd.f32 %v1057_v33, %v1056_v35  ;;  %v1098_v2 = vadd.f32 %v1097_v4, %v1096_v14  ;;  %v1138_v31 = vadd.f32 %v1137_v32, %v1136_v52 }
 0x10b   :  { %v1217_v9 = vsel %vm5126_vm10, %v2985_v50, 0.0  ;;  %vm5127_vm4 = vmmov %vm5123_vm5  ;;  %v1295_v3 = vadd.f32 %v3009_v8, %v3005_v42  ;;  %v1178_v26 = vadd.f32 %v1177_v38, %v1176_v54  ;;  %v1335_v10 = vadd.f32 %v3025_v30, %v3021_v43 }
 0x10c   :  { %v1257_v37 = vsel %vm5127_vm4, %v3001_v19, 0.0  ;;  %v1059_v5 = vrot.slane %v1058_v51, 4  ;;  %v1218_v59 = vadd.f32 %v1217_v9, %v1216_v44  ;;  %vm5128_vm2 = vmmov %vm5127_vm4  ;;  %v1099_v57 = vrot.slane %v1098_v2, 4 }
 0x10d   :  { %v1297_v46 = vsel %vm5128_vm2, %v3017_v36, 0.0  ;;  %v1139_v56 = vrot.slane %v1138_v31, 4  ;;  %v1258_v6 = vadd.f32 %v1257_v37, %v1256_v24  ;;  %v1296_v62 = vadd.f32 %v3013_v63, %v1295_v3  ;;  %vm5129_vm13 = vmmov %vm5128_vm2 }
 0x10e   :  { %v1060_v18 = vadd.f32 %v1059_v5, %v1058_v51  ;;  %v1179_v29 = vrot.slane %v1178_v26, 4  ;;  %v1219_v15 = vrot.slane %v1218_v59, 4  ;;  %v1100_v16 = vadd.f32 %v1099_v57, %v1098_v2 }
 0x10f   :  { %v1140_v20 = vadd.f32 %v1139_v56, %v1138_v31  ;;  %v1259_v60 = vrot.slane %v1258_v6, 4  ;;  %v1298_v48 = vadd.f32 %v1297_v46, %v1296_v62  ;;  %v1336_v17 = vadd.f32 %v3029_v1, %v1335_v10 }
 0x110   :  { %v1061_v50 = vrot.slane %v1060_v18, 2  ;;  %v1180_v58 = vadd.f32 %v1179_v29, %v1178_v26  ;;  %v1220_v28 = vadd.f32 %v1219_v15, %v1218_v59  ;;  %v1101_v19 = vrot.slane %v1100_v16, 2 }
 0x111   :  { %v1141_v42 = vrot.slane %v1140_v20, 2  ;;  %v1260_v8 = vadd.f32 %v1259_v60, %v1258_v6  ;;  %v1299_v36 = vrot.slane %v1298_v48, 4  ;;  %v1337_v63 = vsel %vm5129_vm13, %v3033_v39, 0.0 }
 0x112   :  { %v1062_v41 = vadd.f32 %v1061_v50, %v1060_v18  ;;  %v1181_v33 = vrot.slane %v1180_v58, 2  ;;  %v1221_v23 = vrot.slane %v1220_v28, 2  ;;  %v1102_v4 = vadd.f32 %v1101_v19, %v1100_v16 }
 0x113   :  { %v1142_v7 = vadd.f32 %v1141_v42, %v1140_v20  ;;  %v1261_v43 = vrot.slane %v1260_v8, 2  ;;  %v1300_v30 = vadd.f32 %v1299_v36, %v1298_v48  ;;  %v1338_v38 = vadd.f32 %v1337_v63, %v1336_v17 }
 0x114   :  { %v1063_v32 = vrot.slane %v1062_v41, 1  ;;  %v1182_v35 = vadd.f32 %v1181_v33, %v1180_v58  ;;  %v1222_v12 = vadd.f32 %v1221_v23, %v1220_v28  ;;  %v1103_v40 = vrot.slane %v1102_v4, 1 }
 0x115   :  { %v1143_v14 = vrot.slane %v1142_v7, 1  ;;  %v1262_v1 = vadd.f32 %v1261_v43, %v1260_v8  ;;  %v1301_v52 = vrot.slane %v1300_v30, 2  ;;  %v1339_v54 = vrot.slane %v1338_v38, 4 }
 0x116   :  { %v1064_v9 = vadd.f32 %v1063_v32, %v1062_v41  ;;  %v1183_v13 = vrot.slane %v1182_v35, 1  ;;  %v1223_v51 = vrot.slane %v1222_v12, 1  ;;  %v1104_v44 = vadd.f32 %v1103_v40, %v1102_v4 }
 0x117   :  { %v1144_v37 = vadd.f32 %v1143_v14, %v1142_v7  ;;  %v1263_v2 = vrot.slane %v1262_v1, 1  ;;  %v1302_v39 = vadd.f32 %v1301_v52, %v1300_v30  ;;  %v1340_v3 = vadd.f32 %v1339_v54, %v1338_v38 }
 0x118   :  { %v1184_v31 = vadd.f32 %v1183_v13, %v1182_v35  ;;  %v1224_v24 = vadd.f32 %v1223_v51, %v1222_v12  ;;  %vm5130_vm15 = vcmask 1041409   ;;  %vm280_vm11 = vcmp.eq.s32.totalorder %v3591_v25, 0 }
 0x119   :  { %v1264_v5 = vadd.f32 %v1263_v2, %v1262_v1  ;;  %v1303_v26 = vrot.slane %v1302_v39, 1  ;;  %v1763_v59 = vsel %vm5130_vm15, %v1104_v44, %v1064_v9  ;;  %vm284_vm7 = vcmp.eq.s32.totalorder %v3595_v21, 0 }
 0x11a   :  { %v1341_v46 = vrot.slane %v1340_v3, 2  ;;  %vm5131_vm0 = vcmask 1042434   ;;  %vm288_vm8 = vcmp.eq.s32.totalorder %v3601_v27, 0  ;;  %vm292_vm3 = vcmp.eq.s32.totalorder %v3597_v11, 0 }
 0x11b   :  { %v1764_v57 = vsel %vm5131_vm0, %v1144_v37, %v1763_v59  ;;  %v1304_v56 = vadd.f32 %v1303_v26, %v1302_v39  ;;  %vm5132_vm1 = vcmask 1043459   ;;  %vm296_vm12 = vcmp.eq.s32.totalorder %v3591_v25, 1 }
 0x11c   :  { %v1765_v6 = vsel %vm5132_vm1, %v1184_v31, %v1764_v57  ;;  %vm300_vm6 = vcmp.eq.s32.totalorder %v3595_v21, 1  ;;  %v1342_v62 = vadd.f32 %v1341_v46, %v1340_v3  ;;  %vm5133_vm5 = vcmask 1044484  }
 0x11d   :  { %v1766_v18 = vsel %vm5133_vm5, %v1224_v24, %v1765_v6  ;;  %vm5134_vm10 = vcmask 1045509   ;;  %vm5135_vm15 = vcmask 1046534   ;;  %vm372_vm5 = vcmp.eq.s32.totalorder %v3597_v11, 5 }
 0x11e   :  { %v1767_v29 = vsel %vm5134_vm10, %v1264_v5, %v1766_v18  ;;  %v1343_v15 = vrot.slane %v1342_v62, 1  ;;  %vm5136_vm14 = vcmask 1047559   ;;  %vm376_vm9 = vcmp.eq.s32.totalorder %v3591_v25, 6 }
 0x11f   :  { %v1768_v10 = vsel %vm5135_vm15, %v1304_v56, %v1767_v29  ;;  %vm380_vm10 = vcmp.eq.s32.totalorder %v3595_v21, 6  ;;  %vm384_vm2 = vcmp.eq.s32.totalorder %v3601_v27, 6  ;;  %vm388_vm13 = vcmp.eq.s32.totalorder %v3597_v11, 6 }
 0x120   :  { %v1344_v16 = vadd.f32 %v1343_v15, %v1342_v62  ;;  %vm392_vm4 = vcmp.eq.s32.totalorder %v3591_v25, 7  ;;  %vm396_vm15 = vcmp.eq.s32.totalorder %v3595_v21, 7  ;;  %vm400_vm0 = vcmp.eq.s32.totalorder %v3601_v27, 7 }
 0x121   :  { %vm404_vm1 = vcmp.eq.s32.totalorder %v3597_v11, 7  ;;  %v2911_v60 = vsel %vm280_vm11, 1.0, %v3344_v0  ;;  %v2915_v48 = vsel %vm284_vm7, 1.0, %v3344_v0  ;;  %v2919_v50 = vsel %vm288_vm8, 1.0, %v3344_v0 }
 0x122   :  { %v1769_v20 = vsel %vm5136_vm14, %v1344_v16, %v1768_v10  ;;  %v2923_v58 = vsel %vm292_vm3, 1.0, %v3344_v0  ;;  %v2927_v28 = vsel %vm296_vm12, 1.0, %v3344_v0  ;;  %v2931_v17 = vsel %vm300_vm6, 1.0, %v3344_v0 }
 0x123   :  { %1863 = vmatprep.subr.mxu0 %v1769_v20  ;;  %vm5137_vm11 = vcmp.eq.s32.totalorder %v3601_v27, 1  ;;  %vm5138_vm7 = vcmp.eq.s32.totalorder %v3597_v11, 1  ;;  %vm5139_vm8 = vcmp.eq.s32.totalorder %v3591_v25, 2  ;;  %vm5140_vm3 = vcmp.eq.s32.totalorder %v3595_v21, 2 }
 0x124   :  { %v2935_v19 = vsel %vm5137_vm11, 1.0, %v3344_v0  ;;  %v2939_v42 = vsel %vm5138_vm7, 1.0, %v3344_v0  ;;  %v2943_v8 = vsel %vm5139_vm8, 1.0, %v3344_v0  ;;  %v2947_v36 = vsel %vm5140_vm3, 1.0, %v3344_v0 }
 0x125   :  { %vm5141_vm12 = vcmp.eq.s32.totalorder %v3601_v27, 2  ;;  %vm5142_vm6 = vcmp.eq.s32.totalorder %v3597_v11, 2  ;;  %vm5143_vm14 = vcmp.eq.s32.totalorder %v3591_v25, 3  ;;  %vm5144_vm11 = vcmp.eq.s32.totalorder %v3595_v21, 3 }
 0x126   :  { %v2951_v41 = vsel %vm5141_vm12, 1.0, %v3344_v0  ;;  %v2955_v33 = vsel %vm5142_vm6, 1.0, %v3344_v0  ;;  %v2959_v23 = vsel %vm5143_vm14, 1.0, %v3344_v0  ;;  %v2963_v63 = vsel %vm5144_vm11, 1.0, %v3344_v0 }
 0x127   :  { %vm5145_vm7 = vcmp.eq.s32.totalorder %v3601_v27, 3  ;;  %vm5146_vm8 = vcmp.eq.s32.totalorder %v3597_v11, 3  ;;  %vm5147_vm3 = vcmp.eq.s32.totalorder %v3591_v25, 4  ;;  %vm5148_vm12 = vcmp.eq.s32.totalorder %v3595_v21, 4 }
 0x128   :  { %v2967_v4 = vsel %vm5145_vm7, 1.0, %v3344_v0  ;;  %v2971_v7 = vsel %vm5146_vm8, 1.0, %v3344_v0  ;;  %v2975_v43 = vsel %vm5147_vm3, 1.0, %v3344_v0  ;;  %v2979_v30 = vsel %vm5148_vm12, 1.0, %v3344_v0 }
 0x129   :  { %vm5149_vm6 = vcmp.eq.s32.totalorder %v3601_v27, 4  ;;  %vm5150_vm14 = vcmp.eq.s32.totalorder %v3597_v11, 4  ;;  %vm5151_vm11 = vcmp.eq.s32.totalorder %v3591_v25, 5  ;;  %vm5152_vm7 = vcmp.eq.s32.totalorder %v3595_v21, 5 }
 0x12a   :  { %v2983_v32 = vsel %vm5149_vm6, 1.0, %v3344_v0  ;;  %v2987_v35 = vsel %vm5150_vm14, 1.0, %v3344_v0  ;;  %v2991_v12 = vsel %vm5151_vm11, 1.0, %v3344_v0  ;;  %v2995_v38 = vsel %vm5152_vm7, 1.0, %v3344_v0 }
 0x12b   :  { %vm5153_vm8 = vcmp.eq.s32.totalorder %v3601_v27, 5  ;;  %v3003_v14 = vsel %vm372_vm5, 1.0, %v3344_v0  ;;  %v3007_v1 = vsel %vm376_vm9, 1.0, %v3344_v0  ;;  %v3011_v52 = vsel %vm380_vm10, 1.0, %v3344_v0 }
 0x12c   :  { %v2999_v40 = vsel %vm5153_vm8, 1.0, %v3344_v0  ;;  %v3015_v9 = vsel %vm384_vm2, 1.0, %v3344_v0  ;;  %v3019_v13 = vsel %vm388_vm13, 1.0, %v3344_v0  ;;  %v3023_v51 = vsel %vm392_vm4, 1.0, %v3344_v0 }
 0x12d   :  { %v3027_v54 = vsel %vm396_vm15, 1.0, %v3344_v0  ;;  %v3031_v44 = vsel %vm400_vm0, 1.0, %v3344_v0  ;;  %v3035_v37 = vsel %vm404_vm1, 1.0, %v3344_v0  ;;  %v1075_v2 = vadd.f32 %v2915_v48, %v2911_v60 }
 0x12e   :  { %vm5154_vm9 = vcmask 1044480   ;;  %v1115_v31 = vadd.f32 %v2931_v17, %v2927_v28  ;;  %v1155_v25 = vadd.f32 %v2947_v36, %v2943_v8  ;;  %v1195_v5 = vadd.f32 %v2963_v63, %v2959_v23 }
 0x12f   :  { %v1077_v39 = vsel %vm5154_vm9, %v2923_v58, 0.0  ;;  %vm5155_vm2 = vmmov %vm5154_vm9  ;;  %v1076_v21 = vadd.f32 %v2919_v50, %v1075_v2  ;;  %v1235_v27 = vadd.f32 %v2979_v30, %v2975_v43  ;;  %v1275_v56 = vadd.f32 %v2995_v38, %v2991_v12 }
 0x130   :  { %v1117_v24 = vsel %vm5155_vm2, %v2939_v42, 0.0  ;;  %vm5156_vm4 = vmmov %vm5155_vm2  ;;  %v1116_v26 = vadd.f32 %v2935_v19, %v1115_v31  ;;  %v1156_v46 = vadd.f32 %v2951_v41, %v1155_v25  ;;  %v1196_v57 = vadd.f32 %v2967_v4, %v1195_v5 }
 0x131   :  { %v1157_v3 = vsel %vm5156_vm4, %v2955_v33, 0.0  ;;  %vm5157_vm13 = vmmov %vm5155_vm2  ;;  %v1078_v6 = vadd.f32 %v1077_v39, %v1076_v21  ;;  %v1236_v18 = vadd.f32 %v2983_v32, %v1235_v27  ;;  %v1276_v16 = vadd.f32 %v2999_v40, %v1275_v56 }
 0x132   :  { %v1197_v59 = vsel %vm5157_vm13, %v2971_v7, 0.0  ;;  %vm5158_vm0 = vmmov %vm5155_vm2  ;;  %v1118_v62 = vadd.f32 %v1117_v24, %v1116_v26  ;;  %v1158_v15 = vadd.f32 %v1157_v3, %v1156_v46  ;;  %v1315_v20 = vadd.f32 %v3011_v52, %v3007_v1 }
 0x133   :  { %v1237_v11 = vsel %vm5158_vm0, %v2987_v35, 0.0  ;;  %vm5159_vm1 = vmmov %vm5158_vm0  ;;  %v1198_v10 = vadd.f32 %v1197_v59, %v1196_v57  ;;  %v1079_v60 = vrot.slane %v1078_v6, 4  ;;  %v1355_v33 = vadd.f32 %v3027_v54, %v3023_v51 }
 0x134   :  { %v1277_v29 = vsel %vm5159_vm1, %v3003_v14, 0.0  ;;  %v1119_v48 = vrot.slane %v1118_v62, 4  ;;  %v1238_v50 = vadd.f32 %v1237_v11, %v1236_v18  ;;  %vm5160_vm5 = vmmov %vm5158_vm0  ;;  %v1159_v28 = vrot.slane %v1158_v15, 4 }
 0x135   :  { %v1317_v58 = vsel %vm5160_vm5, %v3019_v13, 0.0  ;;  %v1199_v17 = vrot.slane %v1198_v10, 4  ;;  %v1278_v19 = vadd.f32 %v1277_v29, %v1276_v16  ;;  %v1316_v42 = vadd.f32 %v3015_v9, %v1315_v20  ;;  %vm5161_vm10 = vmmov %vm5158_vm0 }
 0x136   :  { %v1080_v8 = vadd.f32 %v1079_v60, %v1078_v6  ;;  %v1120_v36 = vadd.f32 %v1119_v48, %v1118_v62  ;;  %v1239_v41 = vrot.slane %v1238_v50, 4  ;;  %v1160_v23 = vadd.f32 %v1159_v28, %v1158_v15 }
 0x137   :  { %v1200_v63 = vadd.f32 %v1199_v17, %v1198_v10  ;;  %v1279_v4 = vrot.slane %v1278_v19, 4  ;;  %v1318_v7 = vadd.f32 %v1317_v58, %v1316_v42  ;;  %v1356_v35 = vadd.f32 %v3031_v44, %v1355_v33 }
 0x138   :  { %v1081_v43 = vrot.slane %v1080_v8, 2  ;;  %v1121_v30 = vrot.slane %v1120_v36, 2  ;;  %v1240_v32 = vadd.f32 %v1239_v41, %v1238_v50  ;;  %v1161_v12 = vrot.slane %v1160_v23, 2 }
 0x139   :  { %v1201_v38 = vrot.slane %v1200_v63, 2  ;;  %v1280_v40 = vadd.f32 %v1279_v4, %v1278_v19  ;;  %v1319_v14 = vrot.slane %v1318_v7, 4  ;;  %v1357_v9 = vsel %vm5161_vm10, %v3035_v37, 0.0 }
 0x13a   :  { %v1082_v1 = vadd.f32 %v1081_v43, %v1080_v8  ;;  %v1122_v52 = vadd.f32 %v1121_v30, %v1120_v36  ;;  %v1241_v13 = vrot.slane %v1240_v32, 2  ;;  %v1162_v2 = vadd.f32 %v1161_v12, %v1160_v23 }
 0x13b   :  { %v1202_v39 = vadd.f32 %v1201_v38, %v1200_v63  ;;  %v1281_v51 = vrot.slane %v1280_v40, 2  ;;  %v1320_v54 = vadd.f32 %v1319_v14, %v1318_v7  ;;  %v1358_v3 = vadd.f32 %v1357_v9, %v1356_v35 }
 0x13c   :  { %v1083_v31 = vrot.slane %v1082_v1, 1  ;;  %v1123_v24 = vrot.slane %v1122_v52, 1  ;;  %v1242_v25 = vadd.f32 %v1241_v13, %v1240_v32  ;;  %v1163_v5 = vrot.slane %v1162_v2, 1 }
 0x13d   :  { %v1203_v21 = vrot.slane %v1202_v39, 1  ;;  %v1282_v44 = vadd.f32 %v1281_v51, %v1280_v40  ;;  %v1321_v26 = vrot.slane %v1320_v54, 2  ;;  %v1359_v57 = vrot.slane %v1358_v3, 4 }
 0x13e   :  { %v1084_v59 = vadd.f32 %v1083_v31, %v1082_v1  ;;  %v1124_v27 = vadd.f32 %v1123_v24, %v1122_v52  ;;  %v1243_v46 = vrot.slane %v1242_v25, 1  ;;  %v1164_v11 = vadd.f32 %v1163_v5, %v1162_v2 }
 0x13f   :  { %v1204_v56 = vadd.f32 %v1203_v21, %v1202_v39  ;;  %v1283_v6 = vrot.slane %v1282_v44, 1  ;;  %v1322_v37 = vadd.f32 %v1321_v26, %v1320_v54  ;;  %v1360_v18 = vadd.f32 %v1359_v57, %v1358_v3 }
 0x140   :  { %v1244_v62 = vadd.f32 %v1243_v46, %v1242_v25  ;;  %vm5162_vm15 = vcmask 1041409   ;;  %vm5163_vm3 = vcmask 1042434   ;;  %vm277_vm12 = vcmp.eq.s32.totalorder %v3768_v45, 0 }
 0x141   :  { %v1777_v29 = vsel %vm5162_vm15, %v1124_v27, %v1084_v59  ;;  %v1284_v15 = vadd.f32 %v1283_v6, %v1282_v44  ;;  %v1323_v10 = vrot.slane %v1322_v37, 1  ;;  %vm281_vm6 = vcmp.eq.s32.totalorder %v3774_v55, 0 }
 0x142   :  { %v1778_v16 = vsel %vm5163_vm3, %v1164_v11, %v1777_v29  ;;  %v1361_v20 = vrot.slane %v1360_v18, 2  ;;  %vm5164_vm14 = vcmask 1043459   ;;  %vm285_vm11 = vcmp.eq.s32.totalorder %v3776_v47, 0 }
 0x143   :  { %v1779_v60 = vsel %vm5164_vm14, %v1204_v56, %v1778_v16  ;;  %vm289_vm7 = vcmp.eq.s32.totalorder %v3770_v53, 0  ;;  %v1324_v48 = vadd.f32 %v1323_v10, %v1322_v37  ;;  %vm5165_vm8 = vcmask 1044484  }
 0x144   :  { %v1780_v50 = vsel %vm5165_vm8, %v1244_v62, %v1779_v60  ;;  %vm293_vm9 = vcmp.eq.s32.totalorder %v3768_v45, 1  ;;  %vm297_vm2 = vcmp.eq.s32.totalorder %v3774_v55, 1  ;;  %v1362_v58 = vadd.f32 %v1361_v20, %v1360_v18 }
 0x145   :  { %vm5166_vm4 = vcmask 1045509   ;;  %vm5167_vm1 = vcmask 1046534   ;;  %vm369_vm8 = vcmp.eq.s32.totalorder %v3770_v53, 5  ;;  %vm5168_vm13 = vcmask 1047559  }
 0x146   :  { %v1781_v28 = vsel %vm5166_vm4, %v1284_v15, %v1780_v50  ;;  %v1363_v19 = vrot.slane %v1362_v58, 1  ;;  %vm373_vm4 = vcmp.eq.s32.totalorder %v3768_v45, 6  ;;  %vm377_vm0 = vcmp.eq.s32.totalorder %v3774_v55, 6 }
 0x147   :  { %v1782_v17 = vsel %vm5167_vm1, %v1324_v48, %v1781_v28  ;;  %vm381_vm1 = vcmp.eq.s32.totalorder %v3776_v47, 6  ;;  %vm385_vm10 = vcmp.eq.s32.totalorder %v3770_v53, 6  ;;  %vm389_vm15 = vcmp.eq.s32.totalorder %v3768_v45, 7 }
 0x148   :  { %v1364_v42 = vadd.f32 %v1363_v19, %v1362_v58  ;;  %vm393_vm5 = vcmp.eq.s32.totalorder %v3774_v55, 7  ;;  %vm397_vm3 = vcmp.eq.s32.totalorder %v3776_v47, 7  ;;  %vm401_vm14 = vcmp.eq.s32.totalorder %v3770_v53, 7 }
 0x149   :  { %v2908_v36 = vsel %vm277_vm12, 1.0, %v3344_v0  ;;  %v2912_v41 = vsel %vm281_vm6, 1.0, %v3344_v0  ;;  %v2916_v33 = vsel %vm285_vm11, 1.0, %v3344_v0  ;;  %v2920_v23 = vsel %vm289_vm7, 1.0, %v3344_v0 }
 0x14a   :  { %v1783_v8 = vsel %vm5168_vm13, %v1364_v42, %v1782_v17  ;;  %v2924_v63 = vsel %vm293_vm9, 1.0, %v3344_v0  ;;  %v2928_v4 = vsel %vm297_vm2, 1.0, %v3344_v0  ;;  %vm5169_vm12 = vcmp.eq.s32.totalorder %v3776_v47, 1 }
 0x14b   :  { %1952 = vmatprep.subr.mxu1 %v1783_v8  ;;  %v2932_v7 = vsel %vm5169_vm12, 1.0, %v3344_v0  ;;  %vm5170_vm6 = vcmp.eq.s32.totalorder %v3770_v53, 1  ;;  %vm5171_vm11 = vcmp.eq.s32.totalorder %v3768_v45, 2  ;;  %vm5172_vm7 = vcmp.eq.s32.totalorder %v3774_v55, 2 }
 0x14c   :  { %v2936_v43 = vsel %vm5170_vm6, 1.0, %v3344_v0  ;;  %v2940_v30 = vsel %vm5171_vm11, 1.0, %v3344_v0  ;;  %v2944_v32 = vsel %vm5172_vm7, 1.0, %v3344_v0  ;;  %vm5173_vm9 = vcmp.eq.s32.totalorder %v3776_v47, 2 }
 0x14d   :  { %v2948_v35 = vsel %vm5173_vm9, 1.0, %v3344_v0  ;;  %vm5174_vm2 = vcmp.eq.s32.totalorder %v3770_v53, 2  ;;  %vm5175_vm13 = vcmp.eq.s32.totalorder %v3768_v45, 3  ;;  %vm5176_vm12 = vcmp.eq.s32.totalorder %v3774_v55, 3 }
 0x14e   :  { %v2952_v12 = vsel %vm5174_vm2, 1.0, %v3344_v0  ;;  %v2956_v38 = vsel %vm5175_vm13, 1.0, %v3344_v0  ;;  %v2960_v40 = vsel %vm5176_vm12, 1.0, %v3344_v0  ;;  %vm5177_vm6 = vcmp.eq.s32.totalorder %v3776_v47, 3 }
 0x14f   :  { %v2964_v14 = vsel %vm5177_vm6, 1.0, %v3344_v0  ;;  %vm5178_vm11 = vcmp.eq.s32.totalorder %v3770_v53, 3  ;;  %vm5179_vm7 = vcmp.eq.s32.totalorder %v3768_v45, 4  ;;  %vm5180_vm9 = vcmp.eq.s32.totalorder %v3774_v55, 4 }
 0x150   :  { %v2968_v1 = vsel %vm5178_vm11, 1.0, %v3344_v0  ;;  %v2972_v52 = vsel %vm5179_vm7, 1.0, %v3344_v0  ;;  %v2976_v13 = vsel %vm5180_vm9, 1.0, %v3344_v0  ;;  %vm5181_vm2 = vcmp.eq.s32.totalorder %v3776_v47, 4 }
 0x151   :  { %v2980_v9 = vsel %vm5181_vm2, 1.0, %v3344_v0  ;;  %vm5182_vm13 = vcmp.eq.s32.totalorder %v3770_v53, 4  ;;  %vm5183_vm12 = vcmp.eq.s32.totalorder %v3768_v45, 5  ;;  %vm5184_vm6 = vcmp.eq.s32.totalorder %v3774_v55, 5 }
 0x152   :  { %v2984_v2 = vsel %vm5182_vm13, 1.0, %v3344_v0  ;;  %v2988_v39 = vsel %vm5183_vm12, 1.0, %v3344_v0  ;;  %v2992_v51 = vsel %vm5184_vm6, 1.0, %v3344_v0  ;;  %vm5185_vm11 = vcmp.eq.s32.totalorder %v3776_v47, 5 }
 0x153   :  { %v2996_v54 = vsel %vm5185_vm11, 1.0, %v3344_v0  ;;  %v3000_v31 = vsel %vm369_vm8, 1.0, %v3344_v0  ;;  %v3004_v24 = vsel %vm373_vm4, 1.0, %v3344_v0  ;;  %v3008_v25 = vsel %vm377_vm0, 1.0, %v3344_v0 }
 0x154   :  { %v3012_v3 = vsel %vm381_vm1, 1.0, %v3344_v0  ;;  %v3016_v5 = vsel %vm385_vm10, 1.0, %v3344_v0  ;;  %v3020_v21 = vsel %vm389_vm15, 1.0, %v3344_v0  ;;  %v3024_v44 = vsel %vm393_vm5, 1.0, %v3344_v0 }
 0x155   :  { %v3028_v26 = vsel %vm397_vm3, 1.0, %v3344_v0  ;;  %v3032_v59 = vsel %vm401_vm14, 1.0, %v3344_v0  ;;  %v1045_v27 = vadd.f32 %v2912_v41, %v2908_v36  ;;  %vm5186_vm0 = vcmask 1044480  }
 0x156   :  { %v1047_v46 = vsel %vm5186_vm0, %v2920_v23, 0.0  ;;  %v1085_v57 = vadd.f32 %v2928_v4, %v2924_v63  ;;  %vm5187_vm10 = vmmov %vm5186_vm0  ;;  %v1125_v45 = vadd.f32 %v2944_v32, %v2940_v30  ;;  %v1165_v6 = vadd.f32 %v2960_v40, %v2956_v38 }
 0x157   :  { %v1087_v11 = vsel %vm5187_vm10, %v2936_v43, 0.0  ;;  %vm5188_vm15 = vmmov %vm5186_vm0  ;;  %v1046_v37 = vadd.f32 %v2916_v33, %v1045_v27  ;;  %v1205_v47 = vadd.f32 %v2976_v13, %v2972_v52  ;;  %v1245_v15 = vadd.f32 %v2992_v51, %v2988_v39 }
 0x158   :  { %v1127_v56 = vsel %vm5188_vm15, %v2952_v12, 0.0  ;;  %vm5189_vm8 = vmmov %vm5186_vm0  ;;  %v1086_v62 = vadd.f32 %v2932_v7, %v1085_v57  ;;  %v1126_v29 = vadd.f32 %v2948_v35, %v1125_v45  ;;  %v1166_v53 = vadd.f32 %v2964_v14, %v1165_v6 }
 0x159   :  { %v1167_v55 = vsel %vm5189_vm8, %v2968_v1, 0.0  ;;  %vm5190_vm5 = vmmov %vm5186_vm0  ;;  %v1048_v16 = vadd.f32 %v1047_v46, %v1046_v37  ;;  %v1206_v60 = vadd.f32 %v2980_v9, %v1205_v47  ;;  %v1285_v48 = vadd.f32 %v3008_v25, %v3004_v24 }
 0x15a   :  { %v1207_v18 = vsel %vm5190_vm5, %v2984_v2, 0.0  ;;  %vm5191_vm3 = vmmov %vm5186_vm0  ;;  %v1088_v20 = vadd.f32 %v1087_v11, %v1086_v62  ;;  %v1128_v50 = vadd.f32 %v1127_v56, %v1126_v29  ;;  %v1168_v58 = vadd.f32 %v1167_v55, %v1166_v53 }
 0x15b   :  { %v1247_v10 = vsel %vm5191_vm3, %v3000_v31, 0.0  ;;  %v1246_v28 = vadd.f32 %v2996_v54, %v1245_v15  ;;  %vm5192_vm14 = vmmov %vm5186_vm0  ;;  %v1049_v19 = vrot.slane %v1048_v16, 4  ;;  %v1208_v8 = vadd.f32 %v1207_v18, %v1206_v60 }
 0x15c   :  { %v1287_v17 = vsel %vm5192_vm14, %v3016_v5, 0.0  ;;  %v1089_v42 = vrot.slane %v1088_v20, 4  ;;  %v1286_v36 = vadd.f32 %v3012_v3, %v1285_v48  ;;  %v1129_v41 = vrot.slane %v1128_v50, 4  ;;  %vm5193_vm4 = vmmov %vm5186_vm0 }
 0x15d   :  { %v1169_v33 = vrot.slane %v1168_v58, 4  ;;  %v1248_v23 = vadd.f32 %v1247_v10, %v1246_v28  ;;  %v1325_v63 = vadd.f32 %v3024_v44, %v3020_v21  ;;  %v1050_v4 = vadd.f32 %v1049_v19, %v1048_v16 }
 0x15e   :  { %v1090_v7 = vadd.f32 %v1089_v42, %v1088_v20  ;;  %v1209_v43 = vrot.slane %v1208_v8, 4  ;;  %v1288_v30 = vadd.f32 %v1287_v17, %v1286_v36  ;;  %v1130_v32 = vadd.f32 %v1129_v41, %v1128_v50 }
 0x15f   :  { %v1170_v35 = vadd.f32 %v1169_v33, %v1168_v58  ;;  %v1249_v12 = vrot.slane %v1248_v23, 4  ;;  %v1326_v38 = vadd.f32 %v3028_v26, %v1325_v63  ;;  %v1051_v40 = vrot.slane %v1050_v4, 2 }
 0x160   :  { %v1091_v14 = vrot.slane %v1090_v7, 2  ;;  %v1210_v1 = vadd.f32 %v1209_v43, %v1208_v8  ;;  %v1289_v52 = vrot.slane %v1288_v30, 4  ;;  %v1131_v13 = vrot.slane %v1130_v32, 2 }
 0x161   :  { %v1171_v9 = vrot.slane %v1170_v35, 2  ;;  %v1250_v2 = vadd.f32 %v1249_v12, %v1248_v23  ;;  %v1327_v39 = vsel %vm5193_vm4, %v3032_v59, 0.0  ;;  %v1052_v51 = vadd.f32 %v1051_v40, %v1050_v4 }
 0x162   :  { %v1092_v54 = vadd.f32 %v1091_v14, %v1090_v7  ;;  %v1211_v31 = vrot.slane %v1210_v1, 2  ;;  %v1290_v24 = vadd.f32 %v1289_v52, %v1288_v30  ;;  %v1132_v25 = vadd.f32 %v1131_v13, %v1130_v32 }
 0x163   :  { %v1172_v3 = vadd.f32 %v1171_v9, %v1170_v35  ;;  %v1251_v5 = vrot.slane %v1250_v2, 2  ;;  %v1328_v21 = vadd.f32 %v1327_v39, %v1326_v38  ;;  %v1053_v44 = vrot.slane %v1052_v51, 1 }
 0x164   :  { %v1093_v27 = vrot.slane %v1092_v54, 1  ;;  %v1212_v26 = vadd.f32 %v1211_v31, %v1210_v1  ;;  %v1291_v46 = vrot.slane %v1290_v24, 2  ;;  %v1133_v57 = vrot.slane %v1132_v25, 1 }
 0x165   :  { %v1173_v11 = vrot.slane %v1172_v3, 1  ;;  %v1252_v45 = vadd.f32 %v1251_v5, %v1250_v2  ;;  %v1329_v56 = vrot.slane %v1328_v21, 4  ;;  %v1054_v6 = vadd.f32 %v1053_v44, %v1052_v51 }
 0x166   :  { %v1094_v55 = vadd.f32 %v1093_v27, %v1092_v54  ;;  %v1213_v37 = vrot.slane %v1212_v26, 1  ;;  %v1292_v59 = vadd.f32 %v1291_v46, %v1290_v24  ;;  %v1134_v62 = vadd.f32 %v1133_v57, %v1132_v25 }
 0x167   :  { %v1174_v47 = vadd.f32 %v1173_v11, %v1172_v3  ;;  %v1253_v18 = vrot.slane %v1252_v45, 1  ;;  %v1330_v29 = vadd.f32 %v1329_v56, %v1328_v21  ;;  %vm5194_vm1 = vcmask 1041409  }
 0x168   :  { %v1214_v53 = vadd.f32 %v1213_v37, %v1212_v26  ;;  %v1293_v15 = vrot.slane %v1292_v59, 1  ;;  %v1750_v10 = vsel %vm5194_vm1, %v1094_v55, %v1054_v6  ;;  %vm279_vm7 = vcmp.eq.s32.totalorder %v3943_v22, 0 }
 0x169   :  { %v1254_v16 = vadd.f32 %v1253_v18, %v1252_v45  ;;  %v1331_v20 = vrot.slane %v1330_v29, 2  ;;  %vm5195_vm9 = vcmask 1042434   ;;  %vm283_vm2 = vcmp.eq.s32.totalorder %v3945_v34, 0 }
 0x16a   :  { %v1752_v60 = vsel %vm5195_vm9, %v1134_v62, %v1750_v10  ;;  %v1294_v48 = vadd.f32 %v1293_v15, %v1292_v59  ;;  %vm5196_vm13 = vcmask 1043459   ;;  %vm287_vm12 = vcmp.eq.s32.totalorder %v3949_v49, 0 }
 0x16b   :  { %v1754_v50 = vsel %vm5196_vm13, %v1174_v47, %v1752_v60  ;;  %vm291_vm6 = vcmp.eq.s32.totalorder %v3947_v61, 0  ;;  %v1332_v58 = vadd.f32 %v1331_v20, %v1330_v29  ;;  %vm5197_vm11 = vcmask 1044484  }
 0x16c   :  { %v1756_v28 = vsel %vm5197_vm11, %v1214_v53, %v1754_v50  ;;  %vm295_vm0 = vcmp.eq.s32.totalorder %v3943_v22, 1  ;;  %vm299_vm10 = vcmp.eq.s32.totalorder %v3945_v34, 1  ;;  %vm5198_vm15 = vcmask 1045509  }
 0x16d   :  { %v1758_v17 = vsel %vm5198_vm15, %v1254_v16, %v1756_v28  ;;  %v1333_v19 = vrot.slane %v1332_v58, 1  ;;  %vm5199_vm14 = vcmask 1046534   ;;  %vm5200_vm13 = vcmask 1047559  }
 0x16e   :  { %v1760_v42 = vsel %vm5199_vm14, %v1294_v48, %v1758_v17  ;;  %vm367_vm11 = vcmp.eq.s32.totalorder %v3949_v49, 5  ;;  %vm371_vm15 = vcmp.eq.s32.totalorder %v3947_v61, 5  ;;  %vm375_vm5 = vcmp.eq.s32.totalorder %v3943_v22, 6 }
 0x16f   :  { %v1334_v8 = vadd.f32 %v1333_v19, %v1332_v58  ;;  %vm379_vm3 = vcmp.eq.s32.totalorder %v3945_v34, 6  ;;  %vm383_vm8 = vcmp.eq.s32.totalorder %v3949_v49, 6  ;;  %vm387_vm14 = vcmp.eq.s32.totalorder %v3947_v61, 6 }
 0x170   :  { %vm391_vm4 = vcmp.eq.s32.totalorder %v3943_v22, 7  ;;  %vm395_vm1 = vcmp.eq.s32.totalorder %v3945_v34, 7  ;;  %vm399_vm9 = vcmp.eq.s32.totalorder %v3949_v49, 7  ;;  %v2910_v41 = vsel %vm279_vm7, 1.0, %v3344_v0 }
 0x171   :  { %v1762_v36 = vsel %vm5200_vm13, %v1334_v8, %v1760_v42  ;;  %vm403_vm13 = vcmp.eq.s32.totalorder %v3947_v61, 7  ;;  %v2914_v33 = vsel %vm283_vm2, 1.0, %v3344_v0  ;;  %v2918_v23 = vsel %vm287_vm12, 1.0, %v3344_v0 }
 0x172   :  { %1864 = vmatpush1.msra.mxu0 %v1762_v36  ;;  %v2922_v63 = vsel %vm291_vm6, 1.0, %v3344_v0  ;;  %v2926_v4 = vsel %vm295_vm0, 1.0, %v3344_v0  ;;  %v2930_v7 = vsel %vm299_vm10, 1.0, %v3344_v0  ;;  %vm5201_vm7 = vcmp.eq.s32.totalorder %v3949_v49, 1 }
 0x173   :  { %v2934_v43 = vsel %vm5201_vm7, 1.0, %v3344_v0  ;;  %vm5202_vm2 = vcmp.eq.s32.totalorder %v3947_v61, 1  ;;  %vm5203_vm12 = vcmp.eq.s32.totalorder %v3943_v22, 2  ;;  %vm5204_vm6 = vcmp.eq.s32.totalorder %v3945_v34, 2 }
 0x174   :  { %v2938_v30 = vsel %vm5202_vm2, 1.0, %v3344_v0  ;;  %v2942_v32 = vsel %vm5203_vm12, 1.0, %v3344_v0  ;;  %v2946_v35 = vsel %vm5204_vm6, 1.0, %v3344_v0  ;;  %vm5205_vm0 = vcmp.eq.s32.totalorder %v3949_v49, 2 }
 0x175   :  { %v2950_v12 = vsel %vm5205_vm0, 1.0, %v3344_v0  ;;  %vm5206_vm10 = vcmp.eq.s32.totalorder %v3947_v61, 2  ;;  %vm5207_vm7 = vcmp.eq.s32.totalorder %v3943_v22, 3  ;;  %vm5208_vm2 = vcmp.eq.s32.totalorder %v3945_v34, 3 }
 0x176   :  { %v2954_v38 = vsel %vm5206_vm10, 1.0, %v3344_v0  ;;  %v2958_v40 = vsel %vm5207_vm7, 1.0, %v3344_v0  ;;  %v2962_v14 = vsel %vm5208_vm2, 1.0, %v3344_v0  ;;  %vm5209_vm12 = vcmp.eq.s32.totalorder %v3949_v49, 3 }
 0x177   :  { %v2966_v1 = vsel %vm5209_vm12, 1.0, %v3344_v0  ;;  %vm5210_vm6 = vcmp.eq.s32.totalorder %v3947_v61, 3  ;;  %vm5211_vm0 = vcmp.eq.s32.totalorder %v3943_v22, 4  ;;  %vm5212_vm10 = vcmp.eq.s32.totalorder %v3945_v34, 4 }
 0x178   :  { %v2970_v52 = vsel %vm5210_vm6, 1.0, %v3344_v0  ;;  %v2974_v13 = vsel %vm5211_vm0, 1.0, %v3344_v0  ;;  %v2978_v9 = vsel %vm5212_vm10, 1.0, %v3344_v0  ;;  %vm5213_vm7 = vcmp.eq.s32.totalorder %v3949_v49, 4 }
 0x179   :  { %v2982_v2 = vsel %vm5213_vm7, 1.0, %v3344_v0  ;;  %vm5214_vm2 = vcmp.eq.s32.totalorder %v3947_v61, 4  ;;  %vm5215_vm12 = vcmp.eq.s32.totalorder %v3943_v22, 5  ;;  %vm5216_vm6 = vcmp.eq.s32.totalorder %v3945_v34, 5 }
 0x17a   :  { %v2986_v39 = vsel %vm5214_vm2, 1.0, %v3344_v0  ;;  %v2990_v51 = vsel %vm5215_vm12, 1.0, %v3344_v0  ;;  %v2994_v54 = vsel %vm5216_vm6, 1.0, %v3344_v0  ;;  %v2998_v31 = vsel %vm367_vm11, 1.0, %v3344_v0 }
 0x17b   :  { %v3002_v24 = vsel %vm371_vm15, 1.0, %v3344_v0  ;;  %v3006_v25 = vsel %vm375_vm5, 1.0, %v3344_v0  ;;  %v3010_v3 = vsel %vm379_vm3, 1.0, %v3344_v0  ;;  %v3014_v5 = vsel %vm383_vm8, 1.0, %v3344_v0 }
 0x17c   :  { %v3018_v21 = vsel %vm387_vm14, 1.0, %v3344_v0  ;;  %v3022_v44 = vsel %vm391_vm4, 1.0, %v3344_v0  ;;  %v3026_v27 = vsel %vm395_vm1, 1.0, %v3344_v0  ;;  %v3030_v26 = vsel %vm399_vm9, 1.0, %v3344_v0 }
 0x17d   :  { %v3034_v46 = vsel %vm403_vm13, 1.0, %v3344_v0  ;;  %v1065_v57 = vadd.f32 %v2914_v33, %v2910_v41  ;;  %vm5217_vm8 = vcmask 1044480   ;;  %v1105_v45 = vadd.f32 %v2930_v7, %v2926_v4 }
 0x17e   :  { %v1067_v11 = vsel %vm5217_vm8, %v2922_v63, 0.0  ;;  %vm5218_vm5 = vmmov %vm5217_vm8  ;;  %v1145_v22 = vadd.f32 %v2946_v35, %v2942_v32  ;;  %v1185_v34 = vadd.f32 %v2962_v14, %v2958_v40  ;;  %v1225_v62 = vadd.f32 %v2978_v9, %v2974_v13 }
 0x17f   :  { %v1107_v56 = vsel %vm5218_vm5, %v2938_v30, 0.0  ;;  %v1066_v6 = vadd.f32 %v2918_v23, %v1065_v57  ;;  %vm5219_vm3 = vmmov %vm5218_vm5  ;;  %v1106_v59 = vadd.f32 %v2934_v43, %v1105_v45  ;;  %v1265_v29 = vadd.f32 %v2994_v54, %v2990_v51 }
 0x180   :  { %v1147_v55 = vsel %vm5219_vm3, %v2954_v38, 0.0  ;;  %vm5220_vm4 = vmmov %vm5219_vm3  ;;  %v1146_v49 = vadd.f32 %v2950_v12, %v1145_v22  ;;  %v1186_v18 = vadd.f32 %v2966_v1, %v1185_v34  ;;  %v1226_v16 = vadd.f32 %v2982_v2, %v1225_v62 }
 0x181   :  { %v1187_v37 = vsel %vm5220_vm4, %v2970_v52, 0.0  ;;  %vm5221_vm1 = vmmov %vm5219_vm3  ;;  %v1068_v61 = vadd.f32 %v1067_v11, %v1066_v6  ;;  %v1108_v15 = vadd.f32 %v1107_v56, %v1106_v59  ;;  %v1305_v20 = vadd.f32 %v3010_v3, %v3006_v25  ;;  %v58_v56 = vld [vmem:[#allocation5 + $0x8] sm:$0xff] }
 0x182   :  { %v1227_v47 = vsel %vm5221_vm1, %v2986_v39, 0.0  ;;  %vm5222_vm9 = vmmov %vm5221_vm1  ;;  %v1148_v10 = vadd.f32 %v1147_v55, %v1146_v49  ;;  %v1188_v48 = vadd.f32 %v1187_v37, %v1186_v18  ;;  %v1266_v50 = vadd.f32 %v2998_v31, %v1265_v29 }
 0x183   :  { %v1267_v53 = vsel %vm5222_vm9, %v3002_v24, 0.0  ;;  %v1069_v60 = vrot.slane %v1068_v61, 4  ;;  %vm5223_vm11 = vmmov %vm5221_vm1  ;;  %v1109_v28 = vrot.slane %v1108_v15, 4  ;;  %v1228_v19 = vadd.f32 %v1227_v47, %v1226_v16 }
 0x184   :  { %v1307_v58 = vsel %vm5223_vm11, %v3018_v21, 0.0  ;;  %v1149_v17 = vrot.slane %v1148_v10, 4  ;;  %v1306_v42 = vadd.f32 %v3014_v5, %v1305_v20  ;;  %v1189_v36 = vrot.slane %v1188_v48, 4  ;;  %vm5224_vm15 = vmmov %vm5221_vm1 }
 0x185   :  { %v1070_v8 = vadd.f32 %v1069_v60, %v1068_v61  ;;  %v1268_v41 = vadd.f32 %v1267_v53, %v1266_v50  ;;  %v1345_v33 = vadd.f32 %v3026_v27, %v3022_v44  ;;  %v1110_v23 = vadd.f32 %v1109_v28, %v1108_v15  ;;  %v59_v53 = vld [vmem:[#allocation5 + $0x10] sm:$0xff]  ;;  %v60_v50 = vld [vmem:[#allocation5 + $0x18] sm:$0xff] }
 0x186   :  { %v1150_v63 = vadd.f32 %v1149_v17, %v1148_v10  ;;  %v1229_v4 = vrot.slane %v1228_v19, 4  ;;  %v1308_v7 = vadd.f32 %v1307_v58, %v1306_v42  ;;  %v1190_v30 = vadd.f32 %v1189_v36, %v1188_v48  ;;  %v3256_v42 = vld [vmem:[#allocation2 + $0x8] sm:$0xff] }
 0x187   :  { %v1071_v43 = vrot.slane %v1070_v8, 2  ;;  %v1269_v32 = vrot.slane %v1268_v41, 4  ;;  %v1346_v35 = vadd.f32 %v3030_v26, %v1345_v33  ;;  %v1111_v12 = vrot.slane %v1110_v23, 2  ;;  %v3259_v33 = vld [vmem:[#allocation2 + $0x38] sm:$0xff] }
 0x188   :  { %v1151_v38 = vrot.slane %v1150_v63, 2  ;;  %v1230_v40 = vadd.f32 %v1229_v4, %v1228_v19  ;;  %v1309_v14 = vrot.slane %v1308_v7, 4  ;;  %v1191_v52 = vrot.slane %v1190_v30, 2  ;;  %v61_v19 = vld [vmem:[#allocation5 + $0x20] sm:$0xff] }
 0x189   :  { %v1072_v1 = vadd.f32 %v1071_v43, %v1070_v8  ;;  %v1270_v13 = vadd.f32 %v1269_v32, %v1268_v41  ;;  %v1347_v9 = vsel %vm5224_vm15, %v3034_v46, 0.0  ;;  %v1112_v2 = vadd.f32 %v1111_v12, %v1110_v23  ;;  %v3257_v8 = vld [vmem:[#allocation2 + $0x28] sm:$0xff]  ;;  %v3258_v41 = vld [vmem:[#allocation2 + $0x18] sm:$0xff]  ;;  %v3261_v4 = vld [vmem:[#allocation2 + $0x20] sm:$0xff] }
 0x18a   :  { %v1152_v39 = vadd.f32 %v1151_v38, %v1150_v63  ;;  %v1231_v51 = vrot.slane %v1230_v40, 2  ;;  %v1310_v54 = vadd.f32 %v1309_v14, %v1308_v7  ;;  %v1192_v24 = vadd.f32 %v1191_v52, %v1190_v30  ;;  %v3260_v63 = vld [vmem:[#allocation2] sm:$0xff]  ;;  %v3262_v43 = vld [vmem:[#allocation2 + $0x10] sm:$0xff]  ;;  %v3265_v38 = vld [vmem:[#allocation2 + $0x58] sm:$0xff] }
 0x18b   :  { %v1073_v31 = vrot.slane %v1072_v1, 1  ;;  %v1271_v25 = vrot.slane %v1270_v13, 2  ;;  %v1348_v3 = vadd.f32 %v1347_v9, %v1346_v35  ;;  %v1113_v5 = vrot.slane %v1112_v2, 1  ;;  %v3263_v30 = vld [vmem:[#allocation2 + $0x30] sm:$0xff]  ;;  %v3264_v35 = vld [vmem:[#allocation2 + $0x48] sm:$0xff]  ;;  %v3266_v14 = vld [vmem:[#allocation2 + $0x40] sm:$0xff] }
 0x18c   :  { %v1153_v21 = vrot.slane %v1152_v39, 1  ;;  %v1232_v44 = vadd.f32 %v1231_v51, %v1230_v40  ;;  %v1311_v27 = vrot.slane %v1310_v54, 2  ;;  %v1193_v57 = vrot.slane %v1192_v24, 1  ;;  %v3267_v52 = vld [vmem:[#allocation2 + $0x50] sm:$0xff]  ;;  %v3268_v9 = vld [vmem:[#allocation2 + $0x68] sm:$0xff] }
 0x18d   :  { %v1074_v26 = vadd.f32 %v1073_v31, %v1072_v1  ;;  %v1272_v11 = vadd.f32 %v1271_v25, %v1270_v13  ;;  %v1349_v45 = vrot.slane %v1348_v3, 4  ;;  %v1114_v22 = vadd.f32 %v1113_v5, %v1112_v2 }
 0x18e   :  { %v1154_v6 = vadd.f32 %v1153_v21, %v1152_v39  ;;  %v1233_v46 = vrot.slane %v1232_v44, 1  ;;  %v1312_v55 = vadd.f32 %v1311_v27, %v1310_v54  ;;  %v1194_v34 = vadd.f32 %v1193_v57, %v1192_v24  ;;  %v3269_v39 = vld [vmem:[#allocation2 + $0x78] sm:$0xff]  ;;  %v3270_v54 = vld [vmem:[#allocation2 + $0x60] sm:$0xff]  ;;  %v3271_v24 = vld [vmem:[#allocation2 + $0x70] sm:$0xff] }
 0x18f   :  { %v1273_v37 = vrot.slane %v1272_v11, 1  ;;  %v1350_v59 = vadd.f32 %v1349_v45, %v1348_v3  ;;  %vm1820_vm14 = vcmask 130048   ;;  %vm5225_vm13 = vcmask 1041409  }
 0x190   :  { %v1234_v49 = vadd.f32 %v1233_v46, %v1232_v44  ;;  %v1313_v62 = vrot.slane %v1312_v55, 1  ;;  %v1770_v47 = vsel %vm5225_vm13, %v1114_v22, %v1074_v26  ;;  %3164 = vmatmul.mubr.msk.f32.vlgmr.msra.gmra.mxu0 %vm1820_vm14, %v58_v56  ;;  %vm5226_vm0 = vcmask 1042434  }
 0x191   :  { %v1274_v61 = vadd.f32 %v1273_v37, %v1272_v11  ;;  %v1351_v18 = vrot.slane %v1350_v59, 2  ;;  %v1771_v29 = vsel %vm5226_vm0, %v1154_v6, %v1770_v47  ;;  %1903 = vmatprep.mubr.f32.mxu0 %v3344_v0  ;;  %vm5227_vm10 = vcmask 1043459  }
 0x192   :  { %v1314_v15 = vadd.f32 %v1313_v62, %v1312_v55  ;;  %v1772_v10 = vsel %vm5227_vm10, %v1194_v34, %v1771_v29  ;;  %vm5228_vm7 = vcmask 1044484   ;;  %vm5229_vm2 = vcmask 1045509  }
 0x193   :  { %v1352_v16 = vadd.f32 %v1351_v18, %v1350_v59  ;;  %v1773_v20 = vsel %vm5228_vm7, %v1234_v49, %v1772_v10  ;;  %vm5230_vm12 = vcmask 1046534   ;;  %vm5231_vm6 = vcmask 1047559  }
 0x194   :  { %v1774_v60 = vsel %vm5229_vm2, %v1274_v61, %v1773_v20  ;;  %3165 = vmatmul.mubr.msk.f32.gmra.mxu0 %vm1820_vm14, %v59_v53  ;;  %v2036_v36 = vadd.f32 %v3257_v8, %v3256_v42  ;;  %v2054_v23 = vadd.f32 %v3259_v33, %v3258_v41  ;;  %v2027_v7 = vadd.f32 %v3261_v4, %v3260_v63  ;;  %v4688_v42 = vld [vmem:[#allocation5 + $0x48] sm:$0xff]  ;;  %v4690_v8 = vld [vmem:[#allocation5 + $0x58] sm:$0xff]  ;;  %v4696_v41 = vld [vmem:[#allocation5 + $0x40] sm:$0xff] }
 0x195   :  { %v1353_v48 = vrot.slane %v1352_v16, 1  ;;  %1909 = vmatprep.mubr.f32.mxu0 %v3344_v0  ;;  %v1775_v58 = vsel %vm5230_vm12, %v1314_v15, %v1774_v60  ;;  %v2045_v32 = vadd.f32 %v3263_v30, %v3262_v43  ;;  %vm2068_vm8 = vcmask 1040384   ;;  %v4700_v33 = vld [vmem:[#allocation5 + $0x28] sm:$0xff]  ;;  %v4706_v63 = vld [vmem:[#allocation5 + $0xa0] sm:$0xff]  ;;  %v4708_v4 = vld [vmem:[#allocation5 + $0x98] sm:$0xff] }
 0x196   :  { %v2037_v12 = vadd.f32 %v3264_v35, %v2036_v36  ;;  %v2055_v40 = vadd.f32 %v3265_v38, %v2054_v23  ;;  %v2028_v1 = vadd.f32 %v3266_v14, %v2027_v7  ;;  %vm2073_vm5 = vcmask 1041408   ;;  %v4694_v36 = vld [vmem:[#allocation5 + $0x38] sm:$0xff]  ;;  %v4702_v23 = vld [vmem:[#allocation5 + $0x30] sm:$0xff]  ;;  %v4714_v43 = vld [vmem:[#allocation5 + $0x88] sm:$0xff] }
 0x197   :  { %v1354_v28 = vadd.f32 %v1353_v48, %v1352_v16  ;;  %v2046_v13 = vadd.f32 %v3267_v52, %v2045_v32  ;;  %v4712_v7 = vld [vmem:[#allocation5 + $0x90] sm:$0xff]  ;;  %v4718_v30 = vld [vmem:[#allocation5 + $0x80] sm:$0xff]  ;;  %v4720_v32 = vld [vmem:[#allocation5 + $0x78] sm:$0xff]  ;;  %vm2118_vm3 = vcmask 326656   ;;  %vm2433_vm4 = vcmask 523264  }
 0x198   :  { %3166 = vmatmul.mubr.msk.f32.gmra.mxu0 %vm1820_vm14, %v60_v50  ;;  %v2038_v2 = vadd.f32 %v3268_v9, %v2037_v12  ;;  %v2056_v51 = vadd.f32 %v3269_v39, %v2055_v40  ;;  %v2029_v31 = vadd.f32 %v3270_v54, %v2028_v1  ;;  %v4724_v35 = vld [vmem:[#allocation5 + $0x70] sm:$0xff]  ;;  %v4726_v12 = vld [vmem:[#allocation5 + $0x68] sm:$0xff] }
 0x199   :  { %v1776_v17 = vsel %vm5231_vm6, %v1354_v28, %v1775_v58  ;;  %1915 = vmatprep.mubr.f32.mxu0 %v3344_v0  ;;  %v2047_v25 = vadd.f32 %v3271_v24, %v2046_v13  ;;  %v4682_v28 = vld [vmem:[#allocation5 + $0x50] sm:$0xff] }
 0x19a   :  { %1953 = vmatpush1.msra.mxu1 %v1776_v17  ;;  %v2039_v3 = vrot.slane %v2038_v2, 4  ;;  %v2057_v5 = vrot.slane %v2056_v51, 4  ;;  %v2030_v21 = vrot.slane %v2029_v31, 4  ;;  %v4684_v17 = vld [vmem:[#allocation5 + $0x60] sm:$0xff] }
 0x19b   :  { %3168 = vmatmul.mubr.msk.f32.vlgmr.msra.gmra.mxu1 %vm1820_vm14, %v58_v56  ;;  %v2048_v44 = vrot.slane %v2047_v25, 4 }
 0x19c   :  { %1992 = vmatprep.mubr.f32.mxu1 %v3344_v0  ;;  %3167 = vmatmul.mubr.msk.f32.gmra.mxu0 %vm1820_vm14, %v61_v19  ;;  %v2040_v27 = vadd.f32 %v2039_v3, %v2038_v2  ;;  %v2058_v26 = vadd.f32 %v2057_v5, %v2056_v51  ;;  %v2031_v57 = vadd.f32 %v2030_v21, %v2029_v31 }
 0x19d   :  { %2199 = vmatprep.mubr.f32.mxu0 %v3344_v0  ;;  %v2049_v11 = vadd.f32 %v2048_v44, %v2047_v25 }
 0x19e   :  { %v2041_v45 = vrot.slane %v2040_v27, 2  ;;  %v2059_v56 = vrot.slane %v2058_v26, 2  ;;  %v2032_v22 = vrot.slane %v2031_v57, 2 }
 0x19f   :  { %3169 = vmatmul.mubr.msk.f32.gmra.mxu1 %vm1820_vm14, %v59_v53  ;;  %v2050_v6 = vrot.slane %v2049_v11, 2 }
 0x1a0   :  { %1998 = vmatprep.mubr.f32.mxu1 %v3344_v0  ;;  %v2042_v46 = vadd.f32 %v2041_v45, %v2040_v27  ;;  %v2060_v55 = vadd.f32 %v2059_v56, %v2058_v26  ;;  %v2033_v34 = vadd.f32 %v2032_v22, %v2031_v57 }
 0x1a1   :  { %v2051_v37 = vadd.f32 %v2050_v6, %v2049_v11 }
 0x1a2   :  { %v2043_v59 = vrot.slane %v2042_v46, 1  ;;  %v2061_v49 = vrot.slane %v2060_v55, 1  ;;  %v2034_v62 = vrot.slane %v2033_v34, 1 }
 0x1a3   :  { %3170 = vmatmul.mubr.msk.f32.gmra.mxu1 %vm1820_vm14, %v60_v50  ;;  %v2052_v47 = vrot.slane %v2051_v37, 1 }
 0x1a4   :  { %2004 = vmatprep.mubr.f32.mxu1 %v3344_v0  ;;  %v2044_v61 = vadd.f32 %v2043_v59, %v2042_v46  ;;  %v2062_v18 = vadd.f32 %v2061_v49, %v2060_v55  ;;  %v2035_v29 = vadd.f32 %v2034_v62, %v2033_v34 }
 0x1a5   :  { %v2053_v53 = vadd.f32 %v2052_v47, %v2051_v37 }
 0x1a6   :  { %v2065_v15 = vmul.f32 0.03125, %v2044_v61  ;;  %v2067_v10 = vmul.f32 0.03125, %v2062_v18  ;;  %v2064_v16 = vmul.f32 0.03125, %v2035_v29 }
 0x1a7   :  { %3171 = vmatmul.mubr.msk.f32.gmra.mxu1 %vm1820_vm14, %v61_v19  ;;  %v2066_v20 = vmul.f32 0.03125, %v2053_v53  ;;  %v3345_v19 = vmov 127  }
 0x1a8   :  { %2312 = vmatprep.mubr.f32.mxu1 %v3344_v0  ;;  %v2070_v60 = vsel %vm2068_vm8, 1.0, %v2065_v15  ;;  %v2072_v48 = vsel %vm2068_vm8, 1.0, %v2067_v10  ;;  %v2069_v50 = vsel %vm2068_vm8, 1.0, %v2064_v16  ;;  %3254 = vset.pattern.permute.xlu1 %v3345_v19 }
 0x1a9   :  { %3172 = vmatprep.subr.msk.mxu0 %vm2073_vm5, %v2070_v60  ;;  %3182 = vmatprep.subr.msk.mxu1 %vm2073_vm5, %v2072_v48  ;;  %v2071_v58 = vsel %vm2068_vm8, 1.0, %v2066_v20 }
 0x1aa   :  { %3173 = vmatpush1.msk.msra.mxu0 %vm2073_vm5, %v2069_v50  ;;  %3183 = vmatpush1.msk.msra.mxu1 %vm2073_vm5, %v2071_v58 }
 0x1ab   :  { %3253 = vset.pattern.permute.xlu0 %v3345_v19  ;;  %2105 = vperm.xlu1 %3254, %v4682_v28  }
 0x1ac   :  { %2115 = vperm.xlu0 %3253, %v4684_v17  }
 0x1af   :  { %2100 = vperm.xlu1 %3254, %v4688_v42  }
 0x1b0   :  { %2110 = vperm.xlu0 %3253, %v4690_v8  }
 0x1b3   :  { %2090 = vperm.xlu1 %3254, %v4694_v36  }
 0x1b4   :  { %2095 = vperm.xlu0 %3253, %v4696_v41  }
 0x1b7   :  { %2080 = vperm.xlu1 %3254, %v4700_v33  }
 0x1b8   :  { %2085 = vperm.xlu0 %3253, %v4702_v23  }
 0x1bb   :  { %2425 = vperm.xlu1 %3254, %v4708_v4  }
 0x1bc   :  { %2430 = vperm.xlu0 %3253, %v4706_v63  }
 0x1bf   :  { %2415 = vperm.xlu1 %3254, %v4714_v43  }
 0x1c0   :  { %2420 = vperm.xlu0 %3253, %v4712_v7  }
 0x1c3   :  { %2405 = vperm.xlu1 %3254, %v4720_v32  }
 0x1c4   :  { %2410 = vperm.xlu0 %3253, %v4718_v30  }
 0x1c7   :  { %2395 = vperm.xlu1 %3254, %v4726_v12  }
 0x1c8   :  { %2400 = vperm.xlu0 %3253, %v4724_v35  }
 0x227   :  { %v2116_v19 = vpop.permute.xlu0 %2115 }
 0x250   :  { %v1899_v38 = vpop.f32.mrf.mxu0 }
 0x251   :  { %v2011_v11 = vmul.f32 0.03448276, %v1899_v38 }
 0x252   :  { %v1901_v40 = vpop.f32.mrf.mxu0 }
 0x253   :  { %v2012_v26 = vmul.f32 0.03448276, %v1901_v40  ;;  %v2111_v40 = vpop.permute.xlu0 %2110 }
 0x254   :  { %v1905_v14 = vpop.f32.mrf.mxu0 }
 0x255   :  { %v2015_v27 = vmul.f32 0.03448276, %v1905_v14 }
 0x256   :  { %v1907_v1 = vpop.f32.mrf.mxu0 }
 0x257   :  { %v2016_v21 = vmul.f32 0.03448276, %v1907_v1 }
 0x258   :  { %v1911_v52 = vpop.f32.mrf.mxu0 }
 0x259   :  { %v2019_v5 = vmul.f32 0.03448276, %v1911_v52 }
 0x25a   :  { %v1913_v13 = vpop.f32.mrf.mxu0 }
 0x25b   :  { %v1988_v9 = vpop.f32.mrf.mxu1  ;;  %v2020_v3 = vmul.f32 0.03448276, %v1913_v13 }
 0x25c   :  { %v1917_v2 = vpop.f32.mrf.mxu0  ;;  %v2013_v49 = vmul.f32 0.03448276, %v1988_v9 }
 0x25d   :  { %v1990_v39 = vpop.f32.mrf.mxu1  ;;  %v2023_v24 = vmul.f32 0.03448276, %v1917_v2 }
 0x25e   :  { %v1919_v51 = vpop.f32.mrf.mxu0  ;;  %v2014_v59 = vmul.f32 0.03448276, %v1990_v39 }
 0x25f   :  { %v1994_v54 = vpop.f32.mrf.mxu1  ;;  %v2024_v31 = vmul.f32 0.03448276, %v1919_v51 }
 0x260   :  { %v2017_v37 = vmul.f32 0.03448276, %v1994_v54 }
 0x261   :  { %v1996_v25 = vpop.f32.mrf.mxu1  ;;  %2159 = vmatprep.subr.mxu0 %v2024_v31 }
 0x262   :  { %2160 = vmatpush1.msra.mxu0 %v2023_v24  ;;  %v2018_v34 = vmul.f32 0.03448276, %v1996_v25  ;;  %v4806_v24 = vpop.permute.xlu0 %2095 }
 0x263   :  { %v2000_v44 = vpop.f32.mrf.mxu1  ;;  %2161 = vmatprep.subr.mxu0 %v2020_v3 }
 0x264   :  { %2162 = vmatpush1.msra.mxu0 %v2019_v5  ;;  %v2021_v55 = vmul.f32 0.03448276, %v2000_v44 }
 0x265   :  { %v2002_v57 = vpop.f32.mrf.mxu1  ;;  %2163 = vmatprep.subr.mxu0 %v2016_v21 }
 0x266   :  { %2164 = vmatpush1.msra.mxu0 %v2015_v27  ;;  %v2022_v46 = vmul.f32 0.03448276, %v2002_v57 }
 0x267   :  { %v2006_v45 = vpop.f32.mrf.mxu1  ;;  %2165 = vmatprep.subr.mxu0 %v2012_v26 }
 0x268   :  { %2166 = vmatpush1.msra.mxu0 %v2011_v11  ;;  %v2025_v6 = vmul.f32 0.03448276, %v2006_v45 }
 0x269   :  { %v2008_v56 = vpop.f32.mrf.mxu1  ;;  %3174 = vmatmul.mubr.msk.f32.vlgmr.msra.gmra.mxu0 %vm2118_vm3, %v4700_v33 }
 0x26a   :  { %v2026_v22 = vmul.f32 0.03448276, %v2008_v56  ;;  %2205 = vmatprep.mubr.f32.mxu0 %v3344_v0 }
 0x26c   :  { %2272 = vmatprep.subr.mxu1 %v2026_v22 }
 0x26d   :  { %2273 = vmatpush1.msra.mxu1 %v2025_v6  ;;  %3175 = vmatmul.mubr.msk.f32.gmra.mxu0 %vm2118_vm3, %v4702_v23 }
 0x26e   :  { %2274 = vmatprep.subr.mxu1 %v2022_v46  ;;  %2211 = vmatprep.mubr.f32.mxu0 %v3344_v0 }
 0x26f   :  { %2275 = vmatpush1.msra.mxu1 %v2021_v55 }
 0x270   :  { %2276 = vmatprep.subr.mxu1 %v2018_v34 }
 0x271   :  { %2277 = vmatpush1.msra.mxu1 %v2017_v37  ;;  %3176 = vmatmul.mubr.msk.f32.gmra.mxu0 %vm2118_vm3, %v4694_v36  ;;  %v4816_v37 = vpop.permute.xlu0 %2085 }
 0x272   :  { %2278 = vmatprep.subr.mxu1 %v2014_v59  ;;  %2217 = vmatprep.mubr.f32.mxu0 %v3344_v0 }
 0x273   :  { %2279 = vmatpush1.msra.mxu1 %v2013_v49 }
 0x274   :  { %3184 = vmatmul.mubr.msk.f32.vlgmr.msra.gmra.mxu1 %vm2118_vm3, %v4700_v33 }
 0x275   :  { %2318 = vmatprep.mubr.f32.mxu1 %v3344_v0  ;;  %3177 = vmatmul.mubr.msk.f32.gmra.mxu0 %vm2118_vm3, %v4696_v41 }
 0x276   :  { %2223 = vmatprep.mubr.f32.mxu0 %v3344_v0 }
 0x278   :  { %3185 = vmatmul.mubr.msk.f32.gmra.mxu1 %vm2118_vm3, %v4702_v23 }
 0x279   :  { %2324 = vmatprep.mubr.f32.mxu1 %v3344_v0  ;;  %3178 = vmatmul.mubr.msk.f32.gmra.mxu0 %vm2118_vm3, %v4688_v42 }
 0x27a   :  { %2229 = vmatprep.mubr.f32.mxu0 %v3344_v0 }
 0x27c   :  { %3186 = vmatmul.mubr.msk.f32.gmra.mxu1 %vm2118_vm3, %v4694_v36  ;;  %v4796_v36 = vpop.permute.xlu1 %2105 }
 0x27d   :  { %2330 = vmatprep.mubr.f32.mxu1 %v3344_v0  ;;  %3179 = vmatmul.mubr.msk.f32.gmra.mxu0 %vm2118_vm3, %v4682_v28 }
 0x27e   :  { %2235 = vmatprep.mubr.f32.mxu0 %v3344_v0 }
 0x280   :  { %3187 = vmatmul.mubr.msk.f32.gmra.mxu1 %vm2118_vm3, %v4696_v41  ;;  %v4804_v52 = vpop.permute.xlu1 %2100 }
 0x281   :  { %2336 = vmatprep.mubr.f32.mxu1 %v3344_v0  ;;  %3180 = vmatmul.mubr.msk.f32.gmra.mxu0 %vm2118_vm3, %v4690_v8 }
 0x282   :  { %2241 = vmatprep.mubr.f32.mxu0 %v3344_v0 }
 0x284   :  { %3188 = vmatmul.mubr.msk.f32.gmra.mxu1 %vm2118_vm3, %v4688_v42  ;;  %v4810_v27 = vpop.permute.xlu1 %2090 }
 0x285   :  { %2342 = vmatprep.mubr.f32.mxu1 %v3344_v0  ;;  %3181 = vmatmul.mubr.msk.f32.gmra.mxu0 %vm2118_vm3, %v4684_v17 }
 0x286   :  { %2514 = vmatprep.mubr.f32.mxu0 %v3344_v0 }
 0x288   :  { %3189 = vmatmul.mubr.msk.f32.gmra.mxu1 %vm2118_vm3, %v4682_v28 }
 0x289   :  { %2348 = vmatprep.mubr.f32.mxu1 %v3344_v0 }
 0x28c   :  { %3190 = vmatmul.mubr.msk.f32.gmra.mxu1 %vm2118_vm3, %v4690_v8 }
 0x28d   :  { %2354 = vmatprep.mubr.f32.mxu1 %v3344_v0 }
 0x290   :  { %3191 = vmatmul.mubr.msk.f32.gmra.mxu1 %vm2118_vm3, %v4684_v17 }
 0x291   :  { %2627 = vmatprep.mubr.f32.mxu1 %v3344_v0 }
 0x329   :  { %v4778_v62 = vpop.f32.mrf.mxu0 }
 0x32b   :  { %v4780_v47 = vpop.f32.mrf.mxu0 }
 0x32d   :  { %v4782_v61 = vpop.f32.mrf.mxu0 }
 0x32f   :  { %v2209_v18 = vpop.f32.mrf.mxu0 }
 0x331   :  { %v2213_v29 = vpop.f32.mrf.mxu0 }
 0x333   :  { %v2215_v53 = vpop.f32.mrf.mxu0 }
 0x334   :  { %v4784_v15 = vpop.f32.mrf.mxu1  ;;  %v2216_v59 = vadd.f32 %v2215_v53, %v4810_v27 }
 0x335   :  { %v2219_v10 = vpop.f32.mrf.mxu0 }
 0x336   :  { %v4786_v16 = vpop.f32.mrf.mxu1  ;;  %v2220_v55 = vadd.f32 %v2219_v10, %v4806_v24  ;;  %v2208_v10 = vadd.f32 %v4782_v61, %v4816_v37 }
 0x337   :  { %v2221_v20 = vpop.f32.mrf.mxu0 }
 0x338   :  { %v4788_v60 = vpop.f32.mrf.mxu1  ;;  %v2222_v22 = vadd.f32 %v2221_v20, %v4806_v24  ;;  %v2210_v20 = vadd.f32 %v2209_v18, %v4816_v37 }
 0x339   :  { %v2225_v48 = vpop.f32.mrf.mxu0 }
 0x33a   :  { %v4790_v50 = vpop.f32.mrf.mxu1  ;;  %v2226_v45 = vadd.f32 %v2225_v48, %v4804_v52  ;;  %v2214_v48 = vadd.f32 %v2213_v29, %v4810_v27 }
 0x33b   :  { %v2227_v58 = vpop.f32.mrf.mxu0 }
 0x33c   :  { %v4792_v28 = vpop.f32.mrf.mxu1  ;;  %v2228_v26 = vadd.f32 %v2227_v58, %v4804_v52 }
 0x33d   :  { %v2231_v17 = vpop.f32.mrf.mxu0 }
 0x33e   :  { %v4794_v42 = vpop.f32.mrf.mxu1  ;;  %v2232_v21 = vadd.f32 %v2231_v17, %v4796_v36  ;;  %v2378_v49 = vmax.f32 %v2228_v26, 0.0  ;;  %v2377_v17 = vmax.f32 %v2226_v45, 0.0  ;;  %v2365_v26 = vmax.f32 %v2208_v10, 0.0 }
 0x33f   :  { %v2233_v8 = vpop.f32.mrf.mxu0  ;;  %v2327_v45 = vadd.f32 %v4792_v28, %v4810_v27 }
 0x340   :  { %v4798_v41 = vpop.f32.mrf.mxu1  ;;  %v2234_v25 = vadd.f32 %v2233_v8, %v4796_v36  ;;  %v2381_v34 = vmax.f32 %v2232_v21, 0.0  ;;  %v2081_v8 = vpop.permute.xlu1 %2080  ;;  %v2366_v21 = vmax.f32 %v2210_v20, 0.0 }
 0x341   :  { %v2237_v33 = vpop.f32.mrf.mxu0  ;;  %v2431_v20 = vpop.permute.xlu0 %2430 }
 0x342   :  { %v4800_v23 = vpop.f32.mrf.mxu1  ;;  %v2238_v31 = vadd.f32 %v2237_v33, %v2111_v40  ;;  %v2382_v6 = vmax.f32 %v2234_v25, 0.0  ;;  %v2374_v33 = vmax.f32 %v2222_v22, 0.0  ;;  %v2369_v25 = vmax.f32 %v2214_v48, 0.0 }
 0x343   :  { %v2239_v38 = vpop.f32.mrf.mxu0  ;;  %v2317_v22 = vadd.f32 %v4786_v16, %v2081_v8 }
 0x344   :  { %v4802_v14 = vpop.f32.mrf.mxu1  ;;  %v2240_v51 = vadd.f32 %v2239_v38, %v2111_v40  ;;  %v2385_v56 = vmax.f32 %v2238_v31, 0.0  ;;  %v2202_v31 = vadd.f32 %v4778_v62, %v2081_v8 }
 0x345   :  { %v2243_v1 = vpop.f32.mrf.mxu0  ;;  %v2339_v62 = vadd.f32 %v4802_v14, %v4804_v52  ;;  %v2329_v14 = vadd.f32 %v4794_v42, %v4810_v27  ;;  %v2321_v42 = vadd.f32 %v4788_v60, %v4816_v37  ;;  %v2315_v27 = vadd.f32 %v4784_v15, %v2081_v8 }
 0x346   :  { %v2340_v13 = vpop.f32.mrf.mxu1  ;;  %v2244_v9 = vadd.f32 %v2243_v1, %v2116_v19  ;;  %v2386_v11 = vmax.f32 %v2240_v51, 0.0  ;;  %v2204_v51 = vadd.f32 %v4780_v47, %v2081_v8  ;;  %v2364_v60 = vmax.f32 %v2317_v22, 0.0 }
 0x347   :  { %v2245_v2 = vpop.f32.mrf.mxu0  ;;  %v2372_v28 = vmax.f32 %v2329_v14, 0.0 }
 0x348   :  { %v2344_v39 = vpop.f32.mrf.mxu1  ;;  %v2246_v54 = vadd.f32 %v2245_v2, %v2116_v19  ;;  %v2389_v44 = vmax.f32 %v2244_v9, 0.0  ;;  %v2373_v9 = vmax.f32 %v2220_v55, 0.0  ;;  %v2362_v47 = vmax.f32 %v2204_v51, 0.0  ;;  %v2421_v51 = vpop.permute.xlu0 %2420 }
 0x349   :  { %v2363_v55 = vmax.f32 %v2315_v27, 0.0 }
 0x34a   :  { %v2346_v3 = vpop.f32.mrf.mxu1  ;;  %v2390_v5 = vmax.f32 %v2246_v54, 0.0  ;;  %v2370_v54 = vmax.f32 %v2216_v59, 0.0 }
 0x34b   :  { %v2347_v18 = vadd.f32 %v2346_v3, %v4796_v36  ;;  %v2361_v3 = vmax.f32 %v2202_v31, 0.0 }
 0x34c   :  { %v2350_v57 = vpop.f32.mrf.mxu1  ;;  %2466 = vmatprep.subr.mxu0 %v2390_v5 }
 0x34d   :  { %2467 = vmatpush1.msra.mxu0 %v2389_v44  ;;  %v2351_v29 = vadd.f32 %v2350_v57, %v2111_v40  ;;  %v2345_v44 = vadd.f32 %v2344_v39, %v4796_v36  ;;  %v2335_v57 = vadd.f32 %v4800_v23, %v4806_v24  ;;  %v2384_v36 = vmax.f32 %v2347_v18, 0.0 }
 0x34e   :  { %v2352_v46 = vpop.f32.mrf.mxu1  ;;  %2468 = vmatprep.subr.mxu0 %v2386_v11  ;;  %v2379_v23 = vmax.f32 %v2339_v62, 0.0 }
 0x34f   :  { %2469 = vmatpush1.msra.mxu0 %v2385_v56  ;;  %v2353_v2 = vadd.f32 %v2352_v46, %v2111_v40  ;;  %v2387_v40 = vmax.f32 %v2351_v29, 0.0  ;;  %v2383_v39 = vmax.f32 %v2345_v44, 0.0  ;;  %v2367_v46 = vmax.f32 %v2321_v42, 0.0 }
 0x350   :  { %v2356_v58 = vpop.f32.mrf.mxu1  ;;  %2470 = vmatprep.subr.mxu0 %v2382_v6  ;;  %v2371_v6 = vmax.f32 %v2327_v45, 0.0 }
 0x351   :  { %2471 = vmatpush1.msra.mxu0 %v2381_v34  ;;  %v2357_v38 = vadd.f32 %v2356_v58, %v2116_v19  ;;  %v2388_v11 = vmax.f32 %v2353_v2, 0.0 }
 0x352   :  { %v2358_v1 = vpop.f32.mrf.mxu1  ;;  %2472 = vmatprep.subr.mxu0 %v2378_v49 }
 0x353   :  { %v2359_v53 = vadd.f32 %v2358_v1, %v2116_v19  ;;  %2473 = vmatpush1.msra.mxu0 %v2377_v17  ;;  %v2391_v61 = vmax.f32 %v2357_v38, 0.0  ;;  %v2341_v19 = vadd.f32 %v2340_v13, %v4804_v52  ;;  %v2333_v13 = vadd.f32 %v4798_v41, %v4806_v24  ;;  %v2426_v1 = vpop.permute.xlu1 %2425 }
 0x354   :  { %2474 = vmatprep.subr.mxu0 %v2374_v33  ;;  %v2323_v41 = vadd.f32 %v4790_v50, %v4816_v37  ;;  %v2376_v24 = vmax.f32 %v2335_v57, 0.0 }
 0x355   :  { %v2392_v5 = vmax.f32 %v2359_v53, 0.0  ;;  %2475 = vmatpush1.msra.mxu0 %v2373_v9  ;;  %v2380_v52 = vmax.f32 %v2341_v19, 0.0  ;;  %v2375_v56 = vmax.f32 %v2333_v13, 0.0 }
 0x356   :  { %2476 = vmatprep.subr.mxu0 %v2370_v54  ;;  %v2368_v50 = vmax.f32 %v2323_v41, 0.0 }
 0x357   :  { %2579 = vmatprep.subr.mxu1 %v2392_v5  ;;  %2477 = vmatpush1.msra.mxu0 %v2369_v25  ;;  %v4916_v31 = vpop.permute.xlu1 %2415 }
 0x358   :  { %2580 = vmatpush1.msra.mxu1 %v2391_v61  ;;  %2478 = vmatprep.subr.mxu0 %v2366_v21 }
 0x359   :  { %2581 = vmatprep.subr.mxu1 %v2388_v11  ;;  %2479 = vmatpush1.msra.mxu0 %v2365_v26 }
 0x35a   :  { %2582 = vmatpush1.msra.mxu1 %v2387_v40  ;;  %2480 = vmatprep.subr.mxu0 %v2362_v47  ;;  %v4918_v47 = vpop.permute.xlu0 %2410 }
 0x35b   :  { %2583 = vmatprep.subr.mxu1 %v2384_v36  ;;  %2481 = vmatpush1.msra.mxu0 %v2361_v3  ;;  %v4921_v13 = vpop.permute.xlu1 %2405 }
 0x35c   :  { %2584 = vmatpush1.msra.mxu1 %v2383_v39  ;;  %3192 = vmatmul.mubr.msk.f32.vlgmr.msra.gmra.mxu0 %vm2433_vm4, %v4726_v12 }
 0x35d   :  { %2585 = vmatprep.subr.mxu1 %v2380_v52  ;;  %2520 = vmatprep.mubr.f32.mxu0 %v3344_v0 }
 0x35e   :  { %2586 = vmatpush1.msra.mxu1 %v2379_v23 }
 0x35f   :  { %2587 = vmatprep.subr.mxu1 %v2376_v24 }
 0x360   :  { %2588 = vmatpush1.msra.mxu1 %v2375_v56  ;;  %3193 = vmatmul.mubr.msk.f32.gmra.mxu0 %vm2433_vm4, %v4724_v35 }
 0x361   :  { %2589 = vmatprep.subr.mxu1 %v2372_v28  ;;  %2526 = vmatprep.mubr.f32.mxu0 %v3344_v0  ;;  %v2401_v28 = vpop.permute.xlu0 %2400 }
 0x362   :  { %2590 = vmatpush1.msra.mxu1 %v2371_v6 }
 0x363   :  { %2591 = vmatprep.subr.mxu1 %v2368_v50 }
 0x364   :  { %2592 = vmatpush1.msra.mxu1 %v2367_v46  ;;  %3194 = vmatmul.mubr.msk.f32.gmra.mxu0 %vm2433_vm4, %v4720_v32 }
 0x365   :  { %2593 = vmatprep.subr.mxu1 %v2364_v60  ;;  %2532 = vmatprep.mubr.f32.mxu0 %v3344_v0 }
 0x366   :  { %2594 = vmatpush1.msra.mxu1 %v2363_v55 }
 0x367   :  { %3200 = vmatmul.mubr.msk.f32.vlgmr.msra.gmra.mxu1 %vm2433_vm4, %v4726_v12 }
 0x368   :  { %2633 = vmatprep.mubr.f32.mxu1 %v3344_v0  ;;  %3195 = vmatmul.mubr.msk.f32.gmra.mxu0 %vm2433_vm4, %v4718_v30 }
 0x369   :  { %2538 = vmatprep.mubr.f32.mxu0 %v3344_v0 }
 0x36b   :  { %3201 = vmatmul.mubr.msk.f32.gmra.mxu1 %vm2433_vm4, %v4724_v35 }
 0x36c   :  { %2639 = vmatprep.mubr.f32.mxu1 %v3344_v0  ;;  %3196 = vmatmul.mubr.msk.f32.gmra.mxu0 %vm2433_vm4, %v4714_v43 }
 0x36d   :  { %2544 = vmatprep.mubr.f32.mxu0 %v3344_v0 }
 0x36f   :  { %3202 = vmatmul.mubr.msk.f32.gmra.mxu1 %vm2433_vm4, %v4720_v32 }
 0x370   :  { %2645 = vmatprep.mubr.f32.mxu1 %v3344_v0  ;;  %3197 = vmatmul.mubr.msk.f32.gmra.mxu0 %vm2433_vm4, %v4712_v7 }
 0x371   :  { %2550 = vmatprep.mubr.f32.mxu0 %v3344_v0 }
 0x373   :  { %3203 = vmatmul.mubr.msk.f32.gmra.mxu1 %vm2433_vm4, %v4718_v30  ;;  %v3346_v30 = vmov 0  }
 0x374   :  { %2651 = vmatprep.mubr.f32.mxu1 %v3344_v0  ;;  %3198 = vmatmul.mubr.msk.f32.gmra.mxu0 %vm2433_vm4, %v4708_v4 }
 0x375   :  { %2556 = vmatprep.mubr.f32.mxu0 %v3344_v0  ;;  %3255 = vset.pattern.permute.xlu0 %v3346_v30 }
 0x377   :  { %3204 = vmatmul.mubr.msk.f32.gmra.mxu1 %vm2433_vm4, %v4714_v43  ;;  %v57_v43 = vld [vmem:[#allocation5 + $0x1] sm:$0x1] }
 0x378   :  { %2657 = vmatprep.mubr.f32.mxu1 %v3344_v0  ;;  %3199 = vmatmul.mubr.msk.f32.gmra.mxu0 %vm2433_vm4, %v4706_v63 }
 0x379   :  { %2780 = vmatprep.mubr.f32.mxu0 %v3344_v0  ;;  %2710 = vperm.xlu0 %3255, %v57_v43   ;;  %v2396_v43 = vpop.permute.xlu1 %2395 }
 0x37b   :  { %3205 = vmatmul.mubr.msk.f32.gmra.mxu1 %vm2433_vm4, %v4712_v7 }
 0x37c   :  { %2663 = vmatprep.mubr.f32.mxu1 %v3344_v0 }
 0x37f   :  { %3206 = vmatmul.mubr.msk.f32.gmra.mxu1 %vm2433_vm4, %v4708_v4 }
 0x380   :  { %2669 = vmatprep.mubr.f32.mxu1 %v3344_v0 }
 0x383   :  { %3207 = vmatmul.mubr.msk.f32.gmra.mxu1 %vm2433_vm4, %v4706_v63 }
 0x384   :  { %2851 = vmatprep.mubr.f32.mxu1 %v3344_v0 }
 0x41c   :  { %v4892_v32 = vpop.f32.mrf.mxu0 }
 0x41e   :  { %v4894_v35 = vpop.f32.mrf.mxu0 }
 0x420   :  { %v4896_v7 = vpop.f32.mrf.mxu0 }
 0x421   :  { %v2523_v30 = vadd.f32 %v4896_v7, %v2401_v28 }
 0x422   :  { %v2524_v12 = vpop.f32.mrf.mxu0 }
 0x423   :  { %v2525_v50 = vadd.f32 %v2524_v12, %v2401_v28  ;;  %v2680_v7 = vmax.f32 %v2523_v30, 0.0 }
 0x424   :  { %v2528_v15 = vpop.f32.mrf.mxu0 }
 0x425   :  { %v2529_v27 = vadd.f32 %v2528_v15, %v4921_v13  ;;  %v2517_v15 = vadd.f32 %v4892_v32, %v2396_v43 }
 0x426   :  { %v2530_v4 = vpop.f32.mrf.mxu0 }
 0x427   :  { %v4898_v16 = vpop.f32.mrf.mxu1  ;;  %v2531_v42 = vadd.f32 %v2530_v4, %v4921_v13  ;;  %v2519_v4 = vadd.f32 %v4894_v35, %v2396_v43  ;;  %v2676_v32 = vmax.f32 %v2517_v15, 0.0 }
 0x428   :  { %v2534_v34 = vpop.f32.mrf.mxu0 }
 0x429   :  { %v4900_v37 = vpop.f32.mrf.mxu1  ;;  %v2535_v41 = vadd.f32 %v2534_v34, %v4918_v47  ;;  %v2677_v35 = vmax.f32 %v2519_v4, 0.0 }
 0x42a   :  { %v2536_v63 = vpop.f32.mrf.mxu0 }
 0x42b   :  { %v4902_v0 = vpop.f32.mrf.mxu1  ;;  %v2537_v52 = vadd.f32 %v2536_v63, %v4918_v47  ;;  %v2688_v34 = vmax.f32 %v2535_v41, 0.0 }
 0x42c   :  { %v2540_v59 = vpop.f32.mrf.mxu0 }
 0x42d   :  { %v4904_v49 = vpop.f32.mrf.mxu1  ;;  %v2541_v39 = vadd.f32 %v2540_v59, %v4916_v31  ;;  %v2689_v46 = vmax.f32 %v2537_v52, 0.0 }
 0x42e   :  { %v2542_v58 = vpop.f32.mrf.mxu0 }
 0x42f   :  { %v4906_v48 = vpop.f32.mrf.mxu1  ;;  %v2543_v3 = vadd.f32 %v2542_v58, %v4916_v31  ;;  %v2692_v6 = vmax.f32 %v2541_v39, 0.0  ;;  %v2685_v58 = vmax.f32 %v2531_v42, 0.0  ;;  %v2867_v39 = vlaneseq }
 0x430   :  { %v2546_v17 = vpop.f32.mrf.mxu0 }
 0x431   :  { %v4908_v8 = vpop.f32.mrf.mxu1  ;;  %v2547_v62 = vadd.f32 %v2546_v17, %v2421_v51  ;;  %v2693_v56 = vmax.f32 %v2543_v3, 0.0  ;;  %vm2889_vm1 = vcmp.lt.s32.totalorder %v2867_v39, 512 }
 0x432   :  { %v2548_v33 = vpop.f32.mrf.mxu0 }
 0x433   :  { %v4910_v38 = vpop.f32.mrf.mxu1  ;;  %v2549_v26 = vadd.f32 %v2548_v33, %v2421_v51  ;;  %v2696_v24 = vmax.f32 %v2547_v62, 0.0  ;;  %v2684_v33 = vmax.f32 %v2529_v27, 0.0 }
 0x434   :  { %v2552_v10 = vpop.f32.mrf.mxu0 }
 0x435   :  { %v4912_v9 = vpop.f32.mrf.mxu1  ;;  %v2553_v61 = vadd.f32 %v2552_v10, %v2426_v1  ;;  %v2697_v45 = vmax.f32 %v2549_v26, 0.0  ;;  %v2642_v26 = vadd.f32 %v4906_v48, %v4921_v13 }
 0x436   :  { %v2554_v2 = vpop.f32.mrf.mxu0 }
 0x437   :  { %v4914_v53 = vpop.f32.mrf.mxu1  ;;  %v2555_v21 = vadd.f32 %v2554_v2, %v2426_v1  ;;  %v2700_v14 = vmax.f32 %v2553_v61, 0.0  ;;  %v2681_v2 = vmax.f32 %v2525_v50, 0.0  ;;  %v2686_v3 = vmax.f32 %v2642_v26, 0.0 }
 0x438   :  { %v2558_v54 = vpop.f32.mrf.mxu0 }
 0x439   :  { %v2655_v29 = vpop.f32.mrf.mxu1  ;;  %v2559_v25 = vadd.f32 %v2558_v54, %v2431_v20  ;;  %v2701_v36 = vmax.f32 %v2555_v21, 0.0 }
 0x43a   :  { %v2560_v18 = vpop.f32.mrf.mxu0 }
 0x43b   :  { %v2659_v5 = vpop.f32.mrf.mxu1  ;;  %v2561_v44 = vadd.f32 %v2560_v18, %v2431_v20  ;;  %v2704_v40 = vmax.f32 %v2559_v25, 0.0  ;;  %v2656_v18 = vadd.f32 %v2655_v29, %v4916_v31  ;;  %v2648_v29 = vadd.f32 %v4910_v38, %v4918_v47 }
 0x43c   :  { %v2660_v54 = vadd.f32 %v2659_v5, %v2421_v51  ;;  %v56_v5 = vld [vmem:[#allocation5] sm:$0x1]  ;;  %v2636_v38 = vadd.f32 %v4902_v0, %v2401_v28 }
 0x43d   :  { %v2661_v19 = vpop.f32.mrf.mxu1  ;;  %v2705_v11 = vmax.f32 %v2561_v44, 0.0  ;;  %v2650_v44 = vadd.f32 %v4912_v9, %v4918_v47  ;;  %v2690_v47 = vmax.f32 %v2648_v29, 0.0 }
 0x43e   :  { %v2662_v12 = vadd.f32 %v2661_v19, %v2421_v51  ;;  %v2698_v61 = vmax.f32 %v2660_v54, 0.0  ;;  %v2638_v19 = vadd.f32 %v4904_v49, %v2401_v28 }
 0x43f   :  { %v2665_v57 = vpop.f32.mrf.mxu1  ;;  %2732 = vmatprep.subr.mxu0 %v2705_v11  ;;  %v2691_v11 = vmax.f32 %v2650_v44, 0.0 }
 0x440   :  { %2733 = vmatpush1.msra.mxu0 %v2704_v40  ;;  %v2666_v17 = vadd.f32 %v2665_v57, %v2426_v1  ;;  %v2699_v51 = vmax.f32 %v2662_v12, 0.0  ;;  %v2630_v40 = vadd.f32 %v4898_v16, %v2396_v43  ;;  %v2683_v48 = vmax.f32 %v2638_v19, 0.0  ;;  %v2711_v16 = vpop.permute.xlu0 %2710 }
 0x441   :  { %v2667_v23 = vpop.f32.mrf.mxu1  ;;  %2734 = vmatprep.subr.mxu0 %v2701_v36  ;;  %v2682_v57 = vmax.f32 %v2636_v38, 0.0 }
 0x442   :  { %2735 = vmatpush1.msra.mxu0 %v2700_v14  ;;  %v2668_v63 = vadd.f32 %v2667_v23, %v2426_v1  ;;  %v2654_v1 = vadd.f32 %v4914_v53, %v4916_v31  ;;  %v2702_v21 = vmax.f32 %v2666_v17, 0.0  ;;  %v2644_v53 = vadd.f32 %v4908_v8, %v4921_v13 }
 0x443   :  { %v2671_v22 = vpop.f32.mrf.mxu1  ;;  %2736 = vmatprep.subr.mxu0 %v2697_v45  ;;  %v2695_v31 = vmax.f32 %v2656_v18, 0.0  ;;  %v2632_v8 = vadd.f32 %v4900_v37, %v2396_v43  ;;  %v2678_v49 = vmax.f32 %v2630_v40, 0.0  ;;  %v3347_v37 = vmov 1966171168  }
 0x444   :  { %2737 = vmatpush1.msra.mxu0 %v2696_v24  ;;  %v2672_v60 = vadd.f32 %v2671_v22, %v2431_v20  ;;  %v2694_v9 = vmax.f32 %v2654_v1, 0.0  ;;  %v2687_v62 = vmax.f32 %v2644_v53, 0.0  ;;  %v2865_v13 = vunpack.c.l.s4 %v3347_v37 }
 0x445   :  { %v2673_v55 = vpop.f32.mrf.mxu1  ;;  %2738 = vmatprep.subr.mxu0 %v2693_v56  ;;  %v2679_v36 = vmax.f32 %v2632_v8, 0.0  ;;  %v2868_v23 = vshrl.u32 %v2867_v39, 7 }
 0x446   :  { %v2674_v59 = vadd.f32 %v2673_v55, %v2431_v20  ;;  %2739 = vmatpush1.msra.mxu0 %v2692_v6  ;;  %v2706_v25 = vmax.f32 %v2672_v60, 0.0  ;;  %v2703_v20 = vmax.f32 %v2668_v63, 0.0  ;;  %v2866_v45 = vunpack.c.0.s8 %v2865_v13 }
 0x447   :  { %2740 = vmatprep.subr.mxu0 %v2689_v46 }
 0x448   :  { %v2707_v10 = vmax.f32 %v2674_v59, 0.0  ;;  %2741 = vmatpush1.msra.mxu0 %v2688_v34  ;;  %v2869_v56 = vsub.s32 %v2866_v45, %v2868_v23 }
 0x449   :  { %2742 = vmatprep.subr.mxu0 %v2685_v58 }
 0x44a   :  { %2803 = vmatprep.subr.mxu1 %v2707_v10  ;;  %2743 = vmatpush1.msra.mxu0 %v2684_v33 }
 0x44b   :  { %2804 = vmatpush1.msra.mxu1 %v2706_v25  ;;  %2744 = vmatprep.subr.mxu0 %v2681_v2 }
 0x44c   :  { %2805 = vmatprep.subr.mxu1 %v2703_v20  ;;  %2745 = vmatpush1.msra.mxu0 %v2680_v7 }
 0x44d   :  { %2806 = vmatpush1.msra.mxu1 %v2702_v21  ;;  %2746 = vmatprep.subr.mxu0 %v2677_v35 }
 0x44e   :  { %2807 = vmatprep.subr.mxu1 %v2699_v51  ;;  %2747 = vmatpush1.msra.mxu0 %v2676_v32 }
 0x44f   :  { %2808 = vmatpush1.msra.mxu1 %v2698_v61  ;;  %3208 = vmatmul.mubr.msk.f32.vlgmr.msra.gmra.mxu0 %vm2433_vm4, %v56_v5 }
 0x450   :  { %2809 = vmatprep.subr.mxu1 %v2695_v31 }
 0x451   :  { %2810 = vmatpush1.msra.mxu1 %v2694_v9 }
 0x452   :  { %2811 = vmatprep.subr.mxu1 %v2691_v11 }
 0x453   :  { %2812 = vmatpush1.msra.mxu1 %v2690_v47 }
 0x454   :  { %2813 = vmatprep.subr.mxu1 %v2687_v62 }
 0x455   :  { %2814 = vmatpush1.msra.mxu1 %v2686_v3 }
 0x456   :  { %2815 = vmatprep.subr.mxu1 %v2683_v48 }
 0x457   :  { %2816 = vmatpush1.msra.mxu1 %v2682_v57 }
 0x458   :  { %2817 = vmatprep.subr.mxu1 %v2679_v36 }
 0x459   :  { %2818 = vmatpush1.msra.mxu1 %v2678_v49 }
 0x45a   :  { %3209 = vmatmul.mubr.msk.f32.vlgmr.msra.gmra.mxu1 %vm2433_vm4, %v56_v5 }
 0x50f   :  { %v2782_v0 = vpop.f32.mrf.mxu0 }
 0x510   :  { %v2783_v41 = vadd.f32 %v2782_v0, %v2711_v16 }
 0x511   :  { %v2784_v14 = vpop.f32.mrf.mxu0 }
 0x512   :  { %v2785_v52 = vadd.f32 %v2784_v14, %v2711_v16 }
 0x514   :  { %v2862_v42 = vcombine.low %v2783_v41, %v2785_v52 }
 0x516   :  { %v2870_v6 = vrot.slane %v2862_v42, %v2869_v56 }
 0x51a   :  { %v2853_v24 = vpop.f32.mrf.mxu1 }
 0x51b   :  { %v2854_v28 = vadd.f32 %v2853_v24, %v2711_v16 }
 0x51c   :  { %v2855_v22 = vpop.f32.mrf.mxu1 }
 0x51d   :  { %v2856_v27 = vadd.f32 %v2855_v22, %v2711_v16 }
 0x51f   :  { %v2863_v50 = vcombine.low %v2854_v28, %v2856_v27 }
 0x521   :  { %v2877_v46 = vrot.slane %v2863_v50, %v2869_v56 }
 0x523   :  { %v2878_v60 = vcombine.low %v2870_v6, %v2877_v46 }
 0x525   :  { %v2885_v55 = vrot.slane %v2878_v60, %v2869_v56 }
 0x527   :  { %2891 = vst.msk [vmem:[#allocation7] sm:$0xf] %vm2889_vm1, %v2885_v55 }
 0x528   :  { %3323 = shalt.err (!%p3320_p0)
}
 0x529   :  { %2901 = dma.vmem_to_hbm [thread:$0]  %s2899_s1, 64, %s4953_s2, [#allocation4]  }
 0x52a   :  { %3336 = dma.done.wait [#allocation4], 64  }
 0x52b   :  { %3337 = vsyncadd [#allocation4], 4294967232 }
 0x52c   :  { %2905 = vsyncpa [#allocation3], 1 }
 0x52d   :  { %2906 = vsyncpa [#allocation6], 1 }
 0x52e   :  { %2907 = vsyncpa [#allocation4], 1 }

</bundles_post_ra>
